<compile_context>
chip_gen: v5e
topology: v5e:2x2
jax: 0.10.0
libtpu: 0.0.40
codegen_flags: <defaults>
</compile_context>

<pallas_src>
import functools
import math

import jax
import jax.numpy as jnp
from jax import lax
from jax.experimental import pallas as pl
from jax.experimental.pallas import tpu as pltpu

MXU_DTYPE = jnp.bfloat16  # matmul-operand dtype for encoder / final MHA / fc


# ------------------------------ kernel helpers ------------------------------

def _layernorm_f32(x, g, b, eps):
    mu = jnp.mean(x, axis=-1, keepdims=True)
    var = jnp.mean(jnp.square(x - mu), axis=-1, keepdims=True)
    return (x - mu) * lax.rsqrt(var + eps) * g + b


def _softmax_rows(s):
    m = jnp.max(s, axis=-1, keepdims=True)
    p = jnp.exp(s - m)
    return p * pl.reciprocal(jnp.sum(p, axis=-1, keepdims=True), approx=True)


# ------------------------------ fused kernel --------------------------------

def _cosmic_kernel(x_ref, *rest, num_lstm, num_enc, num_heads, eps):
    """Whole forward pass for ONE batch element; all intermediates stay on-chip.

    x_ref: (S, In).  rest = (flat weight refs..., o_ref) in the exact order
    built by cosmic_decoder_forward().  o_ref: (1, output_dim).
    """
    o_ref = rest[-1]
    refs = iter(rest[:-1])
    ld = lambda: next(refs)[...]

    S = x_ref.shape[0]

    # -------------------- LSTM stack (kept in f32) --------------------------
    x = x_ref[...].astype(jnp.float32)                                  # (S, In)
    for _ in range(num_lstm):
        wih, whh, b = ld(), ld(), ld()
        H = whh.shape[0]
        # Hoisted input projection: one matmul for the whole sequence; only
        # h @ W_hh remains on the serial recurrence path.
        gates_x = jnp.dot(x, wih, preferred_element_type=jnp.float32) + b  # (S,4H)
        h = jnp.zeros((1, H), jnp.float32)
        c = jnp.zeros((1, H), jnp.float32)
        hs = []
        # S is small (8) -> full unroll.  Scaling guard: for long sequences
        # switch this to lax.fori_loop carrying (h, c) with a VMEM scratch.
        for t in range(S):
            g = gates_x[t:t + 1, :] + jnp.dot(
                h, whh, preferred_element_type=jnp.float32)              # (1, 4H)
            sig = jax.nn.sigmoid(g)        # transcendentals on the full 4H vreg,
            th = jnp.tanh(g)               # slice the gates afterwards
            i_g, f_g, o_g = sig[:, 0:H], sig[:, H:2 * H], sig[:, 3 * H:4 * H]
            g_g = th[:, 2 * H:3 * H]
            c = f_g * c + i_g * g_g
            h = o_g * jnp.tanh(c)
            hs.append(h)
        # Coalesced: build (S, H) in-register; no per-step (lane-sparse) stores.
        x = jnp.concatenate(hs, axis=0)                                  # (S, H)

    H = x.shape[-1]
    dh = H // num_heads
    scale = 1.0 / math.sqrt(dh)

    def attn_core(q, k, v, w_out, b_out):
        """Per-head attention; heads concatenated, then ONE out-projection."""
        heads = []
        for hh in range(num_heads):
            qh = (q[:, hh * dh:(hh + 1) * dh] * scale).astype(MXU_DTYPE)
            kh = k[:, hh * dh:(hh + 1) * dh].astype(MXU_DTYPE)
            vh = v[:, hh * dh:(hh + 1) * dh].astype(MXU_DTYPE)
            # q @ k^T without an explicit transpose (contract last axes).
            s = lax.dot_general(qh, kh, (((1,), (1,)), ((), ())),
                                preferred_element_type=jnp.float32)      # (Sq,Skv)
            p = _softmax_rows(s).astype(MXU_DTYPE)
            heads.append(jnp.dot(p, vh, preferred_element_type=jnp.float32))
        o = jnp.concatenate(heads, axis=-1).astype(MXU_DTYPE)            # (Sq, H)
        return jnp.dot(o, w_out, preferred_element_type=jnp.float32) + b_out

    # -------------------- TransformerEncoder (post-norm, relu, eval) --------
    for _ in range(num_enc):
        w_in, b_in, w_out, b_out = ld(), ld(), ld(), ld()
        ln1_g, ln1_b = ld(), ld()
        w1, b1, w2, b2 = ld(), ld(), ld(), ld()
        ln2_g, ln2_b = ld(), ld()

        qkv = jnp.dot(x.astype(MXU_DTYPE), w_in,
                      preferred_element_type=jnp.float32) + b_in         # (S, 3H)
        attn = attn_core(qkv[:, 0:H], qkv[:, H:2 * H], qkv[:, 2 * H:3 * H],
                         w_out, b_out)
        y = _layernorm_f32(x + attn, ln1_g, ln1_b, eps)
        ff = jnp.maximum(
            jnp.dot(y.astype(MXU_DTYPE), w1,
                    preferred_element_type=jnp.float32) + b1, 0.0)
        ff = jnp.dot(ff.astype(MXU_DTYPE), w2,
                     preferred_element_type=jnp.float32) + b2
        x = _layernorm_f32(y + ff, ln2_g, ln2_b, eps)

    # -------------------- final MHA (last query only) + fc ------------------
    w_in, b_in, w_out, b_out = ld(), ld(), ld(), ld()
    fc_w, fc_b = ld(), ld()

    x_last = x[S - 1:S, :]                                               # (1, H)
    q = jnp.dot(x_last.astype(MXU_DTYPE), w_in[:, 0:H],
                preferred_element_type=jnp.float32) + b_in[:, 0:H]       # (1, H)
    kv = jnp.dot(x.astype(MXU_DTYPE), w_in[:, H:3 * H],
                 preferred_element_type=jnp.float32) + b_in[:, H:3 * H]  # (S, 2H)
    attn = attn_core(q, kv[:, 0:H], kv[:, H:2 * H], w_out, b_out)        # (1, H)
    out = jnp.dot(attn.astype(MXU_DTYPE), fc_w,
                  preferred_element_type=jnp.float32) + fc_b             # (1, out)
    o_ref[...] = out.astype(o_ref.dtype)


# ------------------------------- wrapper ------------------------------------

def cosmic_decoder_forward(params, x, num_heads=4):
    """x: (B, S, input_dim) batch-first, like the PyTorch module."""
    B, S, In = x.shape
    out_dim = params["fc_w"].shape[1]

    def mm(w):   # MXU-operand weights -> bf16 (single-pass MXU, half DMA bytes)
        return w.astype(MXU_DTYPE)

    def row(v):  # 1-D params -> (1, N) lane-major rows
        return v.reshape(1, -1)

    # Flat weight list; order must match the kernel's unpack order exactly.
    flat = []
    for lp in params["lstm"]:                         # LSTM stays f32 (see kernel)
        flat += [lp["wih"], lp["whh"], row(lp["b"])]
    for ep in params["encoder"]:
        a = ep["attn"]
        flat += [mm(a["w_in"]), row(a["b_in"]), mm(a["w_out"]), row(a["b_out"]),
                 row(ep["ln1_g"]), row(ep["ln1_b"]),
                 mm(ep["w1"]), row(ep["b1"]), mm(ep["w2"]), row(ep["b2"]),
                 row(ep["ln2_g"]), row(ep["ln2_b"])]
    a = params["mha"]
    flat += [mm(a["w_in"]), row(a["b_in"]), mm(a["w_out"]), row(a["b_out"])]
    flat += [mm(params["fc_w"]), row(params["fc_b"])]

    def const_spec(shape):
        # Full-shape block with a constant index_map: weight lives in VMEM and
        # is DMA'd once (block index never changes across the batch grid).
        n = len(shape)
        return pl.BlockSpec(shape, lambda b, n=n: (0,) * n)

    in_specs = ([pl.BlockSpec((None, S, In), lambda b: (b, 0, 0))]
                + [const_spec(w.shape) for w in flat])

    kernel = functools.partial(_cosmic_kernel,
                               num_lstm=len(params["lstm"]),
                               num_enc=len(params["encoder"]),
                               num_heads=num_heads, eps=1e-5)
    out = pl.pallas_call(
        kernel,
        out_shape=jax.ShapeDtypeStruct((B, 1, out_dim), x.dtype),
        grid=(B,),
        in_specs=in_specs,
        out_specs=pl.BlockSpec((None, 1, out_dim), lambda b: (b, 0, 0)),
        compiler_params=pltpu.CompilerParams(
            dimension_semantics=("parallel",)),  # both TCs on v7x; no-op v5e/v6e
    )(x, *flat)
    return out.reshape(B, out_dim)


# ------------------------------ parameters ----------------------------------

def init_params(key, input_dim, hidden_dim, num_layers, output_dim):
    keys = iter(jax.random.split(key, 256))

    def nrm(shape, scale=0.08):
        return scale * jax.random.normal(next(keys), shape, dtype=jnp.float32)

    H = hidden_dim
    params = {}

    lstm = []
    in_dim = input_dim
    for _ in range(num_layers):
        lstm.append(dict(wih=nrm((in_dim, 4 * H)),
                         whh=nrm((H, 4 * H)),
                         b=nrm((4 * H,))))      # b_ih + b_hh combined
        in_dim = H
    params["lstm"] = lstm

    def attn_params():
        return dict(w_in=nrm((H, 3 * H)), b_in=nrm((3 * H,)),
                    w_out=nrm((H, H)), b_out=nrm((H,)))

    enc = []
    for _ in range(2):
        enc.append(dict(
            attn=attn_params(),
            ln1_g=jnp.ones((H,), jnp.float32), ln1_b=jnp.zeros((H,), jnp.float32),
            w1=nrm((H, 2 * H)), b1=nrm((2 * H,)),
            w2=nrm((2 * H, H)), b2=nrm((H,)),
            ln2_g=jnp.ones((H,), jnp.float32), ln2_b=jnp.zeros((H,), jnp.float32),
        ))
    params["encoder"] = enc
    params["mha"] = attn_params()
    params["fc_w"] = nrm((H, output_dim))
    params["fc_b"] = nrm((output_dim,))
    return params


# ---------------------- pure-JAX f32 reference (for check) ------------------

def reference_forward(params, x, num_heads=4):
    B, S, _ = x.shape
    h = jnp.transpose(x, (1, 0, 2)).astype(jnp.float32)        # (S, B, In)
    for lp in params["lstm"]:
        H = lp["whh"].shape[0]
        gates_x = jnp.einsum("sbi,ig->sbg", h, lp["wih"]) + lp["b"]
        ht = jnp.zeros((B, H), jnp.float32)
        ct = jnp.zeros((B, H), jnp.float32)
        hs = []
        for t in range(S):
            g = gates_x[t] + ht @ lp["whh"]
            i_g = jax.nn.sigmoid(g[:, :H]); f_g = jax.nn.sigmoid(g[:, H:2 * H])
            g_g = jnp.tanh(g[:, 2 * H:3 * H]); o_g = jax.nn.sigmoid(g[:, 3 * H:])
            ct = f_g * ct + i_g * g_g
            ht = o_g * jnp.tanh(ct)
            hs.append(ht)
        h = jnp.stack(hs, axis=0)                              # (S, B, H)

    H = h.shape[-1]
    dh = H // num_heads
    scale = 1.0 / math.sqrt(dh)

    def mha(x_sbh, p):
        qkv = jnp.einsum("sbh,hk->sbk", x_sbh, p["w_in"]) + p["b_in"]
        q, k, v = jnp.split(qkv, 3, axis=-1)

        def heads(t):                                          # -> (B, nh, S, dh)
            return t.reshape(S, B, num_heads, dh).transpose(1, 2, 0, 3)

        s = jnp.einsum("bnqd,bnkd->bnqk", heads(q) * scale, heads(k))
        pr = jax.nn.softmax(s, axis=-1)
        o = jnp.einsum("bnqk,bnkd->bnqd", pr, heads(v))
        o = o.transpose(2, 0, 1, 3).reshape(S, B, H)
        return jnp.einsum("sbh,ho->sbo", o, p["w_out"]) + p["b_out"]

    def ln(t, g, b, eps=1e-5):
        mu = jnp.mean(t, -1, keepdims=True)
        var = jnp.mean(jnp.square(t - mu), -1, keepdims=True)
        return (t - mu) * jax.lax.rsqrt(var + eps) * g + b

    for ep in params["encoder"]:
        a = mha(h, ep["attn"])
        h = ln(h + a, ep["ln1_g"], ep["ln1_b"])
        ff = jnp.maximum(jnp.einsum("sbh,hf->sbf", h, ep["w1"]) + ep["b1"], 0.0)
        ff = jnp.einsum("sbf,fh->sbh", ff, ep["w2"]) + ep["b2"]
        h = ln(h + ff, ep["ln2_g"], ep["ln2_b"])

    a = mha(h, params["mha"])                                  # (S, B, H)
    return a[S - 1] @ params["fc_w"] + params["fc_b"]          # (B, output_dim)


# --------------------------------- main --------------------------------------

if __name__ == "__main__":
    B, S = 2, 8
    input_dim, hidden_dim, num_layers, output_dim = 16, 32, 2, 8

    key = jax.random.PRNGKey(0)
    pkey, xkey = jax.random.split(key)
    params = init_params(pkey, input_dim, hidden_dim, num_layers, output_dim)
    x = jax.random.normal(xkey, (B, S, input_dim), dtype=jnp.float32)

    out = jax.jit(cosmic_decoder_forward)(params, x)
    jax.block_until_ready(out)
    assert out.shape == (B, output_dim), out.shape
    assert out.dtype == jnp.float32

    ref = reference_forward(params, x)
    max_err = float(jnp.max(jnp.abs(out - ref)))
    # Tolerance loosened vs. the all-f32 version (<5e-3): matmul operands in the
    # transformer/MHA/fc path are bf16 (per perf review) and the softmax uses
    # pl.reciprocal(approx=True); the LSTM path remains exact f32.
    assert max_err < 2.5e-2, f"max abs error vs pure-JAX f32 reference: {max_err}"
    print("KERNEL_OK")
</pallas_src>

<mosaic_0001>
module attributes {stable_mosaic.version = 11 : i64} {
  func.func @_cosmic_kernel(%arg0: i32, %arg1: memref<1x8x16xf32, #tpu.memory_space<vmem>>, %arg2: memref<16x128xf32, #tpu.memory_space<vmem>>, %arg3: memref<32x128xf32, #tpu.memory_space<vmem>>, %arg4: memref<1x128xf32, #tpu.memory_space<vmem>>, %arg5: memref<32x128xf32, #tpu.memory_space<vmem>>, %arg6: memref<32x128xf32, #tpu.memory_space<vmem>>, %arg7: memref<1x128xf32, #tpu.memory_space<vmem>>, %arg8: memref<32x96xbf16, #tpu.memory_space<vmem>>, %arg9: memref<1x96xf32, #tpu.memory_space<vmem>>, %arg10: memref<32x32xbf16, #tpu.memory_space<vmem>>, %arg11: memref<1x32xf32, #tpu.memory_space<vmem>>, %arg12: memref<1x32xf32, #tpu.memory_space<vmem>>, %arg13: memref<1x32xf32, #tpu.memory_space<vmem>>, %arg14: memref<32x64xbf16, #tpu.memory_space<vmem>>, %arg15: memref<1x64xf32, #tpu.memory_space<vmem>>, %arg16: memref<64x32xbf16, #tpu.memory_space<vmem>>, %arg17: memref<1x32xf32, #tpu.memory_space<vmem>>, %arg18: memref<1x32xf32, #tpu.memory_space<vmem>>, %arg19: memref<1x32xf32, #tpu.memory_space<vmem>>, %arg20: memref<32x96xbf16, #tpu.memory_space<vmem>>, %arg21: memref<1x96xf32, #tpu.memory_space<vmem>>, %arg22: memref<32x32xbf16, #tpu.memory_space<vmem>>, %arg23: memref<1x32xf32, #tpu.memory_space<vmem>>, %arg24: memref<1x32xf32, #tpu.memory_space<vmem>>, %arg25: memref<1x32xf32, #tpu.memory_space<vmem>>, %arg26: memref<32x64xbf16, #tpu.memory_space<vmem>>, %arg27: memref<1x64xf32, #tpu.memory_space<vmem>>, %arg28: memref<64x32xbf16, #tpu.memory_space<vmem>>, %arg29: memref<1x32xf32, #tpu.memory_space<vmem>>, %arg30: memref<1x32xf32, #tpu.memory_space<vmem>>, %arg31: memref<1x32xf32, #tpu.memory_space<vmem>>, %arg32: memref<32x96xbf16, #tpu.memory_space<vmem>>, %arg33: memref<1x96xf32, #tpu.memory_space<vmem>>, %arg34: memref<32x32xbf16, #tpu.memory_space<vmem>>, %arg35: memref<1x32xf32, #tpu.memory_space<vmem>>, %arg36: memref<32x8xbf16, #tpu.memory_space<vmem>>, %arg37: memref<1x8xf32, #tpu.memory_space<vmem>>, %arg38: memref<1x1x8xf32, #tpu.memory_space<vmem>>) attributes {dimension_semantics = [#tpu.dimension_semantics<parallel>], iteration_bounds = array<i64: 2>, scalar_prefetch = 0 : i64, scratch_operands = 0 : i64, tpu.core_type = #tpu.core_type<tc>, window_params = [{transform_indices = @transform_0, window_bounds = array<i64: 1, 8, 16>}, {pipeline_mode = #tpu.pipeline_mode<synchronous>, transform_indices = @transform_1, window_bounds = array<i64: 16, 128>}, {pipeline_mode = #tpu.pipeline_mode<synchronous>, transform_indices = @transform_2, window_bounds = array<i64: 32, 128>}, {pipeline_mode = #tpu.pipeline_mode<synchronous>, transform_indices = @transform_3, window_bounds = array<i64: 1, 128>}, {pipeline_mode = #tpu.pipeline_mode<synchronous>, transform_indices = @transform_4, window_bounds = array<i64: 32, 128>}, {pipeline_mode = #tpu.pipeline_mode<synchronous>, transform_indices = @transform_5, window_bounds = array<i64: 32, 128>}, {pipeline_mode = #tpu.pipeline_mode<synchronous>, transform_indices = @transform_6, window_bounds = array<i64: 1, 128>}, {pipeline_mode = #tpu.pipeline_mode<synchronous>, transform_indices = @transform_7, window_bounds = array<i64: 32, 96>}, {pipeline_mode = #tpu.pipeline_mode<synchronous>, transform_indices = @transform_8, window_bounds = array<i64: 1, 96>}, {pipeline_mode = #tpu.pipeline_mode<synchronous>, transform_indices = @transform_9, window_bounds = array<i64: 32, 32>}, {pipeline_mode = #tpu.pipeline_mode<synchronous>, transform_indices = @transform_10, window_bounds = array<i64: 1, 32>}, {pipeline_mode = #tpu.pipeline_mode<synchronous>, transform_indices = @transform_11, window_bounds = array<i64: 1, 32>}, {pipeline_mode = #tpu.pipeline_mode<synchronous>, transform_indices = @transform_12, window_bounds = array<i64: 1, 32>}, {pipeline_mode = #tpu.pipeline_mode<synchronous>, transform_indices = @transform_13, window_bounds = array<i64: 32, 64>}, {pipeline_mode = #tpu.pipeline_mode<synchronous>, transform_indices = @transform_14, window_bounds = array<i64: 1, 64>}, {pipeline_mode = #tpu.pipeline_mode<synchronous>, transform_indices = @transform_15, window_bounds = array<i64: 64, 32>}, {pipeline_mode = #tpu.pipeline_mode<synchronous>, transform_indices = @transform_16, window_bounds = array<i64: 1, 32>}, {pipeline_mode = #tpu.pipeline_mode<synchronous>, transform_indices = @transform_17, window_bounds = array<i64: 1, 32>}, {pipeline_mode = #tpu.pipeline_mode<synchronous>, transform_indices = @transform_18, window_bounds = array<i64: 1, 32>}, {pipeline_mode = #tpu.pipeline_mode<synchronous>, transform_indices = @transform_19, window_bounds = array<i64: 32, 96>}, {pipeline_mode = #tpu.pipeline_mode<synchronous>, transform_indices = @transform_20, window_bounds = array<i64: 1, 96>}, {pipeline_mode = #tpu.pipeline_mode<synchronous>, transform_indices = @transform_21, window_bounds = array<i64: 32, 32>}, {pipeline_mode = #tpu.pipeline_mode<synchronous>, transform_indices = @transform_22, window_bounds = array<i64: 1, 32>}, {pipeline_mode = #tpu.pipeline_mode<synchronous>, transform_indices = @transform_23, window_bounds = array<i64: 1, 32>}, {pipeline_mode = #tpu.pipeline_mode<synchronous>, transform_indices = @transform_24, window_bounds = array<i64: 1, 32>}, {pipeline_mode = #tpu.pipeline_mode<synchronous>, transform_indices = @transform_25, window_bounds = array<i64: 32, 64>}, {pipeline_mode = #tpu.pipeline_mode<synchronous>, transform_indices = @transform_26, window_bounds = array<i64: 1, 64>}, {pipeline_mode = #tpu.pipeline_mode<synchronous>, transform_indices = @transform_27, window_bounds = array<i64: 64, 32>}, {pipeline_mode = #tpu.pipeline_mode<synchronous>, transform_indices = @transform_28, window_bounds = array<i64: 1, 32>}, {pipeline_mode = #tpu.pipeline_mode<synchronous>, transform_indices = @transform_29, window_bounds = array<i64: 1, 32>}, {pipeline_mode = #tpu.pipeline_mode<synchronous>, transform_indices = @transform_30, window_bounds = array<i64: 1, 32>}, {pipeline_mode = #tpu.pipeline_mode<synchronous>, transform_indices = @transform_31, window_bounds = array<i64: 32, 96>}, {pipeline_mode = #tpu.pipeline_mode<synchronous>, transform_indices = @transform_32, window_bounds = array<i64: 1, 96>}, {pipeline_mode = #tpu.pipeline_mode<synchronous>, transform_indices = @transform_33, window_bounds = array<i64: 32, 32>}, {pipeline_mode = #tpu.pipeline_mode<synchronous>, transform_indices = @transform_34, window_bounds = array<i64: 1, 32>}, {pipeline_mode = #tpu.pipeline_mode<synchronous>, transform_indices = @transform_35, window_bounds = array<i64: 32, 8>}, {pipeline_mode = #tpu.pipeline_mode<synchronous>, transform_indices = @transform_36, window_bounds = array<i64: 1, 8>}, {transform_indices = @transform_37, window_bounds = array<i64: 1, 1, 8>}]} {
    %c0 = arith.constant 0 : index
    %c0_0 = arith.constant 0 : index
    %c0_1 = arith.constant 0 : index
    %0 = vector.load %arg1[%c0, %c0_0, %c0_1] : memref<1x8x16xf32, #tpu.memory_space<vmem>>, vector<1x8x16xf32>
    %1 = vector.shape_cast %0 : vector<1x8x16xf32> to vector<8x16xf32>
    %c0_2 = arith.constant 0 : index
    %c0_3 = arith.constant 0 : index
    %2 = vector.load %arg2[%c0_2, %c0_3] : memref<16x128xf32, #tpu.memory_space<vmem>>, vector<16x128xf32>
    %c0_4 = arith.constant 0 : index
    %c0_5 = arith.constant 0 : index
    %3 = vector.load %arg3[%c0_4, %c0_5] : memref<32x128xf32, #tpu.memory_space<vmem>>, vector<32x128xf32>
    %c0_6 = arith.constant 0 : index
    %c0_7 = arith.constant 0 : index
    %4 = vector.load %arg4[%c0_6, %c0_7] : memref<1x128xf32, #tpu.memory_space<vmem>>, vector<1x128xf32>
    %cst = arith.constant dense<0.000000e+00> : vector<8x128xf32>
    %5 = tpu.matmul %1, %2, %cst {dimension_numbers = #tpu.dot_dimension_numbers<[1], [0], [0], [1], [0, 0, 1, 1], [], []>} : vector<8x16xf32>, vector<16x128xf32>, vector<8x128xf32> -> vector<8x128xf32>
    %6 = vector.broadcast %4 : vector<1x128xf32> to vector<8x128xf32>
    %7 = arith.addf %5, %6 : vector<8x128xf32>
    %cst_8 = arith.constant 0.000000e+00 : f32
    %8 = vector.broadcast %cst_8 : f32 to vector<1x32xf32>
    %cst_9 = arith.constant 0.000000e+00 : f32
    %9 = vector.broadcast %cst_9 : f32 to vector<1x32xf32>
    %10 = vector.extract_strided_slice %7 {offsets = [0, 0], sizes = [1, 128], strides = [1, 1]} : vector<8x128xf32> to vector<1x128xf32>
    %cst_10 = arith.constant dense<0.000000e+00> : vector<1x128xf32>
    %11 = tpu.matmul %8, %3, %cst_10 {dimension_numbers = #tpu.dot_dimension_numbers<[1], [0], [0], [1], [0, 0, 1, 1], [], []>} : vector<1x32xf32>, vector<32x128xf32>, vector<1x128xf32> -> vector<1x128xf32>
    %12 = arith.addf %10, %11 : vector<1x128xf32>
    %13 = arith.negf %12 : vector<1x128xf32>
    %14 = math.exp %13 : vector<1x128xf32>
    %cst_11 = arith.constant 1.000000e+00 : f32
    %15 = vector.broadcast %cst_11 : f32 to vector<1x128xf32>
    %16 = arith.addf %15, %14 : vector<1x128xf32>
    %17 = arith.divf %15, %16 : vector<1x128xf32>
    %18 = math.tanh %12 : vector<1x128xf32>
    %19 = vector.extract_strided_slice %17 {offsets = [0, 0], sizes = [1, 32], strides = [1, 1]} : vector<1x128xf32> to vector<1x32xf32>
    %20 = vector.extract_strided_slice %17 {offsets = [0, 32], sizes = [1, 32], strides = [1, 1]} : vector<1x128xf32> to vector<1x32xf32>
    %21 = vector.extract_strided_slice %17 {offsets = [0, 96], sizes = [1, 32], strides = [1, 1]} : vector<1x128xf32> to vector<1x32xf32>
    %22 = vector.extract_strided_slice %18 {offsets = [0, 64], sizes = [1, 32], strides = [1, 1]} : vector<1x128xf32> to vector<1x32xf32>
    %23 = arith.mulf %20, %9 : vector<1x32xf32>
    %24 = arith.mulf %19, %22 : vector<1x32xf32>
    %25 = arith.addf %23, %24 : vector<1x32xf32>
    %26 = math.tanh %25 : vector<1x32xf32>
    %27 = arith.mulf %21, %26 : vector<1x32xf32>
    %28 = vector.extract_strided_slice %7 {offsets = [1, 0], sizes = [1, 128], strides = [1, 1]} : vector<8x128xf32> to vector<1x128xf32>
    %cst_12 = arith.constant dense<0.000000e+00> : vector<1x128xf32>
    %29 = tpu.matmul %27, %3, %cst_12 {dimension_numbers = #tpu.dot_dimension_numbers<[1], [0], [0], [1], [0, 0, 1, 1], [], []>} : vector<1x32xf32>, vector<32x128xf32>, vector<1x128xf32> -> vector<1x128xf32>
    %30 = arith.addf %28, %29 : vector<1x128xf32>
    %31 = arith.negf %30 : vector<1x128xf32>
    %32 = math.exp %31 : vector<1x128xf32>
    %cst_13 = arith.constant 1.000000e+00 : f32
    %33 = vector.broadcast %cst_13 : f32 to vector<1x128xf32>
    %34 = arith.addf %33, %32 : vector<1x128xf32>
    %35 = arith.divf %33, %34 : vector<1x128xf32>
    %36 = math.tanh %30 : vector<1x128xf32>
    %37 = vector.extract_strided_slice %35 {offsets = [0, 0], sizes = [1, 32], strides = [1, 1]} : vector<1x128xf32> to vector<1x32xf32>
    %38 = vector.extract_strided_slice %35 {offsets = [0, 32], sizes = [1, 32], strides = [1, 1]} : vector<1x128xf32> to vector<1x32xf32>
    %39 = vector.extract_strided_slice %35 {offsets = [0, 96], sizes = [1, 32], strides = [1, 1]} : vector<1x128xf32> to vector<1x32xf32>
    %40 = vector.extract_strided_slice %36 {offsets = [0, 64], sizes = [1, 32], strides = [1, 1]} : vector<1x128xf32> to vector<1x32xf32>
    %41 = arith.mulf %38, %25 : vector<1x32xf32>
    %42 = arith.mulf %37, %40 : vector<1x32xf32>
    %43 = arith.addf %41, %42 : vector<1x32xf32>
    %44 = math.tanh %43 : vector<1x32xf32>
    %45 = arith.mulf %39, %44 : vector<1x32xf32>
    %46 = vector.extract_strided_slice %7 {offsets = [2, 0], sizes = [1, 128], strides = [1, 1]} : vector<8x128xf32> to vector<1x128xf32>
    %cst_14 = arith.constant dense<0.000000e+00> : vector<1x128xf32>
    %47 = tpu.matmul %45, %3, %cst_14 {dimension_numbers = #tpu.dot_dimension_numbers<[1], [0], [0], [1], [0, 0, 1, 1], [], []>} : vector<1x32xf32>, vector<32x128xf32>, vector<1x128xf32> -> vector<1x128xf32>
    %48 = arith.addf %46, %47 : vector<1x128xf32>
    %49 = arith.negf %48 : vector<1x128xf32>
    %50 = math.exp %49 : vector<1x128xf32>
    %cst_15 = arith.constant 1.000000e+00 : f32
    %51 = vector.broadcast %cst_15 : f32 to vector<1x128xf32>
    %52 = arith.addf %51, %50 : vector<1x128xf32>
    %53 = arith.divf %51, %52 : vector<1x128xf32>
    %54 = math.tanh %48 : vector<1x128xf32>
    %55 = vector.extract_strided_slice %53 {offsets = [0, 0], sizes = [1, 32], strides = [1, 1]} : vector<1x128xf32> to vector<1x32xf32>
    %56 = vector.extract_strided_slice %53 {offsets = [0, 32], sizes = [1, 32], strides = [1, 1]} : vector<1x128xf32> to vector<1x32xf32>
    %57 = vector.extract_strided_slice %53 {offsets = [0, 96], sizes = [1, 32], strides = [1, 1]} : vector<1x128xf32> to vector<1x32xf32>
    %58 = vector.extract_strided_slice %54 {offsets = [0, 64], sizes = [1, 32], strides = [1, 1]} : vector<1x128xf32> to vector<1x32xf32>
    %59 = arith.mulf %56, %43 : vector<1x32xf32>
    %60 = arith.mulf %55, %58 : vector<1x32xf32>
    %61 = arith.addf %59, %60 : vector<1x32xf32>
    %62 = math.tanh %61 : vector<1x32xf32>
    %63 = arith.mulf %57, %62 : vector<1x32xf32>
    %64 = vector.extract_strided_slice %7 {offsets = [3, 0], sizes = [1, 128], strides = [1, 1]} : vector<8x128xf32> to vector<1x128xf32>
    %cst_16 = arith.constant dense<0.000000e+00> : vector<1x128xf32>
    %65 = tpu.matmul %63, %3, %cst_16 {dimension_numbers = #tpu.dot_dimension_numbers<[1], [0], [0], [1], [0, 0, 1, 1], [], []>} : vector<1x32xf32>, vector<32x128xf32>, vector<1x128xf32> -> vector<1x128xf32>
    %66 = arith.addf %64, %65 : vector<1x128xf32>
    %67 = arith.negf %66 : vector<1x128xf32>
    %68 = math.exp %67 : vector<1x128xf32>
    %cst_17 = arith.constant 1.000000e+00 : f32
    %69 = vector.broadcast %cst_17 : f32 to vector<1x128xf32>
    %70 = arith.addf %69, %68 : vector<1x128xf32>
    %71 = arith.divf %69, %70 : vector<1x128xf32>
    %72 = math.tanh %66 : vector<1x128xf32>
    %73 = vector.extract_strided_slice %71 {offsets = [0, 0], sizes = [1, 32], strides = [1, 1]} : vector<1x128xf32> to vector<1x32xf32>
    %74 = vector.extract_strided_slice %71 {offsets = [0, 32], sizes = [1, 32], strides = [1, 1]} : vector<1x128xf32> to vector<1x32xf32>
    %75 = vector.extract_strided_slice %71 {offsets = [0, 96], sizes = [1, 32], strides = [1, 1]} : vector<1x128xf32> to vector<1x32xf32>
    %76 = vector.extract_strided_slice %72 {offsets = [0, 64], sizes = [1, 32], strides = [1, 1]} : vector<1x128xf32> to vector<1x32xf32>
    %77 = arith.mulf %74, %61 : vector<1x32xf32>
    %78 = arith.mulf %73, %76 : vector<1x32xf32>
    %79 = arith.addf %77, %78 : vector<1x32xf32>
    %80 = math.tanh %79 : vector<1x32xf32>
    %81 = arith.mulf %75, %80 : vector<1x32xf32>
    %82 = vector.extract_strided_slice %7 {offsets = [4, 0], sizes = [1, 128], strides = [1, 1]} : vector<8x128xf32> to vector<1x128xf32>
    %cst_18 = arith.constant dense<0.000000e+00> : vector<1x128xf32>
    %83 = tpu.matmul %81, %3, %cst_18 {dimension_numbers = #tpu.dot_dimension_numbers<[1], [0], [0], [1], [0, 0, 1, 1], [], []>} : vector<1x32xf32>, vector<32x128xf32>, vector<1x128xf32> -> vector<1x128xf32>
    %84 = arith.addf %82, %83 : vector<1x128xf32>
    %85 = arith.negf %84 : vector<1x128xf32>
    %86 = math.exp %85 : vector<1x128xf32>
    %cst_19 = arith.constant 1.000000e+00 : f32
    %87 = vector.broadcast %cst_19 : f32 to vector<1x128xf32>
    %88 = arith.addf %87, %86 : vector<1x128xf32>
    %89 = arith.divf %87, %88 : vector<1x128xf32>
    %90 = math.tanh %84 : vector<1x128xf32>
    %91 = vector.extract_strided_slice %89 {offsets = [0, 0], sizes = [1, 32], strides = [1, 1]} : vector<1x128xf32> to vector<1x32xf32>
    %92 = vector.extract_strided_slice %89 {offsets = [0, 32], sizes = [1, 32], strides = [1, 1]} : vector<1x128xf32> to vector<1x32xf32>
    %93 = vector.extract_strided_slice %89 {offsets = [0, 96], sizes = [1, 32], strides = [1, 1]} : vector<1x128xf32> to vector<1x32xf32>
    %94 = vector.extract_strided_slice %90 {offsets = [0, 64], sizes = [1, 32], strides = [1, 1]} : vector<1x128xf32> to vector<1x32xf32>
    %95 = arith.mulf %92, %79 : vector<1x32xf32>
    %96 = arith.mulf %91, %94 : vector<1x32xf32>
    %97 = arith.addf %95, %96 : vector<1x32xf32>
    %98 = math.tanh %97 : vector<1x32xf32>
    %99 = arith.mulf %93, %98 : vector<1x32xf32>
    %100 = vector.extract_strided_slice %7 {offsets = [5, 0], sizes = [1, 128], strides = [1, 1]} : vector<8x128xf32> to vector<1x128xf32>
    %cst_20 = arith.constant dense<0.000000e+00> : vector<1x128xf32>
    %101 = tpu.matmul %99, %3, %cst_20 {dimension_numbers = #tpu.dot_dimension_numbers<[1], [0], [0], [1], [0, 0, 1, 1], [], []>} : vector<1x32xf32>, vector<32x128xf32>, vector<1x128xf32> -> vector<1x128xf32>
    %102 = arith.addf %100, %101 : vector<1x128xf32>
    %103 = arith.negf %102 : vector<1x128xf32>
    %104 = math.exp %103 : vector<1x128xf32>
    %cst_21 = arith.constant 1.000000e+00 : f32
    %105 = vector.broadcast %cst_21 : f32 to vector<1x128xf32>
    %106 = arith.addf %105, %104 : vector<1x128xf32>
    %107 = arith.divf %105, %106 : vector<1x128xf32>
    %108 = math.tanh %102 : vector<1x128xf32>
    %109 = vector.extract_strided_slice %107 {offsets = [0, 0], sizes = [1, 32], strides = [1, 1]} : vector<1x128xf32> to vector<1x32xf32>
    %110 = vector.extract_strided_slice %107 {offsets = [0, 32], sizes = [1, 32], strides = [1, 1]} : vector<1x128xf32> to vector<1x32xf32>
    %111 = vector.extract_strided_slice %107 {offsets = [0, 96], sizes = [1, 32], strides = [1, 1]} : vector<1x128xf32> to vector<1x32xf32>
    %112 = vector.extract_strided_slice %108 {offsets = [0, 64], sizes = [1, 32], strides = [1, 1]} : vector<1x128xf32> to vector<1x32xf32>
    %113 = arith.mulf %110, %97 : vector<1x32xf32>
    %114 = arith.mulf %109, %112 : vector<1x32xf32>
    %115 = arith.addf %113, %114 : vector<1x32xf32>
    %116 = math.tanh %115 : vector<1x32xf32>
    %117 = arith.mulf %111, %116 : vector<1x32xf32>
    %118 = vector.extract_strided_slice %7 {offsets = [6, 0], sizes = [1, 128], strides = [1, 1]} : vector<8x128xf32> to vector<1x128xf32>
    %cst_22 = arith.constant dense<0.000000e+00> : vector<1x128xf32>
    %119 = tpu.matmul %117, %3, %cst_22 {dimension_numbers = #tpu.dot_dimension_numbers<[1], [0], [0], [1], [0, 0, 1, 1], [], []>} : vector<1x32xf32>, vector<32x128xf32>, vector<1x128xf32> -> vector<1x128xf32>
    %120 = arith.addf %118, %119 : vector<1x128xf32>
    %121 = arith.negf %120 : vector<1x128xf32>
    %122 = math.exp %121 : vector<1x128xf32>
    %cst_23 = arith.constant 1.000000e+00 : f32
    %123 = vector.broadcast %cst_23 : f32 to vector<1x128xf32>
    %124 = arith.addf %123, %122 : vector<1x128xf32>
    %125 = arith.divf %123, %124 : vector<1x128xf32>
    %126 = math.tanh %120 : vector<1x128xf32>
    %127 = vector.extract_strided_slice %125 {offsets = [0, 0], sizes = [1, 32], strides = [1, 1]} : vector<1x128xf32> to vector<1x32xf32>
    %128 = vector.extract_strided_slice %125 {offsets = [0, 32], sizes = [1, 32], strides = [1, 1]} : vector<1x128xf32> to vector<1x32xf32>
    %129 = vector.extract_strided_slice %125 {offsets = [0, 96], sizes = [1, 32], strides = [1, 1]} : vector<1x128xf32> to vector<1x32xf32>
    %130 = vector.extract_strided_slice %126 {offsets = [0, 64], sizes = [1, 32], strides = [1, 1]} : vector<1x128xf32> to vector<1x32xf32>
    %131 = arith.mulf %128, %115 : vector<1x32xf32>
    %132 = arith.mulf %127, %130 : vector<1x32xf32>
    %133 = arith.addf %131, %132 : vector<1x32xf32>
    %134 = math.tanh %133 : vector<1x32xf32>
    %135 = arith.mulf %129, %134 : vector<1x32xf32>
    %136 = vector.extract_strided_slice %7 {offsets = [7, 0], sizes = [1, 128], strides = [1, 1]} : vector<8x128xf32> to vector<1x128xf32>
    %cst_24 = arith.constant dense<0.000000e+00> : vector<1x128xf32>
    %137 = tpu.matmul %135, %3, %cst_24 {dimension_numbers = #tpu.dot_dimension_numbers<[1], [0], [0], [1], [0, 0, 1, 1], [], []>} : vector<1x32xf32>, vector<32x128xf32>, vector<1x128xf32> -> vector<1x128xf32>
    %138 = arith.addf %136, %137 : vector<1x128xf32>
    %139 = arith.negf %138 : vector<1x128xf32>
    %140 = math.exp %139 : vector<1x128xf32>
    %cst_25 = arith.constant 1.000000e+00 : f32
    %141 = vector.broadcast %cst_25 : f32 to vector<1x128xf32>
    %142 = arith.addf %141, %140 : vector<1x128xf32>
    %143 = arith.divf %141, %142 : vector<1x128xf32>
    %144 = math.tanh %138 : vector<1x128xf32>
    %145 = vector.extract_strided_slice %143 {offsets = [0, 0], sizes = [1, 32], strides = [1, 1]} : vector<1x128xf32> to vector<1x32xf32>
    %146 = vector.extract_strided_slice %143 {offsets = [0, 32], sizes = [1, 32], strides = [1, 1]} : vector<1x128xf32> to vector<1x32xf32>
    %147 = vector.extract_strided_slice %143 {offsets = [0, 96], sizes = [1, 32], strides = [1, 1]} : vector<1x128xf32> to vector<1x32xf32>
    %148 = vector.extract_strided_slice %144 {offsets = [0, 64], sizes = [1, 32], strides = [1, 1]} : vector<1x128xf32> to vector<1x32xf32>
    %149 = arith.mulf %146, %133 : vector<1x32xf32>
    %150 = arith.mulf %145, %148 : vector<1x32xf32>
    %151 = arith.addf %149, %150 : vector<1x32xf32>
    %152 = math.tanh %151 : vector<1x32xf32>
    %153 = arith.mulf %147, %152 : vector<1x32xf32>
    %154 = tpu.concatenate %27, %45, %63, %81, %99, %117, %135, %153 in 0 : vector<1x32xf32>, vector<1x32xf32>, vector<1x32xf32>, vector<1x32xf32>, vector<1x32xf32>, vector<1x32xf32>, vector<1x32xf32>, vector<1x32xf32> -> vector<8x32xf32>
    %c0_26 = arith.constant 0 : index
    %c0_27 = arith.constant 0 : index
    %155 = vector.load %arg5[%c0_26, %c0_27] : memref<32x128xf32, #tpu.memory_space<vmem>>, vector<32x128xf32>
    %c0_28 = arith.constant 0 : index
    %c0_29 = arith.constant 0 : index
    %156 = vector.load %arg6[%c0_28, %c0_29] : memref<32x128xf32, #tpu.memory_space<vmem>>, vector<32x128xf32>
    %c0_30 = arith.constant 0 : index
    %c0_31 = arith.constant 0 : index
    %157 = vector.load %arg7[%c0_30, %c0_31] : memref<1x128xf32, #tpu.memory_space<vmem>>, vector<1x128xf32>
    %cst_32 = arith.constant dense<0.000000e+00> : vector<8x128xf32>
    %158 = tpu.matmul %154, %155, %cst_32 {dimension_numbers = #tpu.dot_dimension_numbers<[1], [0], [0], [1], [0, 0, 1, 1], [], []>} : vector<8x32xf32>, vector<32x128xf32>, vector<8x128xf32> -> vector<8x128xf32>
    %159 = vector.broadcast %157 : vector<1x128xf32> to vector<8x128xf32>
    %160 = arith.addf %158, %159 : vector<8x128xf32>
    %cst_33 = arith.constant 0.000000e+00 : f32
    %161 = vector.broadcast %cst_33 : f32 to vector<1x32xf32>
    %cst_34 = arith.constant 0.000000e+00 : f32
    %162 = vector.broadcast %cst_34 : f32 to vector<1x32xf32>
    %163 = vector.extract_strided_slice %160 {offsets = [0, 0], sizes = [1, 128], strides = [1, 1]} : vector<8x128xf32> to vector<1x128xf32>
    %cst_35 = arith.constant dense<0.000000e+00> : vector<1x128xf32>
    %164 = tpu.matmul %161, %156, %cst_35 {dimension_numbers = #tpu.dot_dimension_numbers<[1], [0], [0], [1], [0, 0, 1, 1], [], []>} : vector<1x32xf32>, vector<32x128xf32>, vector<1x128xf32> -> vector<1x128xf32>
    %165 = arith.addf %163, %164 : vector<1x128xf32>
    %166 = arith.negf %165 : vector<1x128xf32>
    %167 = math.exp %166 : vector<1x128xf32>
    %cst_36 = arith.constant 1.000000e+00 : f32
    %168 = vector.broadcast %cst_36 : f32 to vector<1x128xf32>
    %169 = arith.addf %168, %167 : vector<1x128xf32>
    %170 = arith.divf %168, %169 : vector<1x128xf32>
    %171 = math.tanh %165 : vector<1x128xf32>
    %172 = vector.extract_strided_slice %170 {offsets = [0, 0], sizes = [1, 32], strides = [1, 1]} : vector<1x128xf32> to vector<1x32xf32>
    %173 = vector.extract_strided_slice %170 {offsets = [0, 32], sizes = [1, 32], strides = [1, 1]} : vector<1x128xf32> to vector<1x32xf32>
    %174 = vector.extract_strided_slice %170 {offsets = [0, 96], sizes = [1, 32], strides = [1, 1]} : vector<1x128xf32> to vector<1x32xf32>
    %175 = vector.extract_strided_slice %171 {offsets = [0, 64], sizes = [1, 32], strides = [1, 1]} : vector<1x128xf32> to vector<1x32xf32>
    %176 = arith.mulf %173, %162 : vector<1x32xf32>
    %177 = arith.mulf %172, %175 : vector<1x32xf32>
    %178 = arith.addf %176, %177 : vector<1x32xf32>
    %179 = math.tanh %178 : vector<1x32xf32>
    %180 = arith.mulf %174, %179 : vector<1x32xf32>
    %181 = vector.extract_strided_slice %160 {offsets = [1, 0], sizes = [1, 128], strides = [1, 1]} : vector<8x128xf32> to vector<1x128xf32>
    %cst_37 = arith.constant dense<0.000000e+00> : vector<1x128xf32>
    %182 = tpu.matmul %180, %156, %cst_37 {dimension_numbers = #tpu.dot_dimension_numbers<[1], [0], [0], [1], [0, 0, 1, 1], [], []>} : vector<1x32xf32>, vector<32x128xf32>, vector<1x128xf32> -> vector<1x128xf32>
    %183 = arith.addf %181, %182 : vector<1x128xf32>
    %184 = arith.negf %183 : vector<1x128xf32>
    %185 = math.exp %184 : vector<1x128xf32>
    %cst_38 = arith.constant 1.000000e+00 : f32
    %186 = vector.broadcast %cst_38 : f32 to vector<1x128xf32>
    %187 = arith.addf %186, %185 : vector<1x128xf32>
    %188 = arith.divf %186, %187 : vector<1x128xf32>
    %189 = math.tanh %183 : vector<1x128xf32>
    %190 = vector.extract_strided_slice %188 {offsets = [0, 0], sizes = [1, 32], strides = [1, 1]} : vector<1x128xf32> to vector<1x32xf32>
    %191 = vector.extract_strided_slice %188 {offsets = [0, 32], sizes = [1, 32], strides = [1, 1]} : vector<1x128xf32> to vector<1x32xf32>
    %192 = vector.extract_strided_slice %188 {offsets = [0, 96], sizes = [1, 32], strides = [1, 1]} : vector<1x128xf32> to vector<1x32xf32>
    %193 = vector.extract_strided_slice %189 {offsets = [0, 64], sizes = [1, 32], strides = [1, 1]} : vector<1x128xf32> to vector<1x32xf32>
    %194 = arith.mulf %191, %178 : vector<1x32xf32>
    %195 = arith.mulf %190, %193 : vector<1x32xf32>
    %196 = arith.addf %194, %195 : vector<1x32xf32>
    %197 = math.tanh %196 : vector<1x32xf32>
    %198 = arith.mulf %192, %197 : vector<1x32xf32>
    %199 = vector.extract_strided_slice %160 {offsets = [2, 0], sizes = [1, 128], strides = [1, 1]} : vector<8x128xf32> to vector<1x128xf32>
    %cst_39 = arith.constant dense<0.000000e+00> : vector<1x128xf32>
    %200 = tpu.matmul %198, %156, %cst_39 {dimension_numbers = #tpu.dot_dimension_numbers<[1], [0], [0], [1], [0, 0, 1, 1], [], []>} : vector<1x32xf32>, vector<32x128xf32>, vector<1x128xf32> -> vector<1x128xf32>
    %201 = arith.addf %199, %200 : vector<1x128xf32>
    %202 = arith.negf %201 : vector<1x128xf32>
    %203 = math.exp %202 : vector<1x128xf32>
    %cst_40 = arith.constant 1.000000e+00 : f32
    %204 = vector.broadcast %cst_40 : f32 to vector<1x128xf32>
    %205 = arith.addf %204, %203 : vector<1x128xf32>
    %206 = arith.divf %204, %205 : vector<1x128xf32>
    %207 = math.tanh %201 : vector<1x128xf32>
    %208 = vector.extract_strided_slice %206 {offsets = [0, 0], sizes = [1, 32], strides = [1, 1]} : vector<1x128xf32> to vector<1x32xf32>
    %209 = vector.extract_strided_slice %206 {offsets = [0, 32], sizes = [1, 32], strides = [1, 1]} : vector<1x128xf32> to vector<1x32xf32>
    %210 = vector.extract_strided_slice %206 {offsets = [0, 96], sizes = [1, 32], strides = [1, 1]} : vector<1x128xf32> to vector<1x32xf32>
    %211 = vector.extract_strided_slice %207 {offsets = [0, 64], sizes = [1, 32], strides = [1, 1]} : vector<1x128xf32> to vector<1x32xf32>
    %212 = arith.mulf %209, %196 : vector<1x32xf32>
    %213 = arith.mulf %208, %211 : vector<1x32xf32>
    %214 = arith.addf %212, %213 : vector<1x32xf32>
    %215 = math.tanh %214 : vector<1x32xf32>
    %216 = arith.mulf %210, %215 : vector<1x32xf32>
    %217 = vector.extract_strided_slice %160 {offsets = [3, 0], sizes = [1, 128], strides = [1, 1]} : vector<8x128xf32> to vector<1x128xf32>
    %cst_41 = arith.constant dense<0.000000e+00> : vector<1x128xf32>
    %218 = tpu.matmul %216, %156, %cst_41 {dimension_numbers = #tpu.dot_dimension_numbers<[1], [0], [0], [1], [0, 0, 1, 1], [], []>} : vector<1x32xf32>, vector<32x128xf32>, vector<1x128xf32> -> vector<1x128xf32>
    %219 = arith.addf %217, %218 : vector<1x128xf32>
    %220 = arith.negf %219 : vector<1x128xf32>
    %221 = math.exp %220 : vector<1x128xf32>
    %cst_42 = arith.constant 1.000000e+00 : f32
    %222 = vector.broadcast %cst_42 : f32 to vector<1x128xf32>
    %223 = arith.addf %222, %221 : vector<1x128xf32>
    %224 = arith.divf %222, %223 : vector<1x128xf32>
    %225 = math.tanh %219 : vector<1x128xf32>
    %226 = vector.extract_strided_slice %224 {offsets = [0, 0], sizes = [1, 32], strides = [1, 1]} : vector<1x128xf32> to vector<1x32xf32>
    %227 = vector.extract_strided_slice %224 {offsets = [0, 32], sizes = [1, 32], strides = [1, 1]} : vector<1x128xf32> to vector<1x32xf32>
    %228 = vector.extract_strided_slice %224 {offsets = [0, 96], sizes = [1, 32], strides = [1, 1]} : vector<1x128xf32> to vector<1x32xf32>
    %229 = vector.extract_strided_slice %225 {offsets = [0, 64], sizes = [1, 32], strides = [1, 1]} : vector<1x128xf32> to vector<1x32xf32>
    %230 = arith.mulf %227, %214 : vector<1x32xf32>
    %231 = arith.mulf %226, %229 : vector<1x32xf32>
    %232 = arith.addf %230, %231 : vector<1x32xf32>
    %233 = math.tanh %232 : vector<1x32xf32>
    %234 = arith.mulf %228, %233 : vector<1x32xf32>
    %235 = vector.extract_strided_slice %160 {offsets = [4, 0], sizes = [1, 128], strides = [1, 1]} : vector<8x128xf32> to vector<1x128xf32>
    %cst_43 = arith.constant dense<0.000000e+00> : vector<1x128xf32>
    %236 = tpu.matmul %234, %156, %cst_43 {dimension_numbers = #tpu.dot_dimension_numbers<[1], [0], [0], [1], [0, 0, 1, 1], [], []>} : vector<1x32xf32>, vector<32x128xf32>, vector<1x128xf32> -> vector<1x128xf32>
    %237 = arith.addf %235, %236 : vector<1x128xf32>
    %238 = arith.negf %237 : vector<1x128xf32>
    %239 = math.exp %238 : vector<1x128xf32>
    %cst_44 = arith.constant 1.000000e+00 : f32
    %240 = vector.broadcast %cst_44 : f32 to vector<1x128xf32>
    %241 = arith.addf %240, %239 : vector<1x128xf32>
    %242 = arith.divf %240, %241 : vector<1x128xf32>
    %243 = math.tanh %237 : vector<1x128xf32>
    %244 = vector.extract_strided_slice %242 {offsets = [0, 0], sizes = [1, 32], strides = [1, 1]} : vector<1x128xf32> to vector<1x32xf32>
    %245 = vector.extract_strided_slice %242 {offsets = [0, 32], sizes = [1, 32], strides = [1, 1]} : vector<1x128xf32> to vector<1x32xf32>
    %246 = vector.extract_strided_slice %242 {offsets = [0, 96], sizes = [1, 32], strides = [1, 1]} : vector<1x128xf32> to vector<1x32xf32>
    %247 = vector.extract_strided_slice %243 {offsets = [0, 64], sizes = [1, 32], strides = [1, 1]} : vector<1x128xf32> to vector<1x32xf32>
    %248 = arith.mulf %245, %232 : vector<1x32xf32>
    %249 = arith.mulf %244, %247 : vector<1x32xf32>
    %250 = arith.addf %248, %249 : vector<1x32xf32>
    %251 = math.tanh %250 : vector<1x32xf32>
    %252 = arith.mulf %246, %251 : vector<1x32xf32>
    %253 = vector.extract_strided_slice %160 {offsets = [5, 0], sizes = [1, 128], strides = [1, 1]} : vector<8x128xf32> to vector<1x128xf32>
    %cst_45 = arith.constant dense<0.000000e+00> : vector<1x128xf32>
    %254 = tpu.matmul %252, %156, %cst_45 {dimension_numbers = #tpu.dot_dimension_numbers<[1], [0], [0], [1], [0, 0, 1, 1], [], []>} : vector<1x32xf32>, vector<32x128xf32>, vector<1x128xf32> -> vector<1x128xf32>
    %255 = arith.addf %253, %254 : vector<1x128xf32>
    %256 = arith.negf %255 : vector<1x128xf32>
    %257 = math.exp %256 : vector<1x128xf32>
    %cst_46 = arith.constant 1.000000e+00 : f32
    %258 = vector.broadcast %cst_46 : f32 to vector<1x128xf32>
    %259 = arith.addf %258, %257 : vector<1x128xf32>
    %260 = arith.divf %258, %259 : vector<1x128xf32>
    %261 = math.tanh %255 : vector<1x128xf32>
    %262 = vector.extract_strided_slice %260 {offsets = [0, 0], sizes = [1, 32], strides = [1, 1]} : vector<1x128xf32> to vector<1x32xf32>
    %263 = vector.extract_strided_slice %260 {offsets = [0, 32], sizes = [1, 32], strides = [1, 1]} : vector<1x128xf32> to vector<1x32xf32>
    %264 = vector.extract_strided_slice %260 {offsets = [0, 96], sizes = [1, 32], strides = [1, 1]} : vector<1x128xf32> to vector<1x32xf32>
    %265 = vector.extract_strided_slice %261 {offsets = [0, 64], sizes = [1, 32], strides = [1, 1]} : vector<1x128xf32> to vector<1x32xf32>
    %266 = arith.mulf %263, %250 : vector<1x32xf32>
    %267 = arith.mulf %262, %265 : vector<1x32xf32>
    %268 = arith.addf %266, %267 : vector<1x32xf32>
    %269 = math.tanh %268 : vector<1x32xf32>
    %270 = arith.mulf %264, %269 : vector<1x32xf32>
    %271 = vector.extract_strided_slice %160 {offsets = [6, 0], sizes = [1, 128], strides = [1, 1]} : vector<8x128xf32> to vector<1x128xf32>
    %cst_47 = arith.constant dense<0.000000e+00> : vector<1x128xf32>
    %272 = tpu.matmul %270, %156, %cst_47 {dimension_numbers = #tpu.dot_dimension_numbers<[1], [0], [0], [1], [0, 0, 1, 1], [], []>} : vector<1x32xf32>, vector<32x128xf32>, vector<1x128xf32> -> vector<1x128xf32>
    %273 = arith.addf %271, %272 : vector<1x128xf32>
    %274 = arith.negf %273 : vector<1x128xf32>
    %275 = math.exp %274 : vector<1x128xf32>
    %cst_48 = arith.constant 1.000000e+00 : f32
    %276 = vector.broadcast %cst_48 : f32 to vector<1x128xf32>
    %277 = arith.addf %276, %275 : vector<1x128xf32>
    %278 = arith.divf %276, %277 : vector<1x128xf32>
    %279 = math.tanh %273 : vector<1x128xf32>
    %280 = vector.extract_strided_slice %278 {offsets = [0, 0], sizes = [1, 32], strides = [1, 1]} : vector<1x128xf32> to vector<1x32xf32>
    %281 = vector.extract_strided_slice %278 {offsets = [0, 32], sizes = [1, 32], strides = [1, 1]} : vector<1x128xf32> to vector<1x32xf32>
    %282 = vector.extract_strided_slice %278 {offsets = [0, 96], sizes = [1, 32], strides = [1, 1]} : vector<1x128xf32> to vector<1x32xf32>
    %283 = vector.extract_strided_slice %279 {offsets = [0, 64], sizes = [1, 32], strides = [1, 1]} : vector<1x128xf32> to vector<1x32xf32>
    %284 = arith.mulf %281, %268 : vector<1x32xf32>
    %285 = arith.mulf %280, %283 : vector<1x32xf32>
    %286 = arith.addf %284, %285 : vector<1x32xf32>
    %287 = math.tanh %286 : vector<1x32xf32>
    %288 = arith.mulf %282, %287 : vector<1x32xf32>
    %289 = vector.extract_strided_slice %160 {offsets = [7, 0], sizes = [1, 128], strides = [1, 1]} : vector<8x128xf32> to vector<1x128xf32>
    %cst_49 = arith.constant dense<0.000000e+00> : vector<1x128xf32>
    %290 = tpu.matmul %288, %156, %cst_49 {dimension_numbers = #tpu.dot_dimension_numbers<[1], [0], [0], [1], [0, 0, 1, 1], [], []>} : vector<1x32xf32>, vector<32x128xf32>, vector<1x128xf32> -> vector<1x128xf32>
    %291 = arith.addf %289, %290 : vector<1x128xf32>
    %292 = arith.negf %291 : vector<1x128xf32>
    %293 = math.exp %292 : vector<1x128xf32>
    %cst_50 = arith.constant 1.000000e+00 : f32
    %294 = vector.broadcast %cst_50 : f32 to vector<1x128xf32>
    %295 = arith.addf %294, %293 : vector<1x128xf32>
    %296 = arith.divf %294, %295 : vector<1x128xf32>
    %297 = math.tanh %291 : vector<1x128xf32>
    %298 = vector.extract_strided_slice %296 {offsets = [0, 0], sizes = [1, 32], strides = [1, 1]} : vector<1x128xf32> to vector<1x32xf32>
    %299 = vector.extract_strided_slice %296 {offsets = [0, 32], sizes = [1, 32], strides = [1, 1]} : vector<1x128xf32> to vector<1x32xf32>
    %300 = vector.extract_strided_slice %296 {offsets = [0, 96], sizes = [1, 32], strides = [1, 1]} : vector<1x128xf32> to vector<1x32xf32>
    %301 = vector.extract_strided_slice %297 {offsets = [0, 64], sizes = [1, 32], strides = [1, 1]} : vector<1x128xf32> to vector<1x32xf32>
    %302 = arith.mulf %299, %286 : vector<1x32xf32>
    %303 = arith.mulf %298, %301 : vector<1x32xf32>
    %304 = arith.addf %302, %303 : vector<1x32xf32>
    %305 = math.tanh %304 : vector<1x32xf32>
    %306 = arith.mulf %300, %305 : vector<1x32xf32>
    %307 = tpu.concatenate %180, %198, %216, %234, %252, %270, %288, %306 in 0 : vector<1x32xf32>, vector<1x32xf32>, vector<1x32xf32>, vector<1x32xf32>, vector<1x32xf32>, vector<1x32xf32>, vector<1x32xf32>, vector<1x32xf32> -> vector<8x32xf32>
    %c0_51 = arith.constant 0 : index
    %c0_52 = arith.constant 0 : index
    %308 = vector.load %arg8[%c0_51, %c0_52] : memref<32x96xbf16, #tpu.memory_space<vmem>>, vector<32x96xbf16>
    %c0_53 = arith.constant 0 : index
    %c0_54 = arith.constant 0 : index
    %309 = vector.load %arg9[%c0_53, %c0_54] : memref<1x96xf32, #tpu.memory_space<vmem>>, vector<1x96xf32>
    %c0_55 = arith.constant 0 : index
    %c0_56 = arith.constant 0 : index
    %310 = vector.load %arg10[%c0_55, %c0_56] : memref<32x32xbf16, #tpu.memory_space<vmem>>, vector<32x32xbf16>
    %c0_57 = arith.constant 0 : index
    %c0_58 = arith.constant 0 : index
    %311 = vector.load %arg11[%c0_57, %c0_58] : memref<1x32xf32, #tpu.memory_space<vmem>>, vector<1x32xf32>
    %c0_59 = arith.constant 0 : index
    %c0_60 = arith.constant 0 : index
    %312 = vector.load %arg12[%c0_59, %c0_60] : memref<1x32xf32, #tpu.memory_space<vmem>>, vector<1x32xf32>
    %c0_61 = arith.constant 0 : index
    %c0_62 = arith.constant 0 : index
    %313 = vector.load %arg13[%c0_61, %c0_62] : memref<1x32xf32, #tpu.memory_space<vmem>>, vector<1x32xf32>
    %c0_63 = arith.constant 0 : index
    %c0_64 = arith.constant 0 : index
    %314 = vector.load %arg14[%c0_63, %c0_64] : memref<32x64xbf16, #tpu.memory_space<vmem>>, vector<32x64xbf16>
    %c0_65 = arith.constant 0 : index
    %c0_66 = arith.constant 0 : index
    %315 = vector.load %arg15[%c0_65, %c0_66] : memref<1x64xf32, #tpu.memory_space<vmem>>, vector<1x64xf32>
    %c0_67 = arith.constant 0 : index
    %c0_68 = arith.constant 0 : index
    %316 = vector.load %arg16[%c0_67, %c0_68] : memref<64x32xbf16, #tpu.memory_space<vmem>>, vector<64x32xbf16>
    %c0_69 = arith.constant 0 : index
    %c0_70 = arith.constant 0 : index
    %317 = vector.load %arg17[%c0_69, %c0_70] : memref<1x32xf32, #tpu.memory_space<vmem>>, vector<1x32xf32>
    %c0_71 = arith.constant 0 : index
    %c0_72 = arith.constant 0 : index
    %318 = vector.load %arg18[%c0_71, %c0_72] : memref<1x32xf32, #tpu.memory_space<vmem>>, vector<1x32xf32>
    %c0_73 = arith.constant 0 : index
    %c0_74 = arith.constant 0 : index
    %319 = vector.load %arg19[%c0_73, %c0_74] : memref<1x32xf32, #tpu.memory_space<vmem>>, vector<1x32xf32>
    %320 = arith.truncf %307 : vector<8x32xf32> to vector<8x32xbf16>
    %cst_75 = arith.constant dense<0.000000e+00> : vector<8x96xf32>
    %321 = tpu.matmul %320, %308, %cst_75 {dimension_numbers = #tpu.dot_dimension_numbers<[1], [0], [0], [1], [0, 0, 1, 1], [], []>} : vector<8x32xbf16>, vector<32x96xbf16>, vector<8x96xf32> -> vector<8x96xf32>
    %322 = vector.broadcast %309 : vector<1x96xf32> to vector<8x96xf32>
    %323 = arith.addf %321, %322 : vector<8x96xf32>
    %324 = vector.extract_strided_slice %323 {offsets = [0, 0], sizes = [8, 32], strides = [1, 1]} : vector<8x96xf32> to vector<8x32xf32>
    %325 = vector.extract_strided_slice %323 {offsets = [0, 32], sizes = [8, 32], strides = [1, 1]} : vector<8x96xf32> to vector<8x32xf32>
    %326 = vector.extract_strided_slice %323 {offsets = [0, 64], sizes = [8, 32], strides = [1, 1]} : vector<8x96xf32> to vector<8x32xf32>
    %327 = vector.extract_strided_slice %324 {offsets = [0, 0], sizes = [8, 8], strides = [1, 1]} : vector<8x32xf32> to vector<8x8xf32>
    %cst_76 = arith.constant 0.353553385 : f32
    %328 = vector.broadcast %cst_76 : f32 to vector<8x8xf32>
    %329 = arith.mulf %327, %328 : vector<8x8xf32>
    %330 = arith.truncf %329 : vector<8x8xf32> to vector<8x8xbf16>
    %331 = vector.extract_strided_slice %325 {offsets = [0, 0], sizes = [8, 8], strides = [1, 1]} : vector<8x32xf32> to vector<8x8xf32>
    %332 = arith.truncf %331 : vector<8x8xf32> to vector<8x8xbf16>
    %333 = vector.extract_strided_slice %326 {offsets = [0, 0], sizes = [8, 8], strides = [1, 1]} : vector<8x32xf32> to vector<8x8xf32>
    %334 = arith.truncf %333 : vector<8x8xf32> to vector<8x8xbf16>
    %cst_77 = arith.constant dense<0.000000e+00> : vector<8x8xf32>
    %335 = tpu.matmul %330, %332, %cst_77 {dimension_numbers = #tpu.dot_dimension_numbers<[1], [1], [0], [0], [0, 0, 1, 0], [], []>} : vector<8x8xbf16>, vector<8x8xbf16>, vector<8x8xf32> -> vector<8x8xf32>
    %cst_78 = arith.constant dense<0xFF800000> : vector<8xf32>
    %336 = vector.multi_reduction <maximumf>, %335, %cst_78 [1] : vector<8x8xf32> to vector<8xf32>
    %337 = vector.shape_cast %336 : vector<8xf32> to vector<8x1xf32>
    %338 = vector.broadcast %337 : vector<8x1xf32> to vector<8x8xf32>
    %339 = arith.subf %335, %338 : vector<8x8xf32>
    %340 = math.exp %339 : vector<8x8xf32>
    %cst_79 = arith.constant dense<0.000000e+00> : vector<8xf32>
    %341 = vector.multi_reduction <add>, %340, %cst_79 [1] : vector<8x8xf32> to vector<8xf32>
    %342 = vector.shape_cast %341 : vector<8xf32> to vector<8x1xf32>
    %343 = tpu.reciprocal %342 {approx = true} : vector<8x1xf32> -> vector<8x1xf32>
    %344 = vector.broadcast %343 : vector<8x1xf32> to vector<8x8xf32>
    %345 = arith.mulf %340, %344 : vector<8x8xf32>
    %346 = arith.truncf %345 : vector<8x8xf32> to vector<8x8xbf16>
    %cst_80 = arith.constant dense<0.000000e+00> : vector<8x8xf32>
    %347 = tpu.matmul %346, %334, %cst_80 {dimension_numbers = #tpu.dot_dimension_numbers<[1], [0], [0], [1], [0, 0, 1, 1], [], []>} : vector<8x8xbf16>, vector<8x8xbf16>, vector<8x8xf32> -> vector<8x8xf32>
    %348 = vector.extract_strided_slice %324 {offsets = [0, 8], sizes = [8, 8], strides = [1, 1]} : vector<8x32xf32> to vector<8x8xf32>
    %cst_81 = arith.constant 0.353553385 : f32
    %349 = vector.broadcast %cst_81 : f32 to vector<8x8xf32>
    %350 = arith.mulf %348, %349 : vector<8x8xf32>
    %351 = arith.truncf %350 : vector<8x8xf32> to vector<8x8xbf16>
    %352 = vector.extract_strided_slice %325 {offsets = [0, 8], sizes = [8, 8], strides = [1, 1]} : vector<8x32xf32> to vector<8x8xf32>
    %353 = arith.truncf %352 : vector<8x8xf32> to vector<8x8xbf16>
    %354 = vector.extract_strided_slice %326 {offsets = [0, 8], sizes = [8, 8], strides = [1, 1]} : vector<8x32xf32> to vector<8x8xf32>
    %355 = arith.truncf %354 : vector<8x8xf32> to vector<8x8xbf16>
    %cst_82 = arith.constant dense<0.000000e+00> : vector<8x8xf32>
    %356 = tpu.matmul %351, %353, %cst_82 {dimension_numbers = #tpu.dot_dimension_numbers<[1], [1], [0], [0], [0, 0, 1, 0], [], []>} : vector<8x8xbf16>, vector<8x8xbf16>, vector<8x8xf32> -> vector<8x8xf32>
    %cst_83 = arith.constant dense<0xFF800000> : vector<8xf32>
    %357 = vector.multi_reduction <maximumf>, %356, %cst_83 [1] : vector<8x8xf32> to vector<8xf32>
    %358 = vector.shape_cast %357 : vector<8xf32> to vector<8x1xf32>
    %359 = vector.broadcast %358 : vector<8x1xf32> to vector<8x8xf32>
    %360 = arith.subf %356, %359 : vector<8x8xf32>
    %361 = math.exp %360 : vector<8x8xf32>
    %cst_84 = arith.constant dense<0.000000e+00> : vector<8xf32>
    %362 = vector.multi_reduction <add>, %361, %cst_84 [1] : vector<8x8xf32> to vector<8xf32>
    %363 = vector.shape_cast %362 : vector<8xf32> to vector<8x1xf32>
    %364 = tpu.reciprocal %363 {approx = true} : vector<8x1xf32> -> vector<8x1xf32>
    %365 = vector.broadcast %364 : vector<8x1xf32> to vector<8x8xf32>
    %366 = arith.mulf %361, %365 : vector<8x8xf32>
    %367 = arith.truncf %366 : vector<8x8xf32> to vector<8x8xbf16>
    %cst_85 = arith.constant dense<0.000000e+00> : vector<8x8xf32>
    %368 = tpu.matmul %367, %355, %cst_85 {dimension_numbers = #tpu.dot_dimension_numbers<[1], [0], [0], [1], [0, 0, 1, 1], [], []>} : vector<8x8xbf16>, vector<8x8xbf16>, vector<8x8xf32> -> vector<8x8xf32>
    %369 = vector.extract_strided_slice %324 {offsets = [0, 16], sizes = [8, 8], strides = [1, 1]} : vector<8x32xf32> to vector<8x8xf32>
    %cst_86 = arith.constant 0.353553385 : f32
    %370 = vector.broadcast %cst_86 : f32 to vector<8x8xf32>
    %371 = arith.mulf %369, %370 : vector<8x8xf32>
    %372 = arith.truncf %371 : vector<8x8xf32> to vector<8x8xbf16>
    %373 = vector.extract_strided_slice %325 {offsets = [0, 16], sizes = [8, 8], strides = [1, 1]} : vector<8x32xf32> to vector<8x8xf32>
    %374 = arith.truncf %373 : vector<8x8xf32> to vector<8x8xbf16>
    %375 = vector.extract_strided_slice %326 {offsets = [0, 16], sizes = [8, 8], strides = [1, 1]} : vector<8x32xf32> to vector<8x8xf32>
    %376 = arith.truncf %375 : vector<8x8xf32> to vector<8x8xbf16>
    %cst_87 = arith.constant dense<0.000000e+00> : vector<8x8xf32>
    %377 = tpu.matmul %372, %374, %cst_87 {dimension_numbers = #tpu.dot_dimension_numbers<[1], [1], [0], [0], [0, 0, 1, 0], [], []>} : vector<8x8xbf16>, vector<8x8xbf16>, vector<8x8xf32> -> vector<8x8xf32>
    %cst_88 = arith.constant dense<0xFF800000> : vector<8xf32>
    %378 = vector.multi_reduction <maximumf>, %377, %cst_88 [1] : vector<8x8xf32> to vector<8xf32>
    %379 = vector.shape_cast %378 : vector<8xf32> to vector<8x1xf32>
    %380 = vector.broadcast %379 : vector<8x1xf32> to vector<8x8xf32>
    %381 = arith.subf %377, %380 : vector<8x8xf32>
    %382 = math.exp %381 : vector<8x8xf32>
    %cst_89 = arith.constant dense<0.000000e+00> : vector<8xf32>
    %383 = vector.multi_reduction <add>, %382, %cst_89 [1] : vector<8x8xf32> to vector<8xf32>
    %384 = vector.shape_cast %383 : vector<8xf32> to vector<8x1xf32>
    %385 = tpu.reciprocal %384 {approx = true} : vector<8x1xf32> -> vector<8x1xf32>
    %386 = vector.broadcast %385 : vector<8x1xf32> to vector<8x8xf32>
    %387 = arith.mulf %382, %386 : vector<8x8xf32>
    %388 = arith.truncf %387 : vector<8x8xf32> to vector<8x8xbf16>
    %cst_90 = arith.constant dense<0.000000e+00> : vector<8x8xf32>
    %389 = tpu.matmul %388, %376, %cst_90 {dimension_numbers = #tpu.dot_dimension_numbers<[1], [0], [0], [1], [0, 0, 1, 1], [], []>} : vector<8x8xbf16>, vector<8x8xbf16>, vector<8x8xf32> -> vector<8x8xf32>
    %390 = vector.extract_strided_slice %324 {offsets = [0, 24], sizes = [8, 8], strides = [1, 1]} : vector<8x32xf32> to vector<8x8xf32>
    %cst_91 = arith.constant 0.353553385 : f32
    %391 = vector.broadcast %cst_91 : f32 to vector<8x8xf32>
    %392 = arith.mulf %390, %391 : vector<8x8xf32>
    %393 = arith.truncf %392 : vector<8x8xf32> to vector<8x8xbf16>
    %394 = vector.extract_strided_slice %325 {offsets = [0, 24], sizes = [8, 8], strides = [1, 1]} : vector<8x32xf32> to vector<8x8xf32>
    %395 = arith.truncf %394 : vector<8x8xf32> to vector<8x8xbf16>
    %396 = vector.extract_strided_slice %326 {offsets = [0, 24], sizes = [8, 8], strides = [1, 1]} : vector<8x32xf32> to vector<8x8xf32>
    %397 = arith.truncf %396 : vector<8x8xf32> to vector<8x8xbf16>
    %cst_92 = arith.constant dense<0.000000e+00> : vector<8x8xf32>
    %398 = tpu.matmul %393, %395, %cst_92 {dimension_numbers = #tpu.dot_dimension_numbers<[1], [1], [0], [0], [0, 0, 1, 0], [], []>} : vector<8x8xbf16>, vector<8x8xbf16>, vector<8x8xf32> -> vector<8x8xf32>
    %cst_93 = arith.constant dense<0xFF800000> : vector<8xf32>
    %399 = vector.multi_reduction <maximumf>, %398, %cst_93 [1] : vector<8x8xf32> to vector<8xf32>
    %400 = vector.shape_cast %399 : vector<8xf32> to vector<8x1xf32>
    %401 = vector.broadcast %400 : vector<8x1xf32> to vector<8x8xf32>
    %402 = arith.subf %398, %401 : vector<8x8xf32>
    %403 = math.exp %402 : vector<8x8xf32>
    %cst_94 = arith.constant dense<0.000000e+00> : vector<8xf32>
    %404 = vector.multi_reduction <add>, %403, %cst_94 [1] : vector<8x8xf32> to vector<8xf32>
    %405 = vector.shape_cast %404 : vector<8xf32> to vector<8x1xf32>
    %406 = tpu.reciprocal %405 {approx = true} : vector<8x1xf32> -> vector<8x1xf32>
    %407 = vector.broadcast %406 : vector<8x1xf32> to vector<8x8xf32>
    %408 = arith.mulf %403, %407 : vector<8x8xf32>
    %409 = arith.truncf %408 : vector<8x8xf32> to vector<8x8xbf16>
    %cst_95 = arith.constant dense<0.000000e+00> : vector<8x8xf32>
    %410 = tpu.matmul %409, %397, %cst_95 {dimension_numbers = #tpu.dot_dimension_numbers<[1], [0], [0], [1], [0, 0, 1, 1], [], []>} : vector<8x8xbf16>, vector<8x8xbf16>, vector<8x8xf32> -> vector<8x8xf32>
    %411 = tpu.concatenate %347, %368, %389, %410 in 1 : vector<8x8xf32>, vector<8x8xf32>, vector<8x8xf32>, vector<8x8xf32> -> vector<8x32xf32>
    %412 = arith.truncf %411 : vector<8x32xf32> to vector<8x32xbf16>
    %cst_96 = arith.constant dense<0.000000e+00> : vector<8x32xf32>
    %413 = tpu.matmul %412, %310, %cst_96 {dimension_numbers = #tpu.dot_dimension_numbers<[1], [0], [0], [1], [0, 0, 1, 1], [], []>} : vector<8x32xbf16>, vector<32x32xbf16>, vector<8x32xf32> -> vector<8x32xf32>
    %414 = vector.broadcast %311 : vector<1x32xf32> to vector<8x32xf32>
    %415 = arith.addf %413, %414 : vector<8x32xf32>
    %416 = arith.addf %307, %415 : vector<8x32xf32>
    %cst_97 = arith.constant dense<0.000000e+00> : vector<8xf32>
    %417 = vector.multi_reduction <add>, %416, %cst_97 [1] : vector<8x32xf32> to vector<8xf32>
    %418 = vector.shape_cast %417 : vector<8xf32> to vector<8x1xf32>
    %cst_98 = arith.constant 3.200000e+01 : f32
    %419 = vector.broadcast %cst_98 : f32 to vector<8x1xf32>
    %420 = arith.divf %418, %419 : vector<8x1xf32>
    %421 = vector.broadcast %420 : vector<8x1xf32> to vector<8x32xf32>
    %422 = arith.subf %416, %421 : vector<8x32xf32>
    %423 = arith.mulf %422, %422 : vector<8x32xf32>
    %cst_99 = arith.constant dense<0.000000e+00> : vector<8xf32>
    %424 = vector.multi_reduction <add>, %423, %cst_99 [1] : vector<8x32xf32> to vector<8xf32>
    %425 = vector.shape_cast %424 : vector<8xf32> to vector<8x1xf32>
    %cst_100 = arith.constant 3.200000e+01 : f32
    %426 = vector.broadcast %cst_100 : f32 to vector<8x1xf32>
    %427 = arith.divf %425, %426 : vector<8x1xf32>
    %428 = vector.broadcast %420 : vector<8x1xf32> to vector<8x32xf32>
    %429 = arith.subf %416, %428 : vector<8x32xf32>
    %cst_101 = arith.constant 9.99999974E-6 : f32
    %430 = vector.broadcast %cst_101 : f32 to vector<8x1xf32>
    %431 = arith.addf %427, %430 : vector<8x1xf32>
    %432 = math.rsqrt %431 : vector<8x1xf32>
    %433 = vector.broadcast %432 : vector<8x1xf32> to vector<8x32xf32>
    %434 = arith.mulf %429, %433 : vector<8x32xf32>
    %435 = vector.broadcast %312 : vector<1x32xf32> to vector<8x32xf32>
    %436 = arith.mulf %434, %435 : vector<8x32xf32>
    %437 = vector.broadcast %313 : vector<1x32xf32> to vector<8x32xf32>
    %438 = arith.addf %436, %437 : vector<8x32xf32>
    %439 = arith.truncf %438 : vector<8x32xf32> to vector<8x32xbf16>
    %cst_102 = arith.constant dense<0.000000e+00> : vector<8x64xf32>
    %440 = tpu.matmul %439, %314, %cst_102 {dimension_numbers = #tpu.dot_dimension_numbers<[1], [0], [0], [1], [0, 0, 1, 1], [], []>} : vector<8x32xbf16>, vector<32x64xbf16>, vector<8x64xf32> -> vector<8x64xf32>
    %441 = vector.broadcast %315 : vector<1x64xf32> to vector<8x64xf32>
    %442 = arith.addf %440, %441 : vector<8x64xf32>
    %cst_103 = arith.constant 0.000000e+00 : f32
    %443 = vector.broadcast %cst_103 : f32 to vector<8x64xf32>
    %444 = arith.maximumf %442, %443 : vector<8x64xf32>
    %445 = arith.truncf %444 : vector<8x64xf32> to vector<8x64xbf16>
    %cst_104 = arith.constant dense<0.000000e+00> : vector<8x32xf32>
    %446 = tpu.matmul %445, %316, %cst_104 {dimension_numbers = #tpu.dot_dimension_numbers<[1], [0], [0], [1], [0, 0, 1, 1], [], []>} : vector<8x64xbf16>, vector<64x32xbf16>, vector<8x32xf32> -> vector<8x32xf32>
    %447 = vector.broadcast %317 : vector<1x32xf32> to vector<8x32xf32>
    %448 = arith.addf %446, %447 : vector<8x32xf32>
    %449 = arith.addf %438, %448 : vector<8x32xf32>
    %cst_105 = arith.constant dense<0.000000e+00> : vector<8xf32>
    %450 = vector.multi_reduction <add>, %449, %cst_105 [1] : vector<8x32xf32> to vector<8xf32>
    %451 = vector.shape_cast %450 : vector<8xf32> to vector<8x1xf32>
    %cst_106 = arith.constant 3.200000e+01 : f32
    %452 = vector.broadcast %cst_106 : f32 to vector<8x1xf32>
    %453 = arith.divf %451, %452 : vector<8x1xf32>
    %454 = vector.broadcast %453 : vector<8x1xf32> to vector<8x32xf32>
    %455 = arith.subf %449, %454 : vector<8x32xf32>
    %456 = arith.mulf %455, %455 : vector<8x32xf32>
    %cst_107 = arith.constant dense<0.000000e+00> : vector<8xf32>
    %457 = vector.multi_reduction <add>, %456, %cst_107 [1] : vector<8x32xf32> to vector<8xf32>
    %458 = vector.shape_cast %457 : vector<8xf32> to vector<8x1xf32>
    %cst_108 = arith.constant 3.200000e+01 : f32
    %459 = vector.broadcast %cst_108 : f32 to vector<8x1xf32>
    %460 = arith.divf %458, %459 : vector<8x1xf32>
    %461 = vector.broadcast %453 : vector<8x1xf32> to vector<8x32xf32>
    %462 = arith.subf %449, %461 : vector<8x32xf32>
    %cst_109 = arith.constant 9.99999974E-6 : f32
    %463 = vector.broadcast %cst_109 : f32 to vector<8x1xf32>
    %464 = arith.addf %460, %463 : vector<8x1xf32>
    %465 = math.rsqrt %464 : vector<8x1xf32>
    %466 = vector.broadcast %465 : vector<8x1xf32> to vector<8x32xf32>
    %467 = arith.mulf %462, %466 : vector<8x32xf32>
    %468 = vector.broadcast %318 : vector<1x32xf32> to vector<8x32xf32>
    %469 = arith.mulf %467, %468 : vector<8x32xf32>
    %470 = vector.broadcast %319 : vector<1x32xf32> to vector<8x32xf32>
    %471 = arith.addf %469, %470 : vector<8x32xf32>
    %c0_110 = arith.constant 0 : index
    %c0_111 = arith.constant 0 : index
    %472 = vector.load %arg20[%c0_110, %c0_111] : memref<32x96xbf16, #tpu.memory_space<vmem>>, vector<32x96xbf16>
    %c0_112 = arith.constant 0 : index
    %c0_113 = arith.constant 0 : index
    %473 = vector.load %arg21[%c0_112, %c0_113] : memref<1x96xf32, #tpu.memory_space<vmem>>, vector<1x96xf32>
    %c0_114 = arith.constant 0 : index
    %c0_115 = arith.constant 0 : index
    %474 = vector.load %arg22[%c0_114, %c0_115] : memref<32x32xbf16, #tpu.memory_space<vmem>>, vector<32x32xbf16>
    %c0_116 = arith.constant 0 : index
    %c0_117 = arith.constant 0 : index
    %475 = vector.load %arg23[%c0_116, %c0_117] : memref<1x32xf32, #tpu.memory_space<vmem>>, vector<1x32xf32>
    %c0_118 = arith.constant 0 : index
    %c0_119 = arith.constant 0 : index
    %476 = vector.load %arg24[%c0_118, %c0_119] : memref<1x32xf32, #tpu.memory_space<vmem>>, vector<1x32xf32>
    %c0_120 = arith.constant 0 : index
    %c0_121 = arith.constant 0 : index
    %477 = vector.load %arg25[%c0_120, %c0_121] : memref<1x32xf32, #tpu.memory_space<vmem>>, vector<1x32xf32>
    %c0_122 = arith.constant 0 : index
    %c0_123 = arith.constant 0 : index
    %478 = vector.load %arg26[%c0_122, %c0_123] : memref<32x64xbf16, #tpu.memory_space<vmem>>, vector<32x64xbf16>
    %c0_124 = arith.constant 0 : index
    %c0_125 = arith.constant 0 : index
    %479 = vector.load %arg27[%c0_124, %c0_125] : memref<1x64xf32, #tpu.memory_space<vmem>>, vector<1x64xf32>
    %c0_126 = arith.constant 0 : index
    %c0_127 = arith.constant 0 : index
    %480 = vector.load %arg28[%c0_126, %c0_127] : memref<64x32xbf16, #tpu.memory_space<vmem>>, vector<64x32xbf16>
    %c0_128 = arith.constant 0 : index
    %c0_129 = arith.constant 0 : index
    %481 = vector.load %arg29[%c0_128, %c0_129] : memref<1x32xf32, #tpu.memory_space<vmem>>, vector<1x32xf32>
    %c0_130 = arith.constant 0 : index
    %c0_131 = arith.constant 0 : index
    %482 = vector.load %arg30[%c0_130, %c0_131] : memref<1x32xf32, #tpu.memory_space<vmem>>, vector<1x32xf32>
    %c0_132 = arith.constant 0 : index
    %c0_133 = arith.constant 0 : index
    %483 = vector.load %arg31[%c0_132, %c0_133] : memref<1x32xf32, #tpu.memory_space<vmem>>, vector<1x32xf32>
    %484 = arith.truncf %471 : vector<8x32xf32> to vector<8x32xbf16>
    %cst_134 = arith.constant dense<0.000000e+00> : vector<8x96xf32>
    %485 = tpu.matmul %484, %472, %cst_134 {dimension_numbers = #tpu.dot_dimension_numbers<[1], [0], [0], [1], [0, 0, 1, 1], [], []>} : vector<8x32xbf16>, vector<32x96xbf16>, vector<8x96xf32> -> vector<8x96xf32>
    %486 = vector.broadcast %473 : vector<1x96xf32> to vector<8x96xf32>
    %487 = arith.addf %485, %486 : vector<8x96xf32>
    %488 = vector.extract_strided_slice %487 {offsets = [0, 0], sizes = [8, 32], strides = [1, 1]} : vector<8x96xf32> to vector<8x32xf32>
    %489 = vector.extract_strided_slice %487 {offsets = [0, 32], sizes = [8, 32], strides = [1, 1]} : vector<8x96xf32> to vector<8x32xf32>
    %490 = vector.extract_strided_slice %487 {offsets = [0, 64], sizes = [8, 32], strides = [1, 1]} : vector<8x96xf32> to vector<8x32xf32>
    %491 = vector.extract_strided_slice %488 {offsets = [0, 0], sizes = [8, 8], strides = [1, 1]} : vector<8x32xf32> to vector<8x8xf32>
    %cst_135 = arith.constant 0.353553385 : f32
    %492 = vector.broadcast %cst_135 : f32 to vector<8x8xf32>
    %493 = arith.mulf %491, %492 : vector<8x8xf32>
    %494 = arith.truncf %493 : vector<8x8xf32> to vector<8x8xbf16>
    %495 = vector.extract_strided_slice %489 {offsets = [0, 0], sizes = [8, 8], strides = [1, 1]} : vector<8x32xf32> to vector<8x8xf32>
    %496 = arith.truncf %495 : vector<8x8xf32> to vector<8x8xbf16>
    %497 = vector.extract_strided_slice %490 {offsets = [0, 0], sizes = [8, 8], strides = [1, 1]} : vector<8x32xf32> to vector<8x8xf32>
    %498 = arith.truncf %497 : vector<8x8xf32> to vector<8x8xbf16>
    %cst_136 = arith.constant dense<0.000000e+00> : vector<8x8xf32>
    %499 = tpu.matmul %494, %496, %cst_136 {dimension_numbers = #tpu.dot_dimension_numbers<[1], [1], [0], [0], [0, 0, 1, 0], [], []>} : vector<8x8xbf16>, vector<8x8xbf16>, vector<8x8xf32> -> vector<8x8xf32>
    %cst_137 = arith.constant dense<0xFF800000> : vector<8xf32>
    %500 = vector.multi_reduction <maximumf>, %499, %cst_137 [1] : vector<8x8xf32> to vector<8xf32>
    %501 = vector.shape_cast %500 : vector<8xf32> to vector<8x1xf32>
    %502 = vector.broadcast %501 : vector<8x1xf32> to vector<8x8xf32>
    %503 = arith.subf %499, %502 : vector<8x8xf32>
    %504 = math.exp %503 : vector<8x8xf32>
    %cst_138 = arith.constant dense<0.000000e+00> : vector<8xf32>
    %505 = vector.multi_reduction <add>, %504, %cst_138 [1] : vector<8x8xf32> to vector<8xf32>
    %506 = vector.shape_cast %505 : vector<8xf32> to vector<8x1xf32>
    %507 = tpu.reciprocal %506 {approx = true} : vector<8x1xf32> -> vector<8x1xf32>
    %508 = vector.broadcast %507 : vector<8x1xf32> to vector<8x8xf32>
    %509 = arith.mulf %504, %508 : vector<8x8xf32>
    %510 = arith.truncf %509 : vector<8x8xf32> to vector<8x8xbf16>
    %cst_139 = arith.constant dense<0.000000e+00> : vector<8x8xf32>
    %511 = tpu.matmul %510, %498, %cst_139 {dimension_numbers = #tpu.dot_dimension_numbers<[1], [0], [0], [1], [0, 0, 1, 1], [], []>} : vector<8x8xbf16>, vector<8x8xbf16>, vector<8x8xf32> -> vector<8x8xf32>
    %512 = vector.extract_strided_slice %488 {offsets = [0, 8], sizes = [8, 8], strides = [1, 1]} : vector<8x32xf32> to vector<8x8xf32>
    %cst_140 = arith.constant 0.353553385 : f32
    %513 = vector.broadcast %cst_140 : f32 to vector<8x8xf32>
    %514 = arith.mulf %512, %513 : vector<8x8xf32>
    %515 = arith.truncf %514 : vector<8x8xf32> to vector<8x8xbf16>
    %516 = vector.extract_strided_slice %489 {offsets = [0, 8], sizes = [8, 8], strides = [1, 1]} : vector<8x32xf32> to vector<8x8xf32>
    %517 = arith.truncf %516 : vector<8x8xf32> to vector<8x8xbf16>
    %518 = vector.extract_strided_slice %490 {offsets = [0, 8], sizes = [8, 8], strides = [1, 1]} : vector<8x32xf32> to vector<8x8xf32>
    %519 = arith.truncf %518 : vector<8x8xf32> to vector<8x8xbf16>
    %cst_141 = arith.constant dense<0.000000e+00> : vector<8x8xf32>
    %520 = tpu.matmul %515, %517, %cst_141 {dimension_numbers = #tpu.dot_dimension_numbers<[1], [1], [0], [0], [0, 0, 1, 0], [], []>} : vector<8x8xbf16>, vector<8x8xbf16>, vector<8x8xf32> -> vector<8x8xf32>
    %cst_142 = arith.constant dense<0xFF800000> : vector<8xf32>
    %521 = vector.multi_reduction <maximumf>, %520, %cst_142 [1] : vector<8x8xf32> to vector<8xf32>
    %522 = vector.shape_cast %521 : vector<8xf32> to vector<8x1xf32>
    %523 = vector.broadcast %522 : vector<8x1xf32> to vector<8x8xf32>
    %524 = arith.subf %520, %523 : vector<8x8xf32>
    %525 = math.exp %524 : vector<8x8xf32>
    %cst_143 = arith.constant dense<0.000000e+00> : vector<8xf32>
    %526 = vector.multi_reduction <add>, %525, %cst_143 [1] : vector<8x8xf32> to vector<8xf32>
    %527 = vector.shape_cast %526 : vector<8xf32> to vector<8x1xf32>
    %528 = tpu.reciprocal %527 {approx = true} : vector<8x1xf32> -> vector<8x1xf32>
    %529 = vector.broadcast %528 : vector<8x1xf32> to vector<8x8xf32>
    %530 = arith.mulf %525, %529 : vector<8x8xf32>
    %531 = arith.truncf %530 : vector<8x8xf32> to vector<8x8xbf16>
    %cst_144 = arith.constant dense<0.000000e+00> : vector<8x8xf32>
    %532 = tpu.matmul %531, %519, %cst_144 {dimension_numbers = #tpu.dot_dimension_numbers<[1], [0], [0], [1], [0, 0, 1, 1], [], []>} : vector<8x8xbf16>, vector<8x8xbf16>, vector<8x8xf32> -> vector<8x8xf32>
    %533 = vector.extract_strided_slice %488 {offsets = [0, 16], sizes = [8, 8], strides = [1, 1]} : vector<8x32xf32> to vector<8x8xf32>
    %cst_145 = arith.constant 0.353553385 : f32
    %534 = vector.broadcast %cst_145 : f32 to vector<8x8xf32>
    %535 = arith.mulf %533, %534 : vector<8x8xf32>
    %536 = arith.truncf %535 : vector<8x8xf32> to vector<8x8xbf16>
    %537 = vector.extract_strided_slice %489 {offsets = [0, 16], sizes = [8, 8], strides = [1, 1]} : vector<8x32xf32> to vector<8x8xf32>
    %538 = arith.truncf %537 : vector<8x8xf32> to vector<8x8xbf16>
    %539 = vector.extract_strided_slice %490 {offsets = [0, 16], sizes = [8, 8], strides = [1, 1]} : vector<8x32xf32> to vector<8x8xf32>
    %540 = arith.truncf %539 : vector<8x8xf32> to vector<8x8xbf16>
    %cst_146 = arith.constant dense<0.000000e+00> : vector<8x8xf32>
    %541 = tpu.matmul %536, %538, %cst_146 {dimension_numbers = #tpu.dot_dimension_numbers<[1], [1], [0], [0], [0, 0, 1, 0], [], []>} : vector<8x8xbf16>, vector<8x8xbf16>, vector<8x8xf32> -> vector<8x8xf32>
    %cst_147 = arith.constant dense<0xFF800000> : vector<8xf32>
    %542 = vector.multi_reduction <maximumf>, %541, %cst_147 [1] : vector<8x8xf32> to vector<8xf32>
    %543 = vector.shape_cast %542 : vector<8xf32> to vector<8x1xf32>
    %544 = vector.broadcast %543 : vector<8x1xf32> to vector<8x8xf32>
    %545 = arith.subf %541, %544 : vector<8x8xf32>
    %546 = math.exp %545 : vector<8x8xf32>
    %cst_148 = arith.constant dense<0.000000e+00> : vector<8xf32>
    %547 = vector.multi_reduction <add>, %546, %cst_148 [1] : vector<8x8xf32> to vector<8xf32>
    %548 = vector.shape_cast %547 : vector<8xf32> to vector<8x1xf32>
    %549 = tpu.reciprocal %548 {approx = true} : vector<8x1xf32> -> vector<8x1xf32>
    %550 = vector.broadcast %549 : vector<8x1xf32> to vector<8x8xf32>
    %551 = arith.mulf %546, %550 : vector<8x8xf32>
    %552 = arith.truncf %551 : vector<8x8xf32> to vector<8x8xbf16>
    %cst_149 = arith.constant dense<0.000000e+00> : vector<8x8xf32>
    %553 = tpu.matmul %552, %540, %cst_149 {dimension_numbers = #tpu.dot_dimension_numbers<[1], [0], [0], [1], [0, 0, 1, 1], [], []>} : vector<8x8xbf16>, vector<8x8xbf16>, vector<8x8xf32> -> vector<8x8xf32>
    %554 = vector.extract_strided_slice %488 {offsets = [0, 24], sizes = [8, 8], strides = [1, 1]} : vector<8x32xf32> to vector<8x8xf32>
    %cst_150 = arith.constant 0.353553385 : f32
    %555 = vector.broadcast %cst_150 : f32 to vector<8x8xf32>
    %556 = arith.mulf %554, %555 : vector<8x8xf32>
    %557 = arith.truncf %556 : vector<8x8xf32> to vector<8x8xbf16>
    %558 = vector.extract_strided_slice %489 {offsets = [0, 24], sizes = [8, 8], strides = [1, 1]} : vector<8x32xf32> to vector<8x8xf32>
    %559 = arith.truncf %558 : vector<8x8xf32> to vector<8x8xbf16>
    %560 = vector.extract_strided_slice %490 {offsets = [0, 24], sizes = [8, 8], strides = [1, 1]} : vector<8x32xf32> to vector<8x8xf32>
    %561 = arith.truncf %560 : vector<8x8xf32> to vector<8x8xbf16>
    %cst_151 = arith.constant dense<0.000000e+00> : vector<8x8xf32>
    %562 = tpu.matmul %557, %559, %cst_151 {dimension_numbers = #tpu.dot_dimension_numbers<[1], [1], [0], [0], [0, 0, 1, 0], [], []>} : vector<8x8xbf16>, vector<8x8xbf16>, vector<8x8xf32> -> vector<8x8xf32>
    %cst_152 = arith.constant dense<0xFF800000> : vector<8xf32>
    %563 = vector.multi_reduction <maximumf>, %562, %cst_152 [1] : vector<8x8xf32> to vector<8xf32>
    %564 = vector.shape_cast %563 : vector<8xf32> to vector<8x1xf32>
    %565 = vector.broadcast %564 : vector<8x1xf32> to vector<8x8xf32>
    %566 = arith.subf %562, %565 : vector<8x8xf32>
    %567 = math.exp %566 : vector<8x8xf32>
    %cst_153 = arith.constant dense<0.000000e+00> : vector<8xf32>
    %568 = vector.multi_reduction <add>, %567, %cst_153 [1] : vector<8x8xf32> to vector<8xf32>
    %569 = vector.shape_cast %568 : vector<8xf32> to vector<8x1xf32>
    %570 = tpu.reciprocal %569 {approx = true} : vector<8x1xf32> -> vector<8x1xf32>
    %571 = vector.broadcast %570 : vector<8x1xf32> to vector<8x8xf32>
    %572 = arith.mulf %567, %571 : vector<8x8xf32>
    %573 = arith.truncf %572 : vector<8x8xf32> to vector<8x8xbf16>
    %cst_154 = arith.constant dense<0.000000e+00> : vector<8x8xf32>
    %574 = tpu.matmul %573, %561, %cst_154 {dimension_numbers = #tpu.dot_dimension_numbers<[1], [0], [0], [1], [0, 0, 1, 1], [], []>} : vector<8x8xbf16>, vector<8x8xbf16>, vector<8x8xf32> -> vector<8x8xf32>
    %575 = tpu.concatenate %511, %532, %553, %574 in 1 : vector<8x8xf32>, vector<8x8xf32>, vector<8x8xf32>, vector<8x8xf32> -> vector<8x32xf32>
    %576 = arith.truncf %575 : vector<8x32xf32> to vector<8x32xbf16>
    %cst_155 = arith.constant dense<0.000000e+00> : vector<8x32xf32>
    %577 = tpu.matmul %576, %474, %cst_155 {dimension_numbers = #tpu.dot_dimension_numbers<[1], [0], [0], [1], [0, 0, 1, 1], [], []>} : vector<8x32xbf16>, vector<32x32xbf16>, vector<8x32xf32> -> vector<8x32xf32>
    %578 = vector.broadcast %475 : vector<1x32xf32> to vector<8x32xf32>
    %579 = arith.addf %577, %578 : vector<8x32xf32>
    %580 = arith.addf %471, %579 : vector<8x32xf32>
    %cst_156 = arith.constant dense<0.000000e+00> : vector<8xf32>
    %581 = vector.multi_reduction <add>, %580, %cst_156 [1] : vector<8x32xf32> to vector<8xf32>
    %582 = vector.shape_cast %581 : vector<8xf32> to vector<8x1xf32>
    %cst_157 = arith.constant 3.200000e+01 : f32
    %583 = vector.broadcast %cst_157 : f32 to vector<8x1xf32>
    %584 = arith.divf %582, %583 : vector<8x1xf32>
    %585 = vector.broadcast %584 : vector<8x1xf32> to vector<8x32xf32>
    %586 = arith.subf %580, %585 : vector<8x32xf32>
    %587 = arith.mulf %586, %586 : vector<8x32xf32>
    %cst_158 = arith.constant dense<0.000000e+00> : vector<8xf32>
    %588 = vector.multi_reduction <add>, %587, %cst_158 [1] : vector<8x32xf32> to vector<8xf32>
    %589 = vector.shape_cast %588 : vector<8xf32> to vector<8x1xf32>
    %cst_159 = arith.constant 3.200000e+01 : f32
    %590 = vector.broadcast %cst_159 : f32 to vector<8x1xf32>
    %591 = arith.divf %589, %590 : vector<8x1xf32>
    %592 = vector.broadcast %584 : vector<8x1xf32> to vector<8x32xf32>
    %593 = arith.subf %580, %592 : vector<8x32xf32>
    %cst_160 = arith.constant 9.99999974E-6 : f32
    %594 = vector.broadcast %cst_160 : f32 to vector<8x1xf32>
    %595 = arith.addf %591, %594 : vector<8x1xf32>
    %596 = math.rsqrt %595 : vector<8x1xf32>
    %597 = vector.broadcast %596 : vector<8x1xf32> to vector<8x32xf32>
    %598 = arith.mulf %593, %597 : vector<8x32xf32>
    %599 = vector.broadcast %476 : vector<1x32xf32> to vector<8x32xf32>
    %600 = arith.mulf %598, %599 : vector<8x32xf32>
    %601 = vector.broadcast %477 : vector<1x32xf32> to vector<8x32xf32>
    %602 = arith.addf %600, %601 : vector<8x32xf32>
    %603 = arith.truncf %602 : vector<8x32xf32> to vector<8x32xbf16>
    %cst_161 = arith.constant dense<0.000000e+00> : vector<8x64xf32>
    %604 = tpu.matmul %603, %478, %cst_161 {dimension_numbers = #tpu.dot_dimension_numbers<[1], [0], [0], [1], [0, 0, 1, 1], [], []>} : vector<8x32xbf16>, vector<32x64xbf16>, vector<8x64xf32> -> vector<8x64xf32>
    %605 = vector.broadcast %479 : vector<1x64xf32> to vector<8x64xf32>
    %606 = arith.addf %604, %605 : vector<8x64xf32>
    %cst_162 = arith.constant 0.000000e+00 : f32
    %607 = vector.broadcast %cst_162 : f32 to vector<8x64xf32>
    %608 = arith.maximumf %606, %607 : vector<8x64xf32>
    %609 = arith.truncf %608 : vector<8x64xf32> to vector<8x64xbf16>
    %cst_163 = arith.constant dense<0.000000e+00> : vector<8x32xf32>
    %610 = tpu.matmul %609, %480, %cst_163 {dimension_numbers = #tpu.dot_dimension_numbers<[1], [0], [0], [1], [0, 0, 1, 1], [], []>} : vector<8x64xbf16>, vector<64x32xbf16>, vector<8x32xf32> -> vector<8x32xf32>
    %611 = vector.broadcast %481 : vector<1x32xf32> to vector<8x32xf32>
    %612 = arith.addf %610, %611 : vector<8x32xf32>
    %613 = arith.addf %602, %612 : vector<8x32xf32>
    %cst_164 = arith.constant dense<0.000000e+00> : vector<8xf32>
    %614 = vector.multi_reduction <add>, %613, %cst_164 [1] : vector<8x32xf32> to vector<8xf32>
    %615 = vector.shape_cast %614 : vector<8xf32> to vector<8x1xf32>
    %cst_165 = arith.constant 3.200000e+01 : f32
    %616 = vector.broadcast %cst_165 : f32 to vector<8x1xf32>
    %617 = arith.divf %615, %616 : vector<8x1xf32>
    %618 = vector.broadcast %617 : vector<8x1xf32> to vector<8x32xf32>
    %619 = arith.subf %613, %618 : vector<8x32xf32>
    %620 = arith.mulf %619, %619 : vector<8x32xf32>
    %cst_166 = arith.constant dense<0.000000e+00> : vector<8xf32>
    %621 = vector.multi_reduction <add>, %620, %cst_166 [1] : vector<8x32xf32> to vector<8xf32>
    %622 = vector.shape_cast %621 : vector<8xf32> to vector<8x1xf32>
    %cst_167 = arith.constant 3.200000e+01 : f32
    %623 = vector.broadcast %cst_167 : f32 to vector<8x1xf32>
    %624 = arith.divf %622, %623 : vector<8x1xf32>
    %625 = vector.broadcast %617 : vector<8x1xf32> to vector<8x32xf32>
    %626 = arith.subf %613, %625 : vector<8x32xf32>
    %cst_168 = arith.constant 9.99999974E-6 : f32
    %627 = vector.broadcast %cst_168 : f32 to vector<8x1xf32>
    %628 = arith.addf %624, %627 : vector<8x1xf32>
    %629 = math.rsqrt %628 : vector<8x1xf32>
    %630 = vector.broadcast %629 : vector<8x1xf32> to vector<8x32xf32>
    %631 = arith.mulf %626, %630 : vector<8x32xf32>
    %632 = vector.broadcast %482 : vector<1x32xf32> to vector<8x32xf32>
    %633 = arith.mulf %631, %632 : vector<8x32xf32>
    %634 = vector.broadcast %483 : vector<1x32xf32> to vector<8x32xf32>
    %635 = arith.addf %633, %634 : vector<8x32xf32>
    %c0_169 = arith.constant 0 : index
    %c0_170 = arith.constant 0 : index
    %636 = vector.load %arg32[%c0_169, %c0_170] : memref<32x96xbf16, #tpu.memory_space<vmem>>, vector<32x96xbf16>
    %c0_171 = arith.constant 0 : index
    %c0_172 = arith.constant 0 : index
    %637 = vector.load %arg33[%c0_171, %c0_172] : memref<1x96xf32, #tpu.memory_space<vmem>>, vector<1x96xf32>
    %c0_173 = arith.constant 0 : index
    %c0_174 = arith.constant 0 : index
    %638 = vector.load %arg34[%c0_173, %c0_174] : memref<32x32xbf16, #tpu.memory_space<vmem>>, vector<32x32xbf16>
    %c0_175 = arith.constant 0 : index
    %c0_176 = arith.constant 0 : index
    %639 = vector.load %arg35[%c0_175, %c0_176] : memref<1x32xf32, #tpu.memory_space<vmem>>, vector<1x32xf32>
    %c0_177 = arith.constant 0 : index
    %c0_178 = arith.constant 0 : index
    %640 = vector.load %arg36[%c0_177, %c0_178] : memref<32x8xbf16, #tpu.memory_space<vmem>>, vector<32x8xbf16>
    %c0_179 = arith.constant 0 : index
    %c0_180 = arith.constant 0 : index
    %641 = vector.load %arg37[%c0_179, %c0_180] : memref<1x8xf32, #tpu.memory_space<vmem>>, vector<1x8xf32>
    %642 = vector.extract_strided_slice %635 {offsets = [7, 0], sizes = [1, 32], strides = [1, 1]} : vector<8x32xf32> to vector<1x32xf32>
    %643 = arith.truncf %642 : vector<1x32xf32> to vector<1x32xbf16>
    %644 = vector.extract_strided_slice %636 {offsets = [0, 0], sizes = [32, 32], strides = [1, 1]} : vector<32x96xbf16> to vector<32x32xbf16>
    %cst_181 = arith.constant dense<0.000000e+00> : vector<1x32xf32>
    %645 = tpu.matmul %643, %644, %cst_181 {dimension_numbers = #tpu.dot_dimension_numbers<[1], [0], [0], [1], [0, 0, 1, 1], [], []>} : vector<1x32xbf16>, vector<32x32xbf16>, vector<1x32xf32> -> vector<1x32xf32>
    %646 = vector.extract_strided_slice %637 {offsets = [0, 0], sizes = [1, 32], strides = [1, 1]} : vector<1x96xf32> to vector<1x32xf32>
    %647 = arith.addf %645, %646 : vector<1x32xf32>
    %648 = arith.truncf %635 : vector<8x32xf32> to vector<8x32xbf16>
    %649 = vector.extract_strided_slice %636 {offsets = [0, 32], sizes = [32, 64], strides = [1, 1]} : vector<32x96xbf16> to vector<32x64xbf16>
    %cst_182 = arith.constant dense<0.000000e+00> : vector<8x64xf32>
    %650 = tpu.matmul %648, %649, %cst_182 {dimension_numbers = #tpu.dot_dimension_numbers<[1], [0], [0], [1], [0, 0, 1, 1], [], []>} : vector<8x32xbf16>, vector<32x64xbf16>, vector<8x64xf32> -> vector<8x64xf32>
    %651 = vector.extract_strided_slice %637 {offsets = [0, 32], sizes = [1, 64], strides = [1, 1]} : vector<1x96xf32> to vector<1x64xf32>
    %652 = vector.broadcast %651 : vector<1x64xf32> to vector<8x64xf32>
    %653 = arith.addf %650, %652 : vector<8x64xf32>
    %654 = vector.extract_strided_slice %653 {offsets = [0, 0], sizes = [8, 32], strides = [1, 1]} : vector<8x64xf32> to vector<8x32xf32>
    %655 = vector.extract_strided_slice %653 {offsets = [0, 32], sizes = [8, 32], strides = [1, 1]} : vector<8x64xf32> to vector<8x32xf32>
    %656 = vector.extract_strided_slice %647 {offsets = [0, 0], sizes = [1, 8], strides = [1, 1]} : vector<1x32xf32> to vector<1x8xf32>
    %cst_183 = arith.constant 0.353553385 : f32
    %657 = vector.broadcast %cst_183 : f32 to vector<1x8xf32>
    %658 = arith.mulf %656, %657 : vector<1x8xf32>
    %659 = arith.truncf %658 : vector<1x8xf32> to vector<1x8xbf16>
    %660 = vector.extract_strided_slice %654 {offsets = [0, 0], sizes = [8, 8], strides = [1, 1]} : vector<8x32xf32> to vector<8x8xf32>
    %661 = arith.truncf %660 : vector<8x8xf32> to vector<8x8xbf16>
    %662 = vector.extract_strided_slice %655 {offsets = [0, 0], sizes = [8, 8], strides = [1, 1]} : vector<8x32xf32> to vector<8x8xf32>
    %663 = arith.truncf %662 : vector<8x8xf32> to vector<8x8xbf16>
    %cst_184 = arith.constant dense<0.000000e+00> : vector<1x8xf32>
    %664 = tpu.matmul %659, %661, %cst_184 {dimension_numbers = #tpu.dot_dimension_numbers<[1], [1], [0], [0], [0, 0, 1, 0], [], []>} : vector<1x8xbf16>, vector<8x8xbf16>, vector<1x8xf32> -> vector<1x8xf32>
    %cst_185 = arith.constant dense<0xFF800000> : vector<1xf32>
    %665 = vector.multi_reduction <maximumf>, %664, %cst_185 [1] : vector<1x8xf32> to vector<1xf32>
    %666 = vector.shape_cast %665 : vector<1xf32> to vector<1x1xf32>
    %667 = vector.broadcast %666 : vector<1x1xf32> to vector<1x8xf32>
    %668 = arith.subf %664, %667 : vector<1x8xf32>
    %669 = math.exp %668 : vector<1x8xf32>
    %cst_186 = arith.constant dense<0.000000e+00> : vector<1xf32>
    %670 = vector.multi_reduction <add>, %669, %cst_186 [1] : vector<1x8xf32> to vector<1xf32>
    %671 = vector.shape_cast %670 : vector<1xf32> to vector<1x1xf32>
    %672 = tpu.reciprocal %671 {approx = true} : vector<1x1xf32> -> vector<1x1xf32>
    %673 = vector.broadcast %672 : vector<1x1xf32> to vector<1x8xf32>
    %674 = arith.mulf %669, %673 : vector<1x8xf32>
    %675 = arith.truncf %674 : vector<1x8xf32> to vector<1x8xbf16>
    %cst_187 = arith.constant dense<0.000000e+00> : vector<1x8xf32>
    %676 = tpu.matmul %675, %663, %cst_187 {dimension_numbers = #tpu.dot_dimension_numbers<[1], [0], [0], [1], [0, 0, 1, 1], [], []>} : vector<1x8xbf16>, vector<8x8xbf16>, vector<1x8xf32> -> vector<1x8xf32>
    %677 = vector.extract_strided_slice %647 {offsets = [0, 8], sizes = [1, 8], strides = [1, 1]} : vector<1x32xf32> to vector<1x8xf32>
    %cst_188 = arith.constant 0.353553385 : f32
    %678 = vector.broadcast %cst_188 : f32 to vector<1x8xf32>
    %679 = arith.mulf %677, %678 : vector<1x8xf32>
    %680 = arith.truncf %679 : vector<1x8xf32> to vector<1x8xbf16>
    %681 = vector.extract_strided_slice %654 {offsets = [0, 8], sizes = [8, 8], strides = [1, 1]} : vector<8x32xf32> to vector<8x8xf32>
    %682 = arith.truncf %681 : vector<8x8xf32> to vector<8x8xbf16>
    %683 = vector.extract_strided_slice %655 {offsets = [0, 8], sizes = [8, 8], strides = [1, 1]} : vector<8x32xf32> to vector<8x8xf32>
    %684 = arith.truncf %683 : vector<8x8xf32> to vector<8x8xbf16>
    %cst_189 = arith.constant dense<0.000000e+00> : vector<1x8xf32>
    %685 = tpu.matmul %680, %682, %cst_189 {dimension_numbers = #tpu.dot_dimension_numbers<[1], [1], [0], [0], [0, 0, 1, 0], [], []>} : vector<1x8xbf16>, vector<8x8xbf16>, vector<1x8xf32> -> vector<1x8xf32>
    %cst_190 = arith.constant dense<0xFF800000> : vector<1xf32>
    %686 = vector.multi_reduction <maximumf>, %685, %cst_190 [1] : vector<1x8xf32> to vector<1xf32>
    %687 = vector.shape_cast %686 : vector<1xf32> to vector<1x1xf32>
    %688 = vector.broadcast %687 : vector<1x1xf32> to vector<1x8xf32>
    %689 = arith.subf %685, %688 : vector<1x8xf32>
    %690 = math.exp %689 : vector<1x8xf32>
    %cst_191 = arith.constant dense<0.000000e+00> : vector<1xf32>
    %691 = vector.multi_reduction <add>, %690, %cst_191 [1] : vector<1x8xf32> to vector<1xf32>
    %692 = vector.shape_cast %691 : vector<1xf32> to vector<1x1xf32>
    %693 = tpu.reciprocal %692 {approx = true} : vector<1x1xf32> -> vector<1x1xf32>
    %694 = vector.broadcast %693 : vector<1x1xf32> to vector<1x8xf32>
    %695 = arith.mulf %690, %694 : vector<1x8xf32>
    %696 = arith.truncf %695 : vector<1x8xf32> to vector<1x8xbf16>
    %cst_192 = arith.constant dense<0.000000e+00> : vector<1x8xf32>
    %697 = tpu.matmul %696, %684, %cst_192 {dimension_numbers = #tpu.dot_dimension_numbers<[1], [0], [0], [1], [0, 0, 1, 1], [], []>} : vector<1x8xbf16>, vector<8x8xbf16>, vector<1x8xf32> -> vector<1x8xf32>
    %698 = vector.extract_strided_slice %647 {offsets = [0, 16], sizes = [1, 8], strides = [1, 1]} : vector<1x32xf32> to vector<1x8xf32>
    %cst_193 = arith.constant 0.353553385 : f32
    %699 = vector.broadcast %cst_193 : f32 to vector<1x8xf32>
    %700 = arith.mulf %698, %699 : vector<1x8xf32>
    %701 = arith.truncf %700 : vector<1x8xf32> to vector<1x8xbf16>
    %702 = vector.extract_strided_slice %654 {offsets = [0, 16], sizes = [8, 8], strides = [1, 1]} : vector<8x32xf32> to vector<8x8xf32>
    %703 = arith.truncf %702 : vector<8x8xf32> to vector<8x8xbf16>
    %704 = vector.extract_strided_slice %655 {offsets = [0, 16], sizes = [8, 8], strides = [1, 1]} : vector<8x32xf32> to vector<8x8xf32>
    %705 = arith.truncf %704 : vector<8x8xf32> to vector<8x8xbf16>
    %cst_194 = arith.constant dense<0.000000e+00> : vector<1x8xf32>
    %706 = tpu.matmul %701, %703, %cst_194 {dimension_numbers = #tpu.dot_dimension_numbers<[1], [1], [0], [0], [0, 0, 1, 0], [], []>} : vector<1x8xbf16>, vector<8x8xbf16>, vector<1x8xf32> -> vector<1x8xf32>
    %cst_195 = arith.constant dense<0xFF800000> : vector<1xf32>
    %707 = vector.multi_reduction <maximumf>, %706, %cst_195 [1] : vector<1x8xf32> to vector<1xf32>
    %708 = vector.shape_cast %707 : vector<1xf32> to vector<1x1xf32>
    %709 = vector.broadcast %708 : vector<1x1xf32> to vector<1x8xf32>
    %710 = arith.subf %706, %709 : vector<1x8xf32>
    %711 = math.exp %710 : vector<1x8xf32>
    %cst_196 = arith.constant dense<0.000000e+00> : vector<1xf32>
    %712 = vector.multi_reduction <add>, %711, %cst_196 [1] : vector<1x8xf32> to vector<1xf32>
    %713 = vector.shape_cast %712 : vector<1xf32> to vector<1x1xf32>
    %714 = tpu.reciprocal %713 {approx = true} : vector<1x1xf32> -> vector<1x1xf32>
    %715 = vector.broadcast %714 : vector<1x1xf32> to vector<1x8xf32>
    %716 = arith.mulf %711, %715 : vector<1x8xf32>
    %717 = arith.truncf %716 : vector<1x8xf32> to vector<1x8xbf16>
    %cst_197 = arith.constant dense<0.000000e+00> : vector<1x8xf32>
    %718 = tpu.matmul %717, %705, %cst_197 {dimension_numbers = #tpu.dot_dimension_numbers<[1], [0], [0], [1], [0, 0, 1, 1], [], []>} : vector<1x8xbf16>, vector<8x8xbf16>, vector<1x8xf32> -> vector<1x8xf32>
    %719 = vector.extract_strided_slice %647 {offsets = [0, 24], sizes = [1, 8], strides = [1, 1]} : vector<1x32xf32> to vector<1x8xf32>
    %cst_198 = arith.constant 0.353553385 : f32
    %720 = vector.broadcast %cst_198 : f32 to vector<1x8xf32>
    %721 = arith.mulf %719, %720 : vector<1x8xf32>
    %722 = arith.truncf %721 : vector<1x8xf32> to vector<1x8xbf16>
    %723 = vector.extract_strided_slice %654 {offsets = [0, 24], sizes = [8, 8], strides = [1, 1]} : vector<8x32xf32> to vector<8x8xf32>
    %724 = arith.truncf %723 : vector<8x8xf32> to vector<8x8xbf16>
    %725 = vector.extract_strided_slice %655 {offsets = [0, 24], sizes = [8, 8], strides = [1, 1]} : vector<8x32xf32> to vector<8x8xf32>
    %726 = arith.truncf %725 : vector<8x8xf32> to vector<8x8xbf16>
    %cst_199 = arith.constant dense<0.000000e+00> : vector<1x8xf32>
    %727 = tpu.matmul %722, %724, %cst_199 {dimension_numbers = #tpu.dot_dimension_numbers<[1], [1], [0], [0], [0, 0, 1, 0], [], []>} : vector<1x8xbf16>, vector<8x8xbf16>, vector<1x8xf32> -> vector<1x8xf32>
    %cst_200 = arith.constant dense<0xFF800000> : vector<1xf32>
    %728 = vector.multi_reduction <maximumf>, %727, %cst_200 [1] : vector<1x8xf32> to vector<1xf32>
    %729 = vector.shape_cast %728 : vector<1xf32> to vector<1x1xf32>
    %730 = vector.broadcast %729 : vector<1x1xf32> to vector<1x8xf32>
    %731 = arith.subf %727, %730 : vector<1x8xf32>
    %732 = math.exp %731 : vector<1x8xf32>
    %cst_201 = arith.constant dense<0.000000e+00> : vector<1xf32>
    %733 = vector.multi_reduction <add>, %732, %cst_201 [1] : vector<1x8xf32> to vector<1xf32>
    %734 = vector.shape_cast %733 : vector<1xf32> to vector<1x1xf32>
    %735 = tpu.reciprocal %734 {approx = true} : vector<1x1xf32> -> vector<1x1xf32>
    %736 = vector.broadcast %735 : vector<1x1xf32> to vector<1x8xf32>
    %737 = arith.mulf %732, %736 : vector<1x8xf32>
    %738 = arith.truncf %737 : vector<1x8xf32> to vector<1x8xbf16>
    %cst_202 = arith.constant dense<0.000000e+00> : vector<1x8xf32>
    %739 = tpu.matmul %738, %726, %cst_202 {dimension_numbers = #tpu.dot_dimension_numbers<[1], [0], [0], [1], [0, 0, 1, 1], [], []>} : vector<1x8xbf16>, vector<8x8xbf16>, vector<1x8xf32> -> vector<1x8xf32>
    %740 = tpu.concatenate %676, %697, %718, %739 in 1 : vector<1x8xf32>, vector<1x8xf32>, vector<1x8xf32>, vector<1x8xf32> -> vector<1x32xf32>
    %741 = arith.truncf %740 : vector<1x32xf32> to vector<1x32xbf16>
    %cst_203 = arith.constant dense<0.000000e+00> : vector<1x32xf32>
    %742 = tpu.matmul %741, %638, %cst_203 {dimension_numbers = #tpu.dot_dimension_numbers<[1], [0], [0], [1], [0, 0, 1, 1], [], []>} : vector<1x32xbf16>, vector<32x32xbf16>, vector<1x32xf32> -> vector<1x32xf32>
    %743 = arith.addf %742, %639 : vector<1x32xf32>
    %744 = arith.truncf %743 : vector<1x32xf32> to vector<1x32xbf16>
    %cst_204 = arith.constant dense<0.000000e+00> : vector<1x8xf32>
    %745 = tpu.matmul %744, %640, %cst_204 {dimension_numbers = #tpu.dot_dimension_numbers<[1], [0], [0], [1], [0, 0, 1, 1], [], []>} : vector<1x32xbf16>, vector<32x8xbf16>, vector<1x8xf32> -> vector<1x8xf32>
    %746 = arith.addf %745, %641 : vector<1x8xf32>
    %c0_205 = arith.constant 0 : index
    %c0_206 = arith.constant 0 : index
    %c0_207 = arith.constant 0 : index
    %747 = vector.load %arg38[%c0_205, %c0_206, %c0_207] : memref<1x1x8xf32, #tpu.memory_space<vmem>>, vector<1x1x8xf32>
    %748 = vector.shape_cast %747 : vector<1x1x8xf32> to vector<1x8xf32>
    %749 = vector.shape_cast %746 : vector<1x8xf32> to vector<1x1x8xf32>
    tpu.vector_store %arg38[%c0_205, %c0_206, %c0_207], %749 {strides = array<i32>} : memref<1x1x8xf32, #tpu.memory_space<vmem>>, vector<1x1x8xf32>,
    return
  }
  func.func @transform_0(%arg0: i32) -> (i32, i32, i32) {
    %c0_i32 = arith.constant 0 : i32
    %c0_i32_0 = arith.constant 0 : i32
    %c0_i32_1 = arith.constant 0 : i32
    return %arg0, %c0_i32, %c0_i32_0 : i32, i32, i32
  }
  func.func @transform_1(%arg0: i32) -> (i32, i32) {
    %c0_i32 = arith.constant 0 : i32
    %c0_i32_0 = arith.constant 0 : i32
    %c0_i32_1 = arith.constant 0 : i32
    return %c0_i32, %c0_i32_0 : i32, i32
  }
  func.func @transform_2(%arg0: i32) -> (i32, i32) {
    %c0_i32 = arith.constant 0 : i32
    %c0_i32_0 = arith.constant 0 : i32
    %c0_i32_1 = arith.constant 0 : i32
    return %c0_i32, %c0_i32_0 : i32, i32
  }
  func.func @transform_3(%arg0: i32) -> (i32, i32) {
    %c0_i32 = arith.constant 0 : i32
    %c0_i32_0 = arith.constant 0 : i32
    %c0_i32_1 = arith.constant 0 : i32
    return %c0_i32, %c0_i32_0 : i32, i32
  }
  func.func @transform_4(%arg0: i32) -> (i32, i32) {
    %c0_i32 = arith.constant 0 : i32
    %c0_i32_0 = arith.constant 0 : i32
    %c0_i32_1 = arith.constant 0 : i32
    return %c0_i32, %c0_i32_0 : i32, i32
  }
  func.func @transform_5(%arg0: i32) -> (i32, i32) {
    %c0_i32 = arith.constant 0 : i32
    %c0_i32_0 = arith.constant 0 : i32
    %c0_i32_1 = arith.constant 0 : i32
    return %c0_i32, %c0_i32_0 : i32, i32
  }
  func.func @transform_6(%arg0: i32) -> (i32, i32) {
    %c0_i32 = arith.constant 0 : i32
    %c0_i32_0 = arith.constant 0 : i32
    %c0_i32_1 = arith.constant 0 : i32
    return %c0_i32, %c0_i32_0 : i32, i32
  }
  func.func @transform_7(%arg0: i32) -> (i32, i32) {
    %c0_i32 = arith.constant 0 : i32
    %c0_i32_0 = arith.constant 0 : i32
    %c0_i32_1 = arith.constant 0 : i32
    return %c0_i32, %c0_i32_0 : i32, i32
  }
  func.func @transform_8(%arg0: i32) -> (i32, i32) {
    %c0_i32 = arith.constant 0 : i32
    %c0_i32_0 = arith.constant 0 : i32
    %c0_i32_1 = arith.constant 0 : i32
    return %c0_i32, %c0_i32_0 : i32, i32
  }
  func.func @transform_9(%arg0: i32) -> (i32, i32) {
    %c0_i32 = arith.constant 0 : i32
    %c0_i32_0 = arith.constant 0 : i32
    %c0_i32_1 = arith.constant 0 : i32
    return %c0_i32, %c0_i32_0 : i32, i32
  }
  func.func @transform_10(%arg0: i32) -> (i32, i32) {
    %c0_i32 = arith.constant 0 : i32
    %c0_i32_0 = arith.constant 0 : i32
    %c0_i32_1 = arith.constant 0 : i32
    return %c0_i32, %c0_i32_0 : i32, i32
  }
  func.func @transform_11(%arg0: i32) -> (i32, i32) {
    %c0_i32 = arith.constant 0 : i32
    %c0_i32_0 = arith.constant 0 : i32
    %c0_i32_1 = arith.constant 0 : i32
    return %c0_i32, %c0_i32_0 : i32, i32
  }
  func.func @transform_12(%arg0: i32) -> (i32, i32) {
    %c0_i32 = arith.constant 0 : i32
    %c0_i32_0 = arith.constant 0 : i32
    %c0_i32_1 = arith.constant 0 : i32
    return %c0_i32, %c0_i32_0 : i32, i32
  }
  func.func @transform_13(%arg0: i32) -> (i32, i32) {
    %c0_i32 = arith.constant 0 : i32
    %c0_i32_0 = arith.constant 0 : i32
    %c0_i32_1 = arith.constant 0 : i32
    return %c0_i32, %c0_i32_0 : i32, i32
  }
  func.func @transform_14(%arg0: i32) -> (i32, i32) {
    %c0_i32 = arith.constant 0 : i32
    %c0_i32_0 = arith.constant 0 : i32
    %c0_i32_1 = arith.constant 0 : i32
    return %c0_i32, %c0_i32_0 : i32, i32
  }
  func.func @transform_15(%arg0: i32) -> (i32, i32) {
    %c0_i32 = arith.constant 0 : i32
    %c0_i32_0 = arith.constant 0 : i32
    %c0_i32_1 = arith.constant 0 : i32
    return %c0_i32, %c0_i32_0 : i32, i32
  }
  func.func @transform_16(%arg0: i32) -> (i32, i32) {
    %c0_i32 = arith.constant 0 : i32
    %c0_i32_0 = arith.constant 0 : i32
    %c0_i32_1 = arith.constant 0 : i32
    return %c0_i32, %c0_i32_0 : i32, i32
  }
  func.func @transform_17(%arg0: i32) -> (i32, i32) {
    %c0_i32 = arith.constant 0 : i32
    %c0_i32_0 = arith.constant 0 : i32
    %c0_i32_1 = arith.constant 0 : i32
    return %c0_i32, %c0_i32_0 : i32, i32
  }
  func.func @transform_18(%arg0: i32) -> (i32, i32) {
    %c0_i32 = arith.constant 0 : i32
    %c0_i32_0 = arith.constant 0 : i32
    %c0_i32_1 = arith.constant 0 : i32
    return %c0_i32, %c0_i32_0 : i32, i32
  }
  func.func @transform_19(%arg0: i32) -> (i32, i32) {
    %c0_i32 = arith.constant 0 : i32
    %c0_i32_0 = arith.constant 0 : i32
    %c0_i32_1 = arith.constant 0 : i32
    return %c0_i32, %c0_i32_0 : i32, i32
  }
  func.func @transform_20(%arg0: i32) -> (i32, i32) {
    %c0_i32 = arith.constant 0 : i32
    %c0_i32_0 = arith.constant 0 : i32
    %c0_i32_1 = arith.constant 0 : i32
    return %c0_i32, %c0_i32_0 : i32, i32
  }
  func.func @transform_21(%arg0: i32) -> (i32, i32) {
    %c0_i32 = arith.constant 0 : i32
    %c0_i32_0 = arith.constant 0 : i32
    %c0_i32_1 = arith.constant 0 : i32
    return %c0_i32, %c0_i32_0 : i32, i32
  }
  func.func @transform_22(%arg0: i32) -> (i32, i32) {
    %c0_i32 = arith.constant 0 : i32
    %c0_i32_0 = arith.constant 0 : i32
    %c0_i32_1 = arith.constant 0 : i32
    return %c0_i32, %c0_i32_0 : i32, i32
  }
  func.func @transform_23(%arg0: i32) -> (i32, i32) {
    %c0_i32 = arith.constant 0 : i32
    %c0_i32_0 = arith.constant 0 : i32
    %c0_i32_1 = arith.constant 0 : i32
    return %c0_i32, %c0_i32_0 : i32, i32
  }
  func.func @transform_24(%arg0: i32) -> (i32, i32) {
    %c0_i32 = arith.constant 0 : i32
    %c0_i32_0 = arith.constant 0 : i32
    %c0_i32_1 = arith.constant 0 : i32
    return %c0_i32, %c0_i32_0 : i32, i32
  }
  func.func @transform_25(%arg0: i32) -> (i32, i32) {
    %c0_i32 = arith.constant 0 : i32
    %c0_i32_0 = arith.constant 0 : i32
    %c0_i32_1 = arith.constant 0 : i32
    return %c0_i32, %c0_i32_0 : i32, i32
  }
  func.func @transform_26(%arg0: i32) -> (i32, i32) {
    %c0_i32 = arith.constant 0 : i32
    %c0_i32_0 = arith.constant 0 : i32
    %c0_i32_1 = arith.constant 0 : i32
    return %c0_i32, %c0_i32_0 : i32, i32
  }
  func.func @transform_27(%arg0: i32) -> (i32, i32) {
    %c0_i32 = arith.constant 0 : i32
    %c0_i32_0 = arith.constant 0 : i32
    %c0_i32_1 = arith.constant 0 : i32
    return %c0_i32, %c0_i32_0 : i32, i32
  }
  func.func @transform_28(%arg0: i32) -> (i32, i32) {
    %c0_i32 = arith.constant 0 : i32
    %c0_i32_0 = arith.constant 0 : i32
    %c0_i32_1 = arith.constant 0 : i32
    return %c0_i32, %c0_i32_0 : i32, i32
  }
  func.func @transform_29(%arg0: i32) -> (i32, i32) {
    %c0_i32 = arith.constant 0 : i32
    %c0_i32_0 = arith.constant 0 : i32
    %c0_i32_1 = arith.constant 0 : i32
    return %c0_i32, %c0_i32_0 : i32, i32
  }
  func.func @transform_30(%arg0: i32) -> (i32, i32) {
    %c0_i32 = arith.constant 0 : i32
    %c0_i32_0 = arith.constant 0 : i32
    %c0_i32_1 = arith.constant 0 : i32
    return %c0_i32, %c0_i32_0 : i32, i32
  }
  func.func @transform_31(%arg0: i32) -> (i32, i32) {
    %c0_i32 = arith.constant 0 : i32
    %c0_i32_0 = arith.constant 0 : i32
    %c0_i32_1 = arith.constant 0 : i32
    return %c0_i32, %c0_i32_0 : i32, i32
  }
  func.func @transform_32(%arg0: i32) -> (i32, i32) {
    %c0_i32 = arith.constant 0 : i32
    %c0_i32_0 = arith.constant 0 : i32
    %c0_i32_1 = arith.constant 0 : i32
    return %c0_i32, %c0_i32_0 : i32, i32
  }
  func.func @transform_33(%arg0: i32) -> (i32, i32) {
    %c0_i32 = arith.constant 0 : i32
    %c0_i32_0 = arith.constant 0 : i32
    %c0_i32_1 = arith.constant 0 : i32
    return %c0_i32, %c0_i32_0 : i32, i32
  }
  func.func @transform_34(%arg0: i32) -> (i32, i32) {
    %c0_i32 = arith.constant 0 : i32
    %c0_i32_0 = arith.constant 0 : i32
    %c0_i32_1 = arith.constant 0 : i32
    return %c0_i32, %c0_i32_0 : i32, i32
  }
  func.func @transform_35(%arg0: i32) -> (i32, i32) {
    %c0_i32 = arith.constant 0 : i32
    %c0_i32_0 = arith.constant 0 : i32
    %c0_i32_1 = arith.constant 0 : i32
    return %c0_i32, %c0_i32_0 : i32, i32
  }
  func.func @transform_36(%arg0: i32) -> (i32, i32) {
    %c0_i32 = arith.constant 0 : i32
    %c0_i32_0 = arith.constant 0 : i32
    %c0_i32_1 = arith.constant 0 : i32
    return %c0_i32, %c0_i32_0 : i32, i32
  }
  func.func @transform_37(%arg0: i32) -> (i32, i32, i32) {
    %c0_i32 = arith.constant 0 : i32
    %c0_i32_0 = arith.constant 0 : i32
    %c0_i32_1 = arith.constant 0 : i32
    return %arg0, %c0_i32, %c0_i32_0 : i32, i32, i32
  }
}

</mosaic_0001>

<bundles_post_ra>
// kernel: cosmic_decoder_forward.1
= control target key start
LH: loop header
LB: loop body
LE: loop exit
PB: predicated region body
PF: predicated region fallthrough
CT: control target
= control target key end

     0   :  { %s4397_s6 = smov 1   ;;  %s4398_s10 = smov 2   ;;  %s5133_s0 = inlined_call_operand.smem [shape: u32[38], index: -1, kind: input, shape index: {}] }
   0x1   :  { %s4459_s5 = sld [smem:[%s5133_s0]]   ;;  %s4399_s14 = smov 3  }
   0x2   :  { %s4464_s9 = sld [smem:[%s5133_s0 + %s4397_s6]]   ;;  %s4400_s18 = smov 4  }
   0x3   :  { %s4469_s13 = sld [smem:[%s5133_s0 + %s4398_s10]]   ;;  %s4401_s22 = smov 5  }
   0x4   :  { %s4474_s17 = sld [smem:[%s5133_s0 + %s4399_s14]]   ;;  %s4402_s26 = smov 6  }
   0x5   :  { %s4479_s21 = sld [smem:[%s5133_s0 + %s4400_s18]]   ;;  %s4403_s30 = smov 7  }
   0x6   :  { %s4484_s25 = sld [smem:[%s5133_s0 + %s4401_s22]]   ;;  %s4404_s4 = smov 8  }
   0x7   :  { %5180 = sst [smem:[#allocation5_spill]] %s4459_s5  ;;  %s4405_s10 = smov 9  }
   0x8   :  { %5181 = sst [smem:[#allocation6_spill]] %s4464_s9  ;;  %s4406_s15 = smov 10  }
   0x9   :  { %5182 = sst [smem:[#allocation7_spill]] %s4469_s13  ;;  %s4407_s20 = smov 11  }
   0xa   :  { %5183 = sst [smem:[#allocation8_spill]] %s4474_s17  ;;  %s4409_s1 = smov 13  }
   0xb   :  { %5184 = sst [smem:[#allocation9_spill]] %s4479_s21  ;;  %s4410_s7 = smov 14  }
   0xc   :  { %5185 = sst [smem:[#allocation10_spill]] %s4484_s25  ;;  %s4412_s22 = smov 16  }
   0xd   :  { %s4489_s29 = sld [smem:[%s5133_s0 + %s4402_s26]]   ;;  %s4408_s26 = smov 12  }
   0xe   :  { %s4494_s3 = sld [smem:[%s5133_s0 + %s4403_s30]]   ;;  %s4413_s28 = smov 17  }
   0xf   :  { %s4499_s8 = sld [smem:[%s5133_s0 + %s4404_s4]]  }
  0x10   :  { %s4504_s14 = sld [smem:[%s5133_s0 + %s4405_s10]]  }
  0x11   :  { %s4509_s19 = sld [smem:[%s5133_s0 + %s4406_s15]]   ;;  %s4411_s15 = smov 15  }
  0x12   :  { %s4514_s24 = sld [smem:[%s5133_s0 + %s4407_s20]]  }
  0x13   :  { %s4519_s30 = sld [smem:[%s5133_s0 + %s4408_s26]]  }
  0x14   :  { %5186 = sst [smem:[#allocation11_spill]] %s4494_s3 }
  0x15   :  { %5187 = sst [smem:[#allocation12_spill]] %s4499_s8 }
  0x16   :  { %5188 = sst [smem:[#allocation13_spill]] %s4504_s14 }
  0x17   :  { %5189 = sst [smem:[#allocation14_spill]] %s4509_s19 }
  0x18   :  { %5190 = sst [smem:[#allocation15_spill]] %s4514_s24 }
  0x19   :  { %s4524_s6 = sld [smem:[%s5133_s0 + %s4409_s1]]  }
  0x1a   :  { %s4529_s12 = sld [smem:[%s5133_s0 + %s4410_s7]]   ;;  %s4414_s7 = smov 18  }
  0x1b   :  { %s4534_s20 = sld [smem:[%s5133_s0 + %s4411_s15]]   ;;  %s4415_s15 = smov 19  }
  0x1c   :  { %s4539_s27 = sld [smem:[%s5133_s0 + %s4412_s22]]   ;;  %s4416_s22 = smov 20  }
  0x1d   :  { %s4544_s4 = sld [smem:[%s5133_s0 + %s4413_s28]]   ;;  %s4417_s28 = smov 21  }
  0x1f   :  { %5191 = sst [smem:[#allocation16_spill]] %s4524_s6 }
  0x20   :  { %5192 = sst [smem:[#allocation17_spill]] %s4529_s12 }
  0x21   :  { %5193 = sst [smem:[#allocation18_spill]] %s4534_s20 }
  0x22   :  { %5194 = sst [smem:[#allocation19_spill]] %s4539_s27 }
  0x23   :  { %5195 = sst [smem:[#allocation20_spill]] %s4544_s4 }
  0x24   :  { %s4549_s12 = sld [smem:[%s5133_s0 + %s4414_s7]]   ;;  %s4418_s7 = smov 22  }
  0x25   :  { %s4554_s20 = sld [smem:[%s5133_s0 + %s4415_s15]]   ;;  %s4419_s15 = smov 23  }
  0x26   :  { %s4559_s27 = sld [smem:[%s5133_s0 + %s4416_s22]]   ;;  %s4420_s22 = smov 24  }
  0x27   :  { %s4564_s4 = sld [smem:[%s5133_s0 + %s4417_s28]]   ;;  %s4421_s28 = smov 25  }
  0x2a   :  { %5196 = sst [smem:[#allocation21_spill]] %s4549_s12 }
  0x2b   :  { %5197 = sst [smem:[#allocation22_spill]] %s4554_s20 }
  0x2c   :  { %5198 = sst [smem:[#allocation23_spill]] %s4559_s27 }
  0x2d   :  { %5199 = sst [smem:[#allocation24_spill]] %s4564_s4 }
  0x2e   :  { %s4569_s12 = sld [smem:[%s5133_s0 + %s4418_s7]]   ;;  %s4422_s7 = smov 26  }
  0x2f   :  { %s4574_s20 = sld [smem:[%s5133_s0 + %s4419_s15]]   ;;  %s4423_s15 = smov 27  }
  0x30   :  { %s4579_s27 = sld [smem:[%s5133_s0 + %s4420_s22]]   ;;  %s4424_s22 = smov 28  }
  0x31   :  { %s4584_s4 = sld [smem:[%s5133_s0 + %s4421_s28]]   ;;  %s4425_s28 = smov 29  }
  0x34   :  { %5200 = sst [smem:[#allocation25_spill]] %s4569_s12 }
  0x35   :  { %5201 = sst [smem:[#allocation26_spill]] %s4574_s20 }
  0x36   :  { %5202 = sst [smem:[#allocation27_spill]] %s4579_s27 }
  0x37   :  { %5203 = sst [smem:[#allocation28_spill]] %s4584_s4 }
  0x38   :  { %s4589_s12 = sld [smem:[%s5133_s0 + %s4422_s7]]   ;;  %s4426_s7 = smov 30  }
  0x39   :  { %s4594_s20 = sld [smem:[%s5133_s0 + %s4423_s15]]   ;;  %s4427_s15 = smov 31  }
  0x3a   :  { %s4599_s27 = sld [smem:[%s5133_s0 + %s4424_s22]]   ;;  %s4428_s22 = smov 32  }
  0x3b   :  { %s4604_s4 = sld [smem:[%s5133_s0 + %s4425_s28]]   ;;  %s4429_s28 = smov 33  }
  0x3e   :  { %5204 = sst [smem:[#allocation29_spill]] %s4589_s12 }
  0x3f   :  { %5205 = sst [smem:[#allocation30_spill]] %s4594_s20 }
  0x40   :  { %5206 = sst [smem:[#allocation31_spill]] %s4599_s27 }
  0x41   :  { %5207 = sst [smem:[#allocation32_spill]] %s4604_s4 }
  0x42   :  { %s4609_s12 = sld [smem:[%s5133_s0 + %s4426_s7]]   ;;  %s4430_s7 = smov 34  }
  0x43   :  { %s4614_s20 = sld [smem:[%s5133_s0 + %s4427_s15]]   ;;  %s4431_s15 = smov 35  }
  0x44   :  { %s4619_s27 = sld [smem:[%s5133_s0 + %s4428_s22]]   ;;  %s4432_s22 = smov 36  }
  0x45   :  { %s4624_s4 = sld [smem:[%s5133_s0 + %s4429_s28]]   ;;  %s4433_s28 = smov 37  }
  0x48   :  { %5208 = sst [smem:[#allocation33_spill]] %s4609_s12 }
  0x49   :  { %5209 = sst [smem:[#allocation34_spill]] %s4614_s20 }
  0x4a   :  { %5210 = sst [smem:[#allocation35_spill]] %s4619_s27 }
  0x4b   :  { %5211 = sst [smem:[#allocation36_spill]] %s4624_s4 }
  0x4c   :  { %s4629_s12 = sld [smem:[%s5133_s0 + %s4430_s7]]  }
  0x4d   :  { %s4634_s20 = sld [smem:[%s5133_s0 + %s4431_s15]]  }
  0x4e   :  { %s4639_s27 = sld [smem:[%s5133_s0 + %s4432_s22]]  }
  0x4f   :  { %s4644_s4 = sld [smem:[%s5133_s0 + %s4433_s28]]  }
  0x50   :  { %80 = vsyncpa [#allocation3], 0 }
  0x51   :  { %82 = vsyncpa [#allocation3 + $0x1], 0  ;;  %s4646_s7 = smov 0   ;;  %s4648_s10 = smov 0  }
  0x52   :  { %s4650_s11 = smov 0   ;;  %s4652_s15 = smov 0  }
  0x53 LB: > { %s5212_s25 = sld [smem:[#allocation10_spill]]  ;;  %s4667_s0 = sadd.s32 4294967295, %s4395_s15   ;;  %s4391_s11 = sphi %s4650_s11, %s5263_s11   ;;  %s4387_s10 = sphi %s4648_s10, %s5262_s10   ;;  %s4383_s7 = sphi %s4646_s7, %s5261_s7   ;;  %s4395_s15 = sphi %s4652_s15, %s5264_s15  }
  0x54   : > { %s5213_s21 = sld [smem:[#allocation9_spill]]  ;;  %s3830_s16 = sadd.s32 4294967294, %s4395_s15  }
  0x55   : > { %s5214_s14 = sld [smem:[#allocation13_spill]]  ;;  %s4671_s18 = sadd.s32 1, %s4395_s15  }
  0x56   : > { %s5215_s13 = sld [smem:[#allocation7_spill]]  ;;  %s877_s22 = sadd.s32 1, %s4391_s11 }
  0x57   : > { %s5216_s9 = sld [smem:[#allocation6_spill]]  ;;  %s874_s23 = ssub.s32 %s4395_s15, %s4671_s18 }
  0x58   : > { %s5217_s6 = sld [smem:[#allocation16_spill]]  ;;  %p887_p0 = scmp.ne.s32.totalorder %s4391_s11, %s4387_s10 }
  0x59   : > { %s5218_s3 = sld [smem:[#allocation11_spill]]  ;;  %p875_p1 = scmp.eq.s32.totalorder %s874_s23, 0 }
  0x5a   : > { %p888_p2 = scmp.eq.s32.totalorder %s4667_s0, 1  ;;  %p893_p3 = scmp.ne.s32.totalorder %s4387_s10, %s4383_s7 }
  0x5b   : > { %p894_p4 = scmp.eq.s32.totalorder %s3830_s16, 1  ;;  %p3833_p7 = scmp.ge.s32.totalorder %s4395_s15, 1 }
  0x5c   : > { %s4682_s26 = scalar_select %p875_p1, %s4391_s11, %s877_s22  }
  0x5d   : > { %p4684_p5 = por %p888_p2, %p887_p0  ;;  %p4688_p6 = por %p894_p4, %p893_p3 }
  0x5e   : > { %p1027_p8 = scmp.lt.s32.totalorder %s4395_s15, 3 }
  0x60   : > { %p1028_p9 = pnand %p3833_p7, %p1027_p8 }
  0x61   : > { %p1117_p10 = scmp.lt.s32.totalorder (!%p1028_p9), %s4667_s0, 1  ;;  %s5221_s5 = sld [smem:[#allocation5_spill]] (!%p1028_p9) }
  0x62   : > { %1031 = sbr.rel (%p1028_p9) target bundleno = 16087 (0x3ed7), region = 168  ;;  %s5222_s17 = sld [smem:[#allocation8_spill]] (!%p1028_p9) }
  0x63   : > { %s5142_s23 = smov (!%p1028_p9), 64   ;;  %s5223_s8 = sld [smem:[#allocation12_spill]] (!%p1028_p9) }
  0x64   : > { %s5225_s19 = sld [smem:[#allocation14_spill]] (!%p1028_p9) }
  0x65   : > { %s5227_s24 = sld [smem:[#allocation15_spill]] (!%p1028_p9) }
  0x67   : > { %v1128_v0 = vld [vmem:[%s5215_s13 + $0x18] sm:$0xff]  ;;  %v1124_v1 = vld [vmem:[%s5216_s9 + $0x8] sm:$0xff]  ;;  %v1127_v2 = vld [vmem:[%s5215_s13 + $0x10] sm:$0xff]  ;;  %s1118_s2 = scalar_select %p1117_p10, %s4667_s0, 1  ;;  %vm1133_vm0 = vcmask 130048   ;;  %v4434_v7 = vmov 0.0  }
  0x68   : > { %1173 = vmatpush.msra.mxu1 %v1128_v0  ;;  %1151 = vmatpush.msra.mxu0 %v1124_v1  ;;  %v1123_v3 = vld [vmem:[%s5216_s9] sm:$0xff]  ;;  %v1126_v4 = vld [vmem:[%s5215_s13 + $0x8] sm:$0xff]  ;;  %vm1157_vm5 = vcmask 261120   ;;  %vm1708_vm14 = vcmask 1040384   ;;  %vm1710_vm15 = vcmask 1041408   ;;  %s5239_s9 = smov 112  }
  0x69   : > { %1236 = vmatpush.msra.mxu2 %v1128_v0  ;;  %1306 = vmatpush.msra.mxu3 %v1128_v0  ;;  %s3834_s16 = sshll.u32 %s1118_s2, 3  ;;  %v1125_v5 = vld [vmem:[%s5215_s13] sm:$0xff]  ;;  %s5144_s2 = smov 32  }
  0x6a   : > { %1174 = vmatpush.msra.mxu1 %v1127_v2  ;;  %1152 = vmatpush.msra.mxu0 %v1123_v3  ;;  %s1120_s22 = scalar_lea.vmem %s5221_s5, %s3834_s16  ;;  %v4128_v8 = vld [vmem:[%s5222_s17] ss:$0 sm:$0xff]  ;;  %s5147_s16 = smov 88  }
  0x6b   : > { %1237 = vmatpush.msra.mxu2 %v1127_v2  ;;  %1307 = vmatpush.msra.mxu3 %v1127_v2  ;;  %v1122_v6 = vld [vmem:[%s1120_s22] sm:$0xff]  ;;  %s5168_s22 = smov 96   ;;  %s5156_s5 = smov 112  }
  0x6c   : > { %1175 = vmatpush.msra.mxu1 %v1126_v4  ;;  %1376 = vmatpush.msrb.mxu0 %v1128_v0  ;;  %s5241_s13 = smov 104   ;;  %s5248_s17 = sld [smem:[#allocation25_spill]] }
  0x6d   : > { %1238 = vmatpush.msra.mxu2 %v1126_v4  ;;  %1308 = vmatpush.msra.mxu3 %v1126_v4 }
  0x6e   : > { %3835 = vmatmul.msk.f32.vlgmr.msra.gmra.mxu0 %vm1133_vm0, %v1122_v6  ;;  %1176 = vmatpush.msra.mxu1 %v1125_v5 }
  0x6f   : > { %1177 = vmatmul.f32.vlgmr.msra.gmra.mxu1 %v4434_v7  ;;  %1239 = vmatpush.msra.mxu2 %v1125_v5 }
  0x70   : > { %1309 = vmatpush.msra.mxu3 %v1125_v5  ;;  %1377 = vmatpush.msrb.mxu0 %v1127_v2 }
  0x71   : > { %1446 = vmatpush.msrb.mxu1 %v1128_v0  ;;  %1516 = vmatpush.msrb.mxu2 %v1128_v0 }
  0x72   : > { %1378 = vmatpush.msrb.mxu0 %v1126_v4  ;;  %1586 = vmatpush.msrb.mxu3 %v1128_v0 }
  0x73   : > { %1447 = vmatpush.msrb.mxu1 %v1127_v2  ;;  %1517 = vmatpush.msrb.mxu2 %v1127_v2 }
  0x74   : > { %1379 = vmatpush.msrb.mxu0 %v1125_v5  ;;  %1587 = vmatpush.msrb.mxu3 %v1127_v2 }
  0x75   : > { %1448 = vmatpush.msrb.mxu1 %v1126_v4  ;;  %1518 = vmatpush.msrb.mxu2 %v1126_v4 }
  0x76   : > { %1588 = vmatpush.msrb.mxu3 %v1126_v4  ;;  %1656 = vmatpush.msra.mxu0 %v1128_v0 }
  0x77   : > { %1449 = vmatpush.msrb.mxu1 %v1125_v5  ;;  %1519 = vmatpush.msrb.mxu2 %v1125_v5 }
  0x78   : > { %1589 = vmatpush.msrb.mxu3 %v1125_v5  ;;  %1657 = vmatpush.msra.mxu0 %v1127_v2 }
  0x7a   : > { %1658 = vmatpush.msra.mxu0 %v1126_v4 }
  0x7c   : > { %1659 = vmatpush.msra.mxu0 %v1125_v5 }
  0xeb   : > { %v1154_v9 = vpop.f32.mrf.mxu0 }
  0xec   : > { %v4706_v10 = vadd.f32 %v4128_v8, %v1154_v9  ;;  %v1178_v11 = vpop.f32.mrf.mxu1 }
  0xee   : > { %v1181_v12 = vadd.f32 %v1178_v11, %v4706_v10 }
  0xf0   : > { %4147 = vtanh.f32 %v1181_v12  ;;  %v3836_v14 = vmul.f32 -1.442695, %v1181_v12 }
  0xf2   : > { %4149 = vpow2.f32 %v3836_v14 }
  0xf6   : > { %v4148_v13 = vpop.eup %4147 }
  0xf7   : > { %1204 = vrot.lane.b32.xlu0 %v4148_v13, %s5142_s23 }
  0xf8   : > { %v4150_v15 = vpop.eup %4149 }
  0xf9   : > { %v1185_v16 = vadd.f32 1.0, %v4150_v15 }
  0xfb   : > { %4151 = vrcp.f32 %v1185_v16  ;;  %v1197_v22 = vand.u32 2147483648, %v1185_v16  ;;  %vm1191_vm2 = vweird.f32 %v1185_v16  ;;  %v1195_v23 = vand.u32 2147483647, %v1185_v16 }
  0xfd   : > { %v1198_v25 = vor.u32 1.1754944e-38, %v1197_v22  ;;  %vm1196_vm4 = vcmp.eq.f32.partialorder %v1195_v23, 8.507059e+37 }
 0x101   : > { %v4152_v17 = vpop.eup %4151 }
 0x102   : > { %v1187_v18 = vmul.f32 %v4152_v17, %v1185_v16  ;;  %vm1192_vm1 = vweird.f32 %v4152_v17 }
 0x103   : > { %vm1193_vm3 = vmor %vm1191_vm2, %vm1192_vm1 }
 0x104   : > { %v1188_v19 = vsub.f32 1.0, %v1187_v18 }
 0x106   : > { %v1189_v20 = vmul.f32 %v4152_v17, %v1188_v19 }
 0x108   : > { %v1190_v21 = vadd.f32 %v4152_v17, %v1189_v20 }
 0x10a   : > { %v1194_v24 = vsel %vm1193_vm3, %v4152_v17, %v1190_v21 }
 0x10b   : > { %v1199_v27 = vsel %vm1196_vm4, %v1198_v25, %v1194_v24 }
 0x10c   : > { %v1202_v29 = vmul.f32 0.0, %v1199_v27 }
 0x169   : > { %v1205_v26 = vpop.permute.xlu0 %1204 }
 0x16a   : > { %v1207_v28 = vmul.f32 %v1205_v26, %v1199_v27 }
 0x16c   : > { %1209 = vrot.lane.b32.xlu0 %v1207_v28, %s5144_s2 }
 0x1de   : > { %v1210_v30 = vpop.permute.xlu0 %1209 }
 0x1df   : > { %v1212_v31 = vadd.f32 %v1210_v30, %v1202_v29 }
 0x1e1   : > { %4153 = vtanh.f32 %v1212_v31  ;;  %v1269_v55 = vrot.slane %v1212_v31, 7 }
 0x1e7   : > { %v4154_v32 = vpop.eup %4153 }
 0x1e8   : > { %1215 = vrot.lane.b32.xlu1 %v4154_v32, %s5142_s23 }
 0x25a   : > { %v1216_v33 = vpop.permute.xlu1 %1215 }
 0x25b   : > { %v4712_v34 = vmul.f32 %v1216_v33, %v1199_v27 }
 0x25d   : > { %1220 = vrot.lane.b32.xlu1 %v4712_v34, %s5144_s2 }
 0x2cf   : > { %v1221_v35 = vpop.permute.xlu1 %1220 }
 0x2d0   : > { %3837 = vmatmul.msk.f32.vlgmr.msra.gmra.mxu2 %vm1157_vm5, %v1221_v35 }
 0x353   : > { %v1241_v36 = vpop.f32.mrf.mxu2 }
 0x354   : > { %v1245_v37 = vrot.slane %v1241_v36, 7 }
 0x356   : > { %v1247_v38 = vadd.f32 %v1245_v37, %v4706_v10 }
 0x358   : > { %4155 = vtanh.f32 %v1247_v38  ;;  %v3838_v40 = vmul.f32 -1.442695, %v1247_v38 }
 0x35a   : > { %4157 = vpow2.f32 %v3838_v40 }
 0x35e   : > { %v4156_v39 = vpop.eup %4155 }
 0x35f   : > { %1273 = vrot.lane.b32.xlu2 %v4156_v39, %s5142_s23 }
 0x360   : > { %v4158_v41 = vpop.eup %4157 }
 0x361   : > { %v1251_v42 = vadd.f32 1.0, %v4158_v41 }
 0x363   : > { %4159 = vrcp.f32 %v1251_v42  ;;  %v1263_v48 = vand.u32 2147483648, %v1251_v42  ;;  %vm1257_vm7 = vweird.f32 %v1251_v42  ;;  %v1261_v49 = vand.u32 2147483647, %v1251_v42 }
 0x365   : > { %v1264_v51 = vor.u32 1.1754944e-38, %v1263_v48  ;;  %vm1262_vm9 = vcmp.eq.f32.partialorder %v1261_v49, 8.507059e+37 }
 0x369   : > { %v4160_v43 = vpop.eup %4159 }
 0x36a   : > { %v1253_v44 = vmul.f32 %v4160_v43, %v1251_v42  ;;  %vm1258_vm6 = vweird.f32 %v4160_v43 }
 0x36b   : > { %vm1259_vm8 = vmor %vm1257_vm7, %vm1258_vm6  ;;  %vm1712_vm6 = vcmask 1042432  }
 0x36c   : > { %v1254_v45 = vsub.f32 1.0, %v1253_v44 }
 0x36e   : > { %v1255_v46 = vmul.f32 %v4160_v43, %v1254_v45 }
 0x370   : > { %v1256_v47 = vadd.f32 %v4160_v43, %v1255_v46 }
 0x372   : > { %v1260_v50 = vsel %vm1259_vm8, %v4160_v43, %v1256_v47 }
 0x373   : > { %v1265_v53 = vsel %vm1262_vm9, %v1264_v51, %v1260_v50 }
 0x374   : > { %v1271_v56 = vmul.f32 %v1269_v55, %v1265_v53 }
 0x3b9   : > { %v1274_v52 = vpop.permute.xlu2 %1273 }
 0x3ba   : > { %v1276_v54 = vmul.f32 %v1274_v52, %v1265_v53 }
 0x3bc   : > { %1278 = vrot.lane.b32.xlu2 %v1276_v54, %s5144_s2 }
 0x416   : > { %v1279_v57 = vpop.permute.xlu2 %1278 }
 0x417   : > { %v1281_v58 = vadd.f32 %v1279_v57, %v1271_v56 }
 0x419   : > { %4161 = vtanh.f32 %v1281_v58  ;;  %v1339_v21 = vrot.slane %v1281_v58, 7 }
 0x41f   : > { %v4162_v59 = vpop.eup %4161 }
 0x420   : > { %1284 = vrot.lane.b32.xlu0 %v4162_v59, %s5142_s23 }
 0x492   : > { %v1285_v60 = vpop.permute.xlu0 %1284 }
 0x493   : > { %v1287_v61 = vmul.f32 %v1285_v60, %v1265_v53 }
 0x495   : > { %v1289_v62 = vrot.slane %v1287_v61, 1  ;;  %v1709_v28 = vsel %vm1708_vm14, %v4712_v34, %v1287_v61 }
 0x497   : > { %1290 = vrot.lane.b32.xlu1 %v1289_v62, %s5144_s2 }
 0x509   : > { %v1291_v63 = vpop.permute.xlu1 %1290 }
 0x50a   : > { %3839 = vmatmul.msk.f32.vlgmr.msra.gmra.mxu3 %vm1157_vm5, %v1291_v63 }
 0x58d   : > { %v1311_v0 = vpop.f32.mrf.mxu3 }
 0x58e   : > { %v1315_v1 = vrot.slane %v1311_v0, 6 }
 0x590   : > { %v1317_v2 = vadd.f32 %v1315_v1, %v4706_v10 }
 0x592   : > { %4163 = vtanh.f32 %v1317_v2  ;;  %v3840_v4 = vmul.f32 -1.442695, %v1317_v2 }
 0x594   : > { %4165 = vpow2.f32 %v3840_v4 }
 0x598   : > { %v4164_v3 = vpop.eup %4163 }
 0x599   : > { %1343 = vrot.lane.b32.xlu2 %v4164_v3, %s5142_s23 }
 0x59a   : > { %v4166_v5 = vpop.eup %4165 }
 0x59b   : > { %v1321_v6 = vadd.f32 1.0, %v4166_v5 }
 0x59d   : > { %4167 = vrcp.f32 %v1321_v6  ;;  %v1333_v14 = vand.u32 2147483648, %v1321_v6  ;;  %vm1327_vm11 = vweird.f32 %v1321_v6  ;;  %v1331_v15 = vand.u32 2147483647, %v1321_v6 }
 0x59f   : > { %v1334_v17 = vor.u32 1.1754944e-38, %v1333_v14  ;;  %vm1332_vm13 = vcmp.eq.f32.partialorder %v1331_v15, 8.507059e+37 }
 0x5a3   : > { %v4168_v8 = vpop.eup %4167 }
 0x5a4   : > { %v1323_v9 = vmul.f32 %v4168_v8, %v1321_v6  ;;  %vm1328_vm10 = vweird.f32 %v4168_v8 }
 0x5a5   : > { %vm1329_vm12 = vmor %vm1327_vm11, %vm1328_vm10  ;;  %vm1714_vm11 = vcmask 1043456  }
 0x5a6   : > { %v1324_v11 = vsub.f32 1.0, %v1323_v9 }
 0x5a8   : > { %v1325_v12 = vmul.f32 %v4168_v8, %v1324_v11 }
 0x5aa   : > { %v1326_v13 = vadd.f32 %v4168_v8, %v1325_v12 }
 0x5ac   : > { %v1330_v16 = vsel %vm1329_vm12, %v4168_v8, %v1326_v13 }
 0x5ad   : > { %v1335_v19 = vsel %vm1332_vm13, %v1334_v17, %v1330_v16 }
 0x5ae   : > { %v1341_v22 = vmul.f32 %v1339_v21, %v1335_v19 }
 0x5f3   : > { %v1344_v18 = vpop.permute.xlu2 %1343 }
 0x5f4   : > { %v1346_v20 = vmul.f32 %v1344_v18, %v1335_v19 }
 0x5f6   : > { %1348 = vrot.lane.b32.xlu0 %v1346_v20, %s5144_s2 }
 0x668   : > { %v1349_v23 = vpop.permute.xlu0 %1348 }
 0x669   : > { %v1351_v24 = vadd.f32 %v1349_v23, %v1341_v22 }
 0x66b   : > { %4169 = vtanh.f32 %v1351_v24  ;;  %v1409_v51 = vrot.slane %v1351_v24, 7 }
 0x671   : > { %v4170_v25 = vpop.eup %4169 }
 0x672   : > { %1354 = vrot.lane.b32.xlu1 %v4170_v25, %s5142_s23 }
 0x6e4   : > { %v1355_v26 = vpop.permute.xlu1 %1354 }
 0x6e5   : > { %v1357_v27 = vmul.f32 %v1355_v26, %v1335_v19 }
 0x6e7   : > { %v1359_v29 = vrot.slane %v1357_v27, 2  ;;  %v1711_v30 = vsel %vm1710_vm15, %v1709_v28, %v1357_v27 }
 0x6e9   : > { %1360 = vrot.lane.b32.xlu2 %v1359_v29, %s5144_s2 }
 0x743   : > { %v1361_v31 = vpop.permute.xlu2 %1360 }
 0x744   : > { %3841 = vmatmul.msk.f32.vlgmr.msrb.gmra.mxu0 %vm1157_vm5, %v1361_v31 }
 0x7c1   : > { %v1381_v32 = vpop.f32.mrf.mxu0 }
 0x7c2   : > { %v1385_v33 = vrot.slane %v1381_v32, 5 }
 0x7c4   : > { %v1387_v35 = vadd.f32 %v1385_v33, %v4706_v10 }
 0x7c6   : > { %4171 = vtanh.f32 %v1387_v35  ;;  %v3842_v37 = vmul.f32 -1.442695, %v1387_v35 }
 0x7c8   : > { %4173 = vpow2.f32 %v3842_v37 }
 0x7cc   : > { %v4172_v36 = vpop.eup %4171 }
 0x7cd   : > { %1413 = vrot.lane.b32.xlu0 %v4172_v36, %s5142_s23 }
 0x7ce   : > { %v4174_v38 = vpop.eup %4173 }
 0x7cf   : > { %v1391_v34 = vadd.f32 1.0, %v4174_v38 }
 0x7d1   : > { %4175 = vrcp.f32 %v1391_v34  ;;  %v1403_v44 = vand.u32 2147483648, %v1391_v34  ;;  %vm1397_vm2 = vweird.f32 %v1391_v34  ;;  %v1401_v45 = vand.u32 2147483647, %v1391_v34 }
 0x7d3   : > { %v1404_v47 = vor.u32 1.1754944e-38, %v1403_v44  ;;  %vm1402_vm4 = vcmp.eq.f32.partialorder %v1401_v45, 8.507059e+37 }
 0x7d7   : > { %v4176_v39 = vpop.eup %4175 }
 0x7d8   : > { %v1393_v40 = vmul.f32 %v4176_v39, %v1391_v34  ;;  %vm1398_vm1 = vweird.f32 %v4176_v39 }
 0x7d9   : > { %vm1399_vm3 = vmor %vm1397_vm2, %vm1398_vm1 }
 0x7da   : > { %v1394_v41 = vsub.f32 1.0, %v1393_v40 }
 0x7dc   : > { %v1395_v42 = vmul.f32 %v4176_v39, %v1394_v41 }
 0x7de   : > { %v1396_v43 = vadd.f32 %v4176_v39, %v1395_v42 }
 0x7e0   : > { %v1400_v46 = vsel %vm1399_vm3, %v4176_v39, %v1396_v43  ;;  %vm1716_vm3 = vcmask 1044480  }
 0x7e1   : > { %v1405_v49 = vsel %vm1402_vm4, %v1404_v47, %v1400_v46 }
 0x7e2   : > { %v1411_v52 = vmul.f32 %v1409_v51, %v1405_v49 }
 0x83f   : > { %v1414_v48 = vpop.permute.xlu0 %1413 }
 0x840   : > { %v1416_v50 = vmul.f32 %v1414_v48, %v1405_v49 }
 0x842   : > { %1418 = vrot.lane.b32.xlu1 %v1416_v50, %s5144_s2 }
 0x8b4   : > { %v1419_v53 = vpop.permute.xlu1 %1418 }
 0x8b5   : > { %v1421_v54 = vadd.f32 %v1419_v53, %v1411_v52 }
 0x8b7   : > { %4177 = vtanh.f32 %v1421_v54  ;;  %v1479_v18 = vrot.slane %v1421_v54, 7 }
 0x8bd   : > { %v4178_v55 = vpop.eup %4177 }
 0x8be   : > { %1424 = vrot.lane.b32.xlu2 %v4178_v55, %s5142_s23 }
 0x918   : > { %v1425_v56 = vpop.permute.xlu2 %1424 }
 0x919   : > { %v1427_v57 = vmul.f32 %v1425_v56, %v1405_v49 }
 0x91b   : > { %v1429_v58 = vrot.slane %v1427_v57, 3  ;;  %v1713_v59 = vsel %vm1712_vm6, %v1711_v30, %v1427_v57 }
 0x91d   : > { %1430 = vrot.lane.b32.xlu0 %v1429_v58, %s5144_s2 }
 0x98f   : > { %v1431_v60 = vpop.permute.xlu0 %1430 }
 0x990   : > { %3843 = vmatmul.msk.f32.vlgmr.msrb.gmra.mxu1 %vm1157_vm5, %v1431_v60 }
 0xa0d   : > { %v1451_v61 = vpop.f32.mrf.mxu1 }
 0xa0e   : > { %v1455_v62 = vrot.slane %v1451_v61, 4 }
 0xa10   : > { %v1457_v63 = vadd.f32 %v1455_v62, %v4706_v10 }
 0xa12   : > { %4179 = vtanh.f32 %v1457_v63  ;;  %v3844_v1 = vmul.f32 -1.442695, %v1457_v63 }
 0xa14   : > { %4181 = vpow2.f32 %v3844_v1 }
 0xa18   : > { %v4180_v0 = vpop.eup %4179 }
 0xa19   : > { %1483 = vrot.lane.b32.xlu1 %v4180_v0, %s5142_s23 }
 0xa1a   : > { %v4182_v2 = vpop.eup %4181 }
 0xa1b   : > { %v1461_v3 = vadd.f32 1.0, %v4182_v2 }
 0xa1d   : > { %4183 = vrcp.f32 %v1461_v3  ;;  %v1473_v11 = vand.u32 2147483648, %v1461_v3  ;;  %vm1467_vm8 = vweird.f32 %v1461_v3  ;;  %v1471_v12 = vand.u32 2147483647, %v1461_v3 }
 0xa1f   : > { %v1474_v14 = vor.u32 1.1754944e-38, %v1473_v11  ;;  %vm1472_vm10 = vcmp.eq.f32.partialorder %v1471_v12, 8.507059e+37 }
 0xa23   : > { %v4184_v4 = vpop.eup %4183 }
 0xa24   : > { %v1463_v5 = vmul.f32 %v4184_v4, %v1461_v3  ;;  %vm1468_vm7 = vweird.f32 %v4184_v4 }
 0xa25   : > { %vm1469_vm9 = vmor %vm1467_vm8, %vm1468_vm7 }
 0xa26   : > { %v1464_v6 = vsub.f32 1.0, %v1463_v5 }
 0xa28   : > { %v1465_v8 = vmul.f32 %v4184_v4, %v1464_v6 }
 0xa2a   : > { %v1466_v9 = vadd.f32 %v4184_v4, %v1465_v8 }
 0xa2c   : > { %v1470_v13 = vsel %vm1469_vm9, %v4184_v4, %v1466_v9 }
 0xa2d   : > { %v1475_v16 = vsel %vm1472_vm10, %v1474_v14, %v1470_v13  ;;  %vm1718_vm10 = vcmask 1045504  }
 0xa2e   : > { %v1481_v19 = vmul.f32 %v1479_v18, %v1475_v16 }
 0xa8b   : > { %v1484_v15 = vpop.permute.xlu1 %1483 }
 0xa8c   : > { %v1486_v17 = vmul.f32 %v1484_v15, %v1475_v16 }
 0xa8e   : > { %1488 = vrot.lane.b32.xlu2 %v1486_v17, %s5144_s2 }
 0xae8   : > { %v1489_v20 = vpop.permute.xlu2 %1488 }
 0xae9   : > { %v1491_v21 = vadd.f32 %v1489_v20, %v1481_v19 }
 0xaeb   : > { %4185 = vtanh.f32 %v1491_v21  ;;  %v1549_v47 = vrot.slane %v1491_v21, 7 }
 0xaf1   : > { %v4186_v22 = vpop.eup %4185 }
 0xaf2   : > { %1494 = vrot.lane.b32.xlu0 %v4186_v22, %s5142_s23 }
 0xb64   : > { %v1495_v23 = vpop.permute.xlu0 %1494 }
 0xb65   : > { %v1497_v24 = vmul.f32 %v1495_v23, %v1475_v16 }
 0xb67   : > { %v1499_v25 = vrot.slane %v1497_v24, 4  ;;  %v1715_v26 = vsel %vm1714_vm11, %v1713_v59, %v1497_v24 }
 0xb69   : > { %1500 = vrot.lane.b32.xlu1 %v1499_v25, %s5144_s2 }
 0xbdb   : > { %v1501_v27 = vpop.permute.xlu1 %1500 }
 0xbdc   : > { %3845 = vmatmul.msk.f32.vlgmr.msrb.gmra.mxu2 %vm1157_vm5, %v1501_v27 }
 0xc5f   : > { %v1521_v28 = vpop.f32.mrf.mxu2 }
 0xc60   : > { %v1525_v29 = vrot.slane %v1521_v28, 3 }
 0xc62   : > { %v1527_v30 = vadd.f32 %v1525_v29, %v4706_v10 }
 0xc64   : > { %4187 = vtanh.f32 %v1527_v30  ;;  %v3846_v32 = vmul.f32 -1.442695, %v1527_v30 }
 0xc66   : > { %4189 = vpow2.f32 %v3846_v32 }
 0xc6a   : > { %v4188_v31 = vpop.eup %4187 }
 0xc6b   : > { %1553 = vrot.lane.b32.xlu2 %v4188_v31, %s5142_s23 }
 0xc6c   : > { %v4190_v33 = vpop.eup %4189 }
 0xc6d   : > { %v1531_v35 = vadd.f32 1.0, %v4190_v33 }
 0xc6f   : > { %4191 = vrcp.f32 %v1531_v35  ;;  %v1543_v40 = vand.u32 2147483648, %v1531_v35  ;;  %vm1537_vm13 = vweird.f32 %v1531_v35  ;;  %v1541_v41 = vand.u32 2147483647, %v1531_v35 }
 0xc71   : > { %v1544_v43 = vor.u32 1.1754944e-38, %v1543_v40  ;;  %vm1542_vm2 = vcmp.eq.f32.partialorder %v1541_v41, 8.507059e+37 }
 0xc75   : > { %v4192_v36 = vpop.eup %4191 }
 0xc76   : > { %v1533_v37 = vmul.f32 %v4192_v36, %v1531_v35  ;;  %vm1538_vm12 = vweird.f32 %v4192_v36 }
 0xc77   : > { %vm1539_vm1 = vmor %vm1537_vm13, %vm1538_vm12 }
 0xc78   : > { %v1534_v38 = vsub.f32 1.0, %v1533_v37 }
 0xc7a   : > { %v1535_v34 = vmul.f32 %v4192_v36, %v1534_v38 }
 0xc7c   : > { %v1536_v39 = vadd.f32 %v4192_v36, %v1535_v34 }
 0xc7e   : > { %v1540_v42 = vsel %vm1539_vm1, %v4192_v36, %v1536_v39 }
 0xc7f   : > { %v1545_v45 = vsel %vm1542_vm2, %v1544_v43, %v1540_v42 }
 0xc80   : > { %v1551_v48 = vmul.f32 %v1549_v47, %v1545_v45  ;;  %v1729_v47 = vld [vmem:[%s5212_s25 + $0x18] sm:$0xff] }
 0xc81   : > { %1771 = vmatpush.msra.mxu2 %v1729_v47  ;;  %1834 = vmatpush.msra.mxu3 %v1729_v47 }
 0xc82   : > { %1904 = vmatpush.msrb.mxu0 %v1729_v47 }
 0xcc5   : > { %v1554_v44 = vpop.permute.xlu2 %1553 }
 0xcc6   : > { %v1556_v46 = vmul.f32 %v1554_v44, %v1545_v45 }
 0xcc8   : > { %1558 = vrot.lane.b32.xlu0 %v1556_v46, %s5144_s2 }
 0xd3a   : > { %v1559_v49 = vpop.permute.xlu0 %1558 }
 0xd3b   : > { %v1561_v50 = vadd.f32 %v1559_v49, %v1551_v48  ;;  %v1728_v48 = vld [vmem:[%s5212_s25 + $0x10] sm:$0xff]  ;;  %v1725_v49 = vld [vmem:[%s5213_s21 + $0x18] sm:$0xff] }
 0xd3c   : > { %1751 = vmatpush.msra.mxu1 %v1725_v49  ;;  %1772 = vmatpush.msra.mxu2 %v1728_v48 }
 0xd3d   : > { %4193 = vtanh.f32 %v1561_v50  ;;  %v1619_v14 = vrot.slane %v1561_v50, 7  ;;  %v1724_v50 = vld [vmem:[%s5213_s21 + $0x10] sm:$0xff]  ;;  %1835 = vmatpush.msra.mxu3 %v1728_v48  ;;  %1905 = vmatpush.msrb.mxu0 %v1728_v48 }
 0xd3e   : > { %1752 = vmatpush.msra.mxu1 %v1724_v50 }
 0xd43   : > { %v4194_v51 = vpop.eup %4193 }
 0xd44   : > { %1564 = vrot.lane.b32.xlu1 %v4194_v51, %s5142_s23  ;;  %v1727_v51 = vld [vmem:[%s5212_s25 + $0x8] sm:$0xff] }
 0xd45   : > { %1773 = vmatpush.msra.mxu2 %v1727_v51  ;;  %1836 = vmatpush.msra.mxu3 %v1727_v51 }
 0xd46   : > { %1906 = vmatpush.msrb.mxu0 %v1727_v51 }
 0xdb6   : > { %v1565_v52 = vpop.permute.xlu1 %1564 }
 0xdb7   : > { %v1567_v53 = vmul.f32 %v1565_v52, %v1545_v45  ;;  %v1723_v52 = vld [vmem:[%s5213_s21 + $0x8] sm:$0xff] }
 0xdb8   : > { %1753 = vmatpush.msra.mxu1 %v1723_v52 }
 0xdb9   : > { %v1569_v54 = vrot.slane %v1567_v53, 5  ;;  %v1717_v55 = vsel %vm1716_vm3, %v1715_v26, %v1567_v53  ;;  %v1726_v53 = vld [vmem:[%s5212_s25] sm:$0xff]  ;;  %s5257_s25 = sld [smem:[#allocation33_spill]] }
 0xdba   : > { %1774 = vmatpush.msra.mxu2 %v1726_v53  ;;  %1837 = vmatpush.msra.mxu3 %v1726_v53 }
 0xdbb   : > { %1570 = vrot.lane.b32.xlu2 %v1569_v54, %s5144_s2  ;;  %v1722_v54 = vld [vmem:[%s5213_s21] sm:$0xff]  ;;  %1775 = vmatmul.f32.vlgmr.msra.gmra.mxu2 %v4434_v7  ;;  %s5250_s21 = sld [smem:[#allocation26_spill]] }
 0xdbc   : > { %1754 = vmatpush.msra.mxu1 %v1722_v54  ;;  %1907 = vmatpush.msrb.mxu0 %v1726_v53 }
 0xdbd   : > { %2044 = vmatpush.msrb.mxu2 %v1729_v47 }
 0xdbe   : > { %1974 = vmatpush.msrb.mxu1 %v1729_v47 }
 0xdbf   : > { %2045 = vmatpush.msrb.mxu2 %v1728_v48 }
 0xdc0   : > { %1975 = vmatpush.msrb.mxu1 %v1728_v48 }
 0xdc1   : > { %2046 = vmatpush.msrb.mxu2 %v1727_v51 }
 0xdc2   : > { %1976 = vmatpush.msrb.mxu1 %v1727_v51 }
 0xdc3   : > { %2047 = vmatpush.msrb.mxu2 %v1726_v53 }
 0xdc4   : > { %1977 = vmatpush.msrb.mxu1 %v1726_v53 }
 0xe15   : > { %v1571_v56 = vpop.permute.xlu2 %1570 }
 0xe16   : > { %3847 = vmatmul.msk.f32.vlgmr.msrb.gmra.mxu3 %vm1157_vm5, %v1571_v56 }
 0xe17   : > { %2114 = vmatpush.msrb.mxu3 %v1729_v47 }
 0xe19   : > { %2115 = vmatpush.msrb.mxu3 %v1728_v48 }
 0xe1b   : > { %2116 = vmatpush.msrb.mxu3 %v1727_v51 }
 0xe1d   : > { %2117 = vmatpush.msrb.mxu3 %v1726_v53 }
 0xe99   : > { %v1591_v57 = vpop.f32.mrf.mxu3 }
 0xe9a   : > { %v1595_v58 = vrot.slane %v1591_v57, 2 }
 0xe9c   : > { %v1597_v59 = vadd.f32 %v1595_v58, %v4706_v10  ;;  %v4129_v58 = vld [vmem:[%s4489_s29] ss:$0 sm:$0xff] }
 0xe9e   : > { %4195 = vtanh.f32 %v1597_v59  ;;  %v3848_v61 = vmul.f32 -1.442695, %v1597_v59 }
 0xea0   : > { %4197 = vpow2.f32 %v3848_v61 }
 0xea4   : > { %v4196_v60 = vpop.eup %4195 }
 0xea5   : > { %1623 = vrot.lane.b32.xlu0 %v4196_v60, %s5142_s23  ;;  %v1776_v60 = vpop.f32.mrf.mxu2 }
 0xea6   : > { %v4198_v62 = vpop.eup %4197 }
 0xea7   : > { %v1601_v63 = vadd.f32 1.0, %v4198_v62 }
 0xea9   : > { %4199 = vrcp.f32 %v1601_v63  ;;  %v1613_v5 = vand.u32 2147483648, %v1601_v63  ;;  %vm1607_vm7 = vweird.f32 %v1601_v63  ;;  %v1611_v6 = vand.u32 2147483647, %v1601_v63 }
 0xeab   : > { %v1614_v9 = vor.u32 1.1754944e-38, %v1613_v5  ;;  %vm1612_vm9 = vcmp.eq.f32.partialorder %v1611_v6, 8.507059e+37 }
 0xeaf   : > { %v4200_v0 = vpop.eup %4199 }
 0xeb0   : > { %v1603_v1 = vmul.f32 %v4200_v0, %v1601_v63  ;;  %vm1608_vm4 = vweird.f32 %v4200_v0 }
 0xeb1   : > { %vm1609_vm8 = vmor %vm1607_vm7, %vm1608_vm4  ;;  %vm1720_vm4 = vcmask 1046528  }
 0xeb2   : > { %v1604_v2 = vsub.f32 1.0, %v1603_v1 }
 0xeb4   : > { %v1605_v3 = vmul.f32 %v4200_v0, %v1604_v2 }
 0xeb6   : > { %v1606_v4 = vadd.f32 %v4200_v0, %v1605_v3 }
 0xeb8   : > { %v1610_v8 = vsel %vm1609_vm8, %v4200_v0, %v1606_v4 }
 0xeb9   : > { %v1615_v12 = vsel %vm1612_vm9, %v1614_v9, %v1610_v8 }
 0xeba   : > { %v1621_v15 = vmul.f32 %v1619_v14, %v1615_v12 }
 0xf17   : > { %v1624_v11 = vpop.permute.xlu0 %1623 }
 0xf18   : > { %v1626_v13 = vmul.f32 %v1624_v11, %v1615_v12 }
 0xf1a   : > { %1628 = vrot.lane.b32.xlu1 %v1626_v13, %s5144_s2 }
 0xf8c   : > { %v1629_v16 = vpop.permute.xlu1 %1628 }
 0xf8d   : > { %v1631_v17 = vadd.f32 %v1629_v16, %v1621_v15 }
 0xf8f   : > { %4201 = vtanh.f32 %v1631_v17  ;;  %v1689_v42 = vrot.slane %v1631_v17, 7 }
 0xf95   : > { %v4202_v18 = vpop.eup %4201 }
 0xf96   : > { %1634 = vrot.lane.b32.xlu2 %v4202_v18, %s5142_s23 }
 0xff0   : > { %v1635_v19 = vpop.permute.xlu2 %1634 }
 0xff1   : > { %v1637_v20 = vmul.f32 %v1635_v19, %v1615_v12 }
 0xff3   : > { %v1639_v21 = vrot.slane %v1637_v20, 6  ;;  %v4758_v22 = vsel %vm1718_vm10, %v1717_v55, %v1637_v20 }
 0xff5   : > { %1640 = vrot.lane.b32.xlu0 %v1639_v21, %s5144_s2 }
0x1067   : > { %v1641_v23 = vpop.permute.xlu0 %1640 }
0x1068   : > { %3849 = vmatmul.msk.f32.vlgmr.msra.gmra.mxu0 %vm1157_vm5, %v1641_v23 }
0x1069   : > { %2184 = vmatpush.msra.mxu0 %v1729_v47 }
0x106b   : > { %2185 = vmatpush.msra.mxu0 %v1728_v48 }
0x106d   : > { %2186 = vmatpush.msra.mxu0 %v1727_v51 }
0x106f   : > { %2187 = vmatpush.msra.mxu0 %v1726_v53 }
0x10e5   : > { %v1661_v24 = vpop.f32.mrf.mxu0 }
0x10e6   : > { %v1665_v25 = vrot.slane %v1661_v24, 1 }
0x10e8   : > { %v1667_v26 = vadd.f32 %v1665_v25, %v4706_v10 }
0x10ea   : > { %4203 = vtanh.f32 %v1667_v26  ;;  %v3850_v28 = vmul.f32 -1.442695, %v1667_v26 }
0x10ec   : > { %4205 = vpow2.f32 %v3850_v28 }
0x10f0   : > { %v4204_v27 = vpop.eup %4203 }
0x10f1   : > { %1693 = vrot.lane.b32.xlu1 %v4204_v27, %s5142_s23 }
0x10f2   : > { %v4206_v29 = vpop.eup %4205 }
0x10f3   : > { %v1671_v30 = vadd.f32 1.0, %v4206_v29 }
0x10f5   : > { %4207 = vrcp.f32 %v1671_v30  ;;  %v1683_v37 = vand.u32 2147483648, %v1671_v30  ;;  %vm1677_vm13 = vweird.f32 %v1671_v30  ;;  %v1681_v38 = vand.u32 2147483647, %v1671_v30 }
0x10f7   : > { %v1684_v34 = vor.u32 1.1754944e-38, %v1683_v37  ;;  %vm1682_vm2 = vcmp.eq.f32.partialorder %v1681_v38, 8.507059e+37 }
0x10fb   : > { %v4208_v31 = vpop.eup %4207 }
0x10fc   : > { %v1673_v32 = vmul.f32 %v4208_v31, %v1671_v30  ;;  %vm1678_vm12 = vweird.f32 %v4208_v31 }
0x10fd   : > { %vm1679_vm1 = vmor %vm1677_vm13, %vm1678_vm12 }
0x10fe   : > { %v1674_v33 = vsub.f32 1.0, %v1673_v32 }
0x1100   : > { %v1675_v35 = vmul.f32 %v4208_v31, %v1674_v33 }
0x1102   : > { %v1676_v36 = vadd.f32 %v4208_v31, %v1675_v35 }
0x1104   : > { %v1680_v10 = vsel %vm1679_vm1, %v4208_v31, %v1676_v36 }
0x1105   : > { %v1685_v40 = vsel %vm1682_vm2, %v1684_v34, %v1680_v10 }
0x1106   : > { %v1691_v43 = vmul.f32 %v1689_v42, %v1685_v40 }
0x1163   : > { %v1694_v39 = vpop.permute.xlu1 %1693 }
0x1164   : > { %v1696_v41 = vmul.f32 %v1694_v39, %v1685_v40 }
0x1166   : > { %1698 = vrot.lane.b32.xlu2 %v1696_v41, %s5144_s2 }
0x11c0   : > { %v1699_v44 = vpop.permute.xlu2 %1698 }
0x11c1   : > { %v1701_v45 = vadd.f32 %v1699_v44, %v1691_v43 }
0x11c3   : > { %4209 = vtanh.f32 %v1701_v45 }
0x11c9   : > { %v4210_v46 = vpop.eup %4209 }
0x11ca   : > { %1704 = vrot.lane.b32.xlu0 %v4210_v46, %s5142_s23 }
0x123c   : > { %v1705_v7 = vpop.permute.xlu0 %1704 }
0x123d   : > { %v1707_v55 = vmul.f32 %v1705_v7, %v1685_v40 }
0x123f   : > { %v1721_v56 = vsel %vm1720_vm4, %v4758_v22, %v1707_v55 }
0x1240   : > { %1735 = vrot.lane.b32.xlu1 %v1721_v56, %s5144_s2 }
0x12b2   : > { %v1736_v57 = vpop.permute.xlu1 %1735 }
0x12b3   : > { %3851 = vmatmul.msk.f32.vlgmr.msra.gmra.mxu1 %vm1157_vm5, %v1736_v57 }
0x12b4   : > { %2254 = vmatpush.msra.mxu1 %v1729_v47 }
0x12b6   : > { %2255 = vmatpush.msra.mxu1 %v1728_v48 }
0x12b8   : > { %2256 = vmatpush.msra.mxu1 %v1727_v51 }
0x12ba   : > { %2257 = vmatpush.msra.mxu1 %v1726_v53 }
0x1330   : > { %v1756_v59 = vpop.f32.mrf.mxu1 }
0x1331   : > { %v4780_v61 = vadd.f32 %v4129_v58, %v1756_v59 }
0x1333   : > { %v1779_v62 = vadd.f32 %v1776_v60, %v4780_v61 }
0x1335   : > { %4211 = vtanh.f32 %v1779_v62  ;;  %v3852_v0 = vmul.f32 -1.442695, %v1779_v62 }
0x1337   : > { %4213 = vpow2.f32 %v3852_v0 }
0x133b   : > { %v4212_v63 = vpop.eup %4211 }
0x133c   : > { %1802 = vrot.lane.b32.xlu2 %v4212_v63, %s5142_s23 }
0x133d   : > { %v4214_v1 = vpop.eup %4213 }
0x133e   : > { %v1783_v2 = vadd.f32 1.0, %v4214_v1 }
0x1340   : > { %4215 = vrcp.f32 %v1783_v2  ;;  %v1795_v9 = vand.u32 2147483648, %v1783_v2  ;;  %vm1789_vm8 = vweird.f32 %v1783_v2  ;;  %v1793_v11 = vand.u32 2147483647, %v1783_v2 }
0x1342   : > { %v1796_v13 = vor.u32 1.1754944e-38, %v1795_v9  ;;  %vm1794_vm12 = vcmp.eq.f32.partialorder %v1793_v11, 8.507059e+37 }
0x1346   : > { %v4216_v3 = vpop.eup %4215 }
0x1347   : > { %v1785_v4 = vmul.f32 %v4216_v3, %v1783_v2  ;;  %vm1790_vm7 = vweird.f32 %v4216_v3 }
0x1348   : > { %vm1791_vm9 = vmor %vm1789_vm8, %vm1790_vm7 }
0x1349   : > { %v1786_v5 = vsub.f32 1.0, %v1785_v4 }
0x134b   : > { %v1787_v6 = vmul.f32 %v4216_v3, %v1786_v5 }
0x134d   : > { %v1788_v8 = vadd.f32 %v4216_v3, %v1787_v6 }
0x134f   : > { %v1792_v12 = vsel %vm1791_vm9, %v4216_v3, %v1788_v8 }
0x1350   : > { %v1797_v15 = vsel %vm1794_vm12, %v1796_v13, %v1792_v12 }
0x1351   : > { %v1800_v17 = vmul.f32 0.0, %v1797_v15 }
0x1396   : > { %v1803_v14 = vpop.permute.xlu2 %1802 }
0x1397   : > { %v1805_v16 = vmul.f32 %v1803_v14, %v1797_v15 }
0x1399   : > { %1807 = vrot.lane.b32.xlu0 %v1805_v16, %s5144_s2 }
0x140b   : > { %v1808_v18 = vpop.permute.xlu0 %1807 }
0x140c   : > { %v1810_v19 = vadd.f32 %v1808_v18, %v1800_v17 }
0x140e   : > { %4217 = vtanh.f32 %v1810_v19  ;;  %v1867_v42 = vrot.slane %v1810_v19, 7 }
0x1414   : > { %v4218_v20 = vpop.eup %4217 }
0x1415   : > { %1813 = vrot.lane.b32.xlu1 %v4218_v20, %s5142_s23 }
0x1487   : > { %v1814_v21 = vpop.permute.xlu1 %1813 }
0x1488   : > { %v4786_v22 = vmul.f32 %v1814_v21, %v1797_v15 }
0x148a   : > { %1818 = vrot.lane.b32.xlu2 %v4786_v22, %s5144_s2 }
0x14e4   : > { %v1819_v23 = vpop.permute.xlu2 %1818 }
0x14e5   : > { %3853 = vmatmul.msk.f32.vlgmr.msra.gmra.mxu3 %vm1157_vm5, %v1819_v23 }
0x1568   : > { %v1839_v24 = vpop.f32.mrf.mxu3 }
0x1569   : > { %v1843_v25 = vrot.slane %v1839_v24, 7 }
0x156b   : > { %v1845_v26 = vadd.f32 %v1843_v25, %v4780_v61 }
0x156d   : > { %4219 = vtanh.f32 %v1845_v26  ;;  %v3854_v28 = vmul.f32 -1.442695, %v1845_v26 }
0x156f   : > { %4221 = vpow2.f32 %v3854_v28 }
0x1573   : > { %v4220_v27 = vpop.eup %4219 }
0x1574   : > { %1871 = vrot.lane.b32.xlu0 %v4220_v27, %s5142_s23 }
0x1575   : > { %v4222_v29 = vpop.eup %4221 }
0x1576   : > { %v1849_v30 = vadd.f32 1.0, %v4222_v29 }
0x1578   : > { %4223 = vrcp.f32 %v1849_v30  ;;  %v1861_v37 = vand.u32 2147483648, %v1849_v30  ;;  %vm1855_vm1 = vweird.f32 %v1849_v30  ;;  %v1859_v38 = vand.u32 2147483647, %v1849_v30 }
0x157a   : > { %v1862_v34 = vor.u32 1.1754944e-38, %v1861_v37  ;;  %vm1860_vm7 = vcmp.eq.f32.partialorder %v1859_v38, 8.507059e+37 }
0x157e   : > { %v4224_v31 = vpop.eup %4223 }
0x157f   : > { %v1851_v32 = vmul.f32 %v4224_v31, %v1849_v30  ;;  %vm1856_vm13 = vweird.f32 %v4224_v31 }
0x1580   : > { %vm1857_vm2 = vmor %vm1855_vm1, %vm1856_vm13 }
0x1581   : > { %v1852_v33 = vsub.f32 1.0, %v1851_v32 }
0x1583   : > { %v1853_v35 = vmul.f32 %v4224_v31, %v1852_v33 }
0x1585   : > { %v1854_v36 = vadd.f32 %v4224_v31, %v1853_v35 }
0x1587   : > { %v1858_v10 = vsel %vm1857_vm2, %v4224_v31, %v1854_v36 }
0x1588   : > { %v1863_v40 = vsel %vm1860_vm7, %v1862_v34, %v1858_v10 }
0x1589   : > { %v1869_v43 = vmul.f32 %v1867_v42, %v1863_v40 }
0x15e6   : > { %v1872_v39 = vpop.permute.xlu0 %1871 }
0x15e7   : > { %v1874_v41 = vmul.f32 %v1872_v39, %v1863_v40 }
0x15e9   : > { %1876 = vrot.lane.b32.xlu1 %v1874_v41, %s5144_s2 }
0x165b   : > { %v1877_v44 = vpop.permute.xlu1 %1876 }
0x165c   : > { %v1879_v45 = vadd.f32 %v1877_v44, %v1869_v43 }
0x165e   : > { %4225 = vtanh.f32 %v1879_v45  ;;  %v1937_v6 = vrot.slane %v1879_v45, 7 }
0x1664   : > { %v4226_v46 = vpop.eup %4225 }
0x1665   : > { %1882 = vrot.lane.b32.xlu2 %v4226_v46, %s5142_s23 }
0x16bf   : > { %v1883_v47 = vpop.permute.xlu2 %1882 }
0x16c0   : > { %v1885_v48 = vmul.f32 %v1883_v47, %v1863_v40 }
0x16c2   : > { %v1887_v49 = vrot.slane %v1885_v48, 1  ;;  %v2306_v15 = vsel %vm1708_vm14, %v4786_v22, %v1885_v48 }
0x16c4   : > { %1888 = vrot.lane.b32.xlu0 %v1887_v49, %s5144_s2 }
0x1736   : > { %v1889_v50 = vpop.permute.xlu0 %1888 }
0x1737   : > { %3855 = vmatmul.msk.f32.vlgmr.msrb.gmra.mxu0 %vm1157_vm5, %v1889_v50 }
0x17b4   : > { %v1909_v51 = vpop.f32.mrf.mxu0 }
0x17b5   : > { %v1913_v52 = vrot.slane %v1909_v51, 6 }
0x17b7   : > { %v1915_v53 = vadd.f32 %v1913_v52, %v4780_v61 }
0x17b9   : > { %4227 = vtanh.f32 %v1915_v53  ;;  %v3856_v7 = vmul.f32 -1.442695, %v1915_v53 }
0x17bb   : > { %4229 = vpow2.f32 %v3856_v7 }
0x17bf   : > { %v4228_v54 = vpop.eup %4227 }
0x17c0   : > { %1941 = vrot.lane.b32.xlu1 %v4228_v54, %s5142_s23 }
0x17c1   : > { %v4230_v55 = vpop.eup %4229 }
0x17c2   : > { %v1919_v56 = vadd.f32 1.0, %v4230_v55 }
0x17c4   : > { %4231 = vrcp.f32 %v1919_v56  ;;  %v1931_v63 = vand.u32 2147483648, %v1919_v56  ;;  %vm1925_vm9 = vweird.f32 %v1919_v56  ;;  %v1929_v0 = vand.u32 2147483647, %v1919_v56 }
0x17c6   : > { %v1932_v2 = vor.u32 1.1754944e-38, %v1931_v63  ;;  %vm1930_vm13 = vcmp.eq.f32.partialorder %v1929_v0, 8.507059e+37 }
0x17ca   : > { %v4232_v57 = vpop.eup %4231 }
0x17cb   : > { %v1921_v58 = vmul.f32 %v4232_v57, %v1919_v56  ;;  %vm1926_vm8 = vweird.f32 %v4232_v57 }
0x17cc   : > { %vm1927_vm12 = vmor %vm1925_vm9, %vm1926_vm8 }
0x17cd   : > { %v1922_v59 = vsub.f32 1.0, %v1921_v58 }
0x17cf   : > { %v1923_v60 = vmul.f32 %v4232_v57, %v1922_v59 }
0x17d1   : > { %v1924_v62 = vadd.f32 %v4232_v57, %v1923_v60 }
0x17d3   : > { %v1928_v1 = vsel %vm1927_vm12, %v4232_v57, %v1924_v62 }
0x17d4   : > { %v1933_v4 = vsel %vm1930_vm13, %v1932_v2, %v1928_v1 }
0x17d5   : > { %v1939_v8 = vmul.f32 %v1937_v6, %v1933_v4 }
0x1832   : > { %v1942_v3 = vpop.permute.xlu1 %1941 }
0x1833   : > { %v1944_v5 = vmul.f32 %v1942_v3, %v1933_v4 }
0x1835   : > { %1946 = vrot.lane.b32.xlu2 %v1944_v5, %s5144_s2 }
0x188f   : > { %v1947_v9 = vpop.permute.xlu2 %1946 }
0x1890   : > { %v1949_v11 = vadd.f32 %v1947_v9, %v1939_v8 }
0x1892   : > { %4233 = vtanh.f32 %v1949_v11  ;;  %v2007_v10 = vrot.slane %v1949_v11, 7 }
0x1898   : > { %v4234_v12 = vpop.eup %4233 }
0x1899   : > { %1952 = vrot.lane.b32.xlu0 %v4234_v12, %s5142_s23 }
0x190b   : > { %v1953_v13 = vpop.permute.xlu0 %1952 }
0x190c   : > { %v1955_v14 = vmul.f32 %v1953_v13, %v1933_v4 }
0x190e   : > { %v1957_v16 = vrot.slane %v1955_v14, 2  ;;  %v2307_v17 = vsel %vm1710_vm15, %v2306_v15, %v1955_v14 }
0x1910   : > { %1958 = vrot.lane.b32.xlu1 %v1957_v16, %s5144_s2 }
0x1982   : > { %v1959_v18 = vpop.permute.xlu1 %1958 }
0x1983   : > { %3857 = vmatmul.msk.f32.vlgmr.msrb.gmra.mxu1 %vm1157_vm5, %v1959_v18 }
0x1a00   : > { %v1979_v19 = vpop.f32.mrf.mxu1 }
0x1a01   : > { %v1983_v20 = vrot.slane %v1979_v19, 5 }
0x1a03   : > { %v1985_v21 = vadd.f32 %v1983_v20, %v4780_v61 }
0x1a05   : > { %4235 = vtanh.f32 %v1985_v21  ;;  %v3858_v24 = vmul.f32 -1.442695, %v1985_v21 }
0x1a07   : > { %4237 = vpow2.f32 %v3858_v24 }
0x1a0b   : > { %v4236_v23 = vpop.eup %4235 }
0x1a0c   : > { %2011 = vrot.lane.b32.xlu2 %v4236_v23, %s5142_s23 }
0x1a0d   : > { %v4238_v25 = vpop.eup %4237 }
0x1a0e   : > { %v1989_v22 = vadd.f32 1.0, %v4238_v25 }
0x1a10   : > { %4239 = vrcp.f32 %v1989_v22  ;;  %v2001_v31 = vand.u32 2147483648, %v1989_v22  ;;  %vm1995_vm15 = vweird.f32 %v1989_v22  ;;  %v1999_v32 = vand.u32 2147483647, %v1989_v22 }
0x1a12   : > { %v2002_v35 = vor.u32 1.1754944e-38, %v2001_v31  ;;  %vm2000_vm2 = vcmp.eq.f32.partialorder %v1999_v32, 8.507059e+37 }
0x1a16   : > { %v4240_v26 = vpop.eup %4239 }
0x1a17   : > { %v1991_v27 = vmul.f32 %v4240_v26, %v1989_v22  ;;  %vm1996_vm14 = vweird.f32 %v4240_v26 }
0x1a18   : > { %vm1997_vm1 = vmor %vm1995_vm15, %vm1996_vm14 }
0x1a19   : > { %v1992_v28 = vsub.f32 1.0, %v1991_v27 }
0x1a1b   : > { %v1993_v29 = vmul.f32 %v4240_v26, %v1992_v28 }
0x1a1d   : > { %v1994_v30 = vadd.f32 %v4240_v26, %v1993_v29 }
0x1a1f   : > { %v1998_v33 = vsel %vm1997_vm1, %v4240_v26, %v1994_v30 }
0x1a20   : > { %v2003_v37 = vsel %vm2000_vm2, %v2002_v35, %v1998_v33 }
0x1a21   : > { %v2009_v34 = vmul.f32 %v2007_v10, %v2003_v37 }
0x1a66   : > { %v2012_v36 = vpop.permute.xlu2 %2011 }
0x1a67   : > { %v2014_v38 = vmul.f32 %v2012_v36, %v2003_v37 }
0x1a69   : > { %2016 = vrot.lane.b32.xlu0 %v2014_v38, %s5144_s2 }
0x1adb   : > { %v2017_v39 = vpop.permute.xlu0 %2016 }
0x1adc   : > { %v2019_v40 = vadd.f32 %v2017_v39, %v2009_v34 }
0x1ade   : > { %4241 = vtanh.f32 %v2019_v40  ;;  %v2077_v2 = vrot.slane %v2019_v40, 7 }
0x1ae4   : > { %v4242_v41 = vpop.eup %4241 }
0x1ae5   : > { %2022 = vrot.lane.b32.xlu1 %v4242_v41, %s5142_s23 }
0x1b57   : > { %v2023_v42 = vpop.permute.xlu1 %2022 }
0x1b58   : > { %v2025_v43 = vmul.f32 %v2023_v42, %v2003_v37 }
0x1b5a   : > { %v2027_v44 = vrot.slane %v2025_v43, 3  ;;  %v2308_v45 = vsel %vm1712_vm6, %v2307_v17, %v2025_v43 }
0x1b5c   : > { %2028 = vrot.lane.b32.xlu2 %v2027_v44, %s5144_s2 }
0x1bb6   : > { %v2029_v46 = vpop.permute.xlu2 %2028 }
0x1bb7   : > { %3859 = vmatmul.msk.f32.vlgmr.msrb.gmra.mxu2 %vm1157_vm5, %v2029_v46 }
0x1c3a   : > { %v2049_v47 = vpop.f32.mrf.mxu2 }
0x1c3b   : > { %v2053_v48 = vrot.slane %v2049_v47, 4 }
0x1c3d   : > { %v2055_v49 = vadd.f32 %v2053_v48, %v4780_v61 }
0x1c3f   : > { %4243 = vtanh.f32 %v2055_v49  ;;  %v3860_v51 = vmul.f32 -1.442695, %v2055_v49 }
0x1c41   : > { %4245 = vpow2.f32 %v3860_v51 }
0x1c45   : > { %v4244_v50 = vpop.eup %4243 }
0x1c46   : > { %2081 = vrot.lane.b32.xlu0 %v4244_v50, %s5142_s23 }
0x1c47   : > { %v4246_v52 = vpop.eup %4245 }
0x1c48   : > { %v2059_v53 = vadd.f32 1.0, %v4246_v52 }
0x1c4a   : > { %4247 = vrcp.f32 %v2059_v53  ;;  %v2071_v58 = vand.u32 2147483648, %v2059_v53  ;;  %vm2065_vm7 = vweird.f32 %v2059_v53  ;;  %v2069_v59 = vand.u32 2147483647, %v2059_v53 }
0x1c4c   : > { %v2072_v62 = vor.u32 1.1754944e-38, %v2071_v58  ;;  %vm2070_vm9 = vcmp.eq.f32.partialorder %v2069_v59, 8.507059e+37 }
0x1c50   : > { %v4248_v54 = vpop.eup %4247 }
0x1c51   : > { %v2061_v7 = vmul.f32 %v4248_v54, %v2059_v53  ;;  %vm2066_vm6 = vweird.f32 %v4248_v54 }
0x1c52   : > { %vm2067_vm8 = vmor %vm2065_vm7, %vm2066_vm6 }
0x1c53   : > { %v2062_v55 = vsub.f32 1.0, %v2061_v7 }
0x1c55   : > { %v2063_v56 = vmul.f32 %v4248_v54, %v2062_v55 }
0x1c57   : > { %v2064_v57 = vadd.f32 %v4248_v54, %v2063_v56 }
0x1c59   : > { %v2068_v60 = vsel %vm2067_vm8, %v4248_v54, %v2064_v57 }
0x1c5a   : > { %v2073_v0 = vsel %vm2070_vm9, %v2072_v62, %v2068_v60 }
0x1c5b   : > { %v2079_v3 = vmul.f32 %v2077_v2, %v2073_v0 }
0x1cb8   : > { %v2082_v63 = vpop.permute.xlu0 %2081 }
0x1cb9   : > { %v2084_v1 = vmul.f32 %v2082_v63, %v2073_v0 }
0x1cbb   : > { %2086 = vrot.lane.b32.xlu1 %v2084_v1, %s5144_s2 }
0x1d2d   : > { %v2087_v4 = vpop.permute.xlu1 %2086 }
0x1d2e   : > { %v2089_v5 = vadd.f32 %v2087_v4, %v2079_v3 }
0x1d30   : > { %4249 = vtanh.f32 %v2089_v5  ;;  %v2147_v33 = vrot.slane %v2089_v5, 7 }
0x1d36   : > { %v4250_v6 = vpop.eup %4249 }
0x1d37   : > { %2092 = vrot.lane.b32.xlu2 %v4250_v6, %s5142_s23 }
0x1d91   : > { %v2093_v8 = vpop.permute.xlu2 %2092 }
0x1d92   : > { %v2095_v9 = vmul.f32 %v2093_v8, %v2073_v0 }
0x1d94   : > { %v2097_v11 = vrot.slane %v2095_v9, 4  ;;  %v2309_v12 = vsel %vm1714_vm11, %v2308_v45, %v2095_v9 }
0x1d96   : > { %2098 = vrot.lane.b32.xlu0 %v2097_v11, %s5144_s2 }
0x1e08   : > { %v2099_v13 = vpop.permute.xlu0 %2098 }
0x1e09   : > { %3861 = vmatmul.msk.f32.vlgmr.msrb.gmra.mxu3 %vm1157_vm5, %v2099_v13 }
0x1e8c   : > { %v2119_v14 = vpop.f32.mrf.mxu3 }
0x1e8d   : > { %v2123_v15 = vrot.slane %v2119_v14, 3 }
0x1e8f   : > { %v2125_v16 = vadd.f32 %v2123_v15, %v4780_v61 }
0x1e91   : > { %4251 = vtanh.f32 %v2125_v16  ;;  %v3862_v18 = vmul.f32 -1.442695, %v2125_v16 }
0x1e93   : > { %4253 = vpow2.f32 %v3862_v18 }
0x1e97   : > { %v4252_v17 = vpop.eup %4251 }
0x1e98   : > { %2151 = vrot.lane.b32.xlu1 %v4252_v17, %s5142_s23 }
0x1e99   : > { %v4254_v19 = vpop.eup %4253 }
0x1e9a   : > { %v2129_v20 = vadd.f32 1.0, %v4254_v19 }
0x1e9c   : > { %4255 = vrcp.f32 %v2129_v20  ;;  %v2141_v26 = vand.u32 2147483648, %v2129_v20  ;;  %vm2135_vm13 = vweird.f32 %v2129_v20  ;;  %v2139_v27 = vand.u32 2147483647, %v2129_v20 }
0x1e9e   : > { %v2142_v29 = vor.u32 1.1754944e-38, %v2141_v26  ;;  %vm2140_vm15 = vcmp.eq.f32.partialorder %v2139_v27, 8.507059e+37 }
0x1ea2   : > { %v4256_v21 = vpop.eup %4255 }
0x1ea3   : > { %v2131_v23 = vmul.f32 %v4256_v21, %v2129_v20  ;;  %vm2136_vm12 = vweird.f32 %v4256_v21 }
0x1ea4   : > { %vm2137_vm14 = vmor %vm2135_vm13, %vm2136_vm12  ;;  %vm2618_vm12 = vcmask 195584  }
0x1ea5   : > { %v2132_v24 = vsub.f32 1.0, %v2131_v23 }
0x1ea7   : > { %v2133_v25 = vmul.f32 %v4256_v21, %v2132_v24 }
0x1ea9   : > { %v2134_v22 = vadd.f32 %v4256_v21, %v2133_v25 }
0x1eab   : > { %v2138_v28 = vsel %vm2137_vm14, %v4256_v21, %v2134_v22 }
0x1eac   : > { %v2143_v31 = vsel %vm2140_vm15, %v2142_v29, %v2138_v28 }
0x1ead   : > { %v2149_v35 = vmul.f32 %v2147_v33, %v2143_v31  ;;  %v4009_v33 = vld [vmem:[%s5218_s3] sm:$0xff] }
0x1f0a   : > { %v2152_v30 = vpop.permute.xlu1 %2151 }
0x1f0b   : > { %v2154_v32 = vmul.f32 %v2152_v30, %v2143_v31 }
0x1f0d   : > { %2156 = vrot.lane.b32.xlu2 %v2154_v32, %s5144_s2  ;;  %v4010_v32 = vld [vmem:[%s5218_s3 + $0x8] sm:$0xff]  ;;  %s5166_s3 = smov 80  }
0x1f0e   : > { %2369 = vmatpush.bf16.msra.mxu2 %v4010_v32 }
0x1f12   : > { %2370 = vmatpush.bf16.msra.mxu2 %v4009_v33 }
0x1f67   : > { %v2157_v36 = vpop.permute.xlu2 %2156 }
0x1f68   : > { %v2159_v37 = vadd.f32 %v2157_v36, %v2149_v35 }
0x1f6a   : > { %4257 = vtanh.f32 %v2159_v37  ;;  %v2217_v60 = vrot.slane %v2159_v37, 7 }
0x1f70   : > { %v4258_v38 = vpop.eup %4257 }
0x1f71   : > { %2162 = vrot.lane.b32.xlu0 %v4258_v38, %s5142_s23 }
0x1fe3   : > { %v2163_v10 = vpop.permute.xlu0 %2162 }
0x1fe4   : > { %v2165_v34 = vmul.f32 %v2163_v10, %v2143_v31 }
0x1fe6   : > { %v2167_v39 = vrot.slane %v2165_v34, 5  ;;  %v2310_v40 = vsel %vm1716_vm3, %v2309_v12, %v2165_v34  ;;  %v4130_v34 = vld [vmem:[%s5223_s8] ss:$0 sm:$0xff]  ;;  %s5233_s8 = sld [smem:[#allocation21_spill]] }
0x1fe8   : > { %2168 = vrot.lane.b32.xlu1 %v2167_v39, %s5144_s2 }
0x205a   : > { %v2169_v41 = vpop.permute.xlu1 %2168 }
0x205b   : > { %3863 = vmatmul.msk.f32.vlgmr.msra.gmra.mxu0 %vm1157_vm5, %v2169_v41 }
0x20d8   : > { %v2189_v42 = vpop.f32.mrf.mxu0 }
0x20d9   : > { %v2193_v43 = vrot.slane %v2189_v42, 2 }
0x20db   : > { %v2195_v44 = vadd.f32 %v2193_v43, %v4780_v61 }
0x20dd   : > { %4259 = vtanh.f32 %v2195_v44  ;;  %v3864_v46 = vmul.f32 -1.442695, %v2195_v44 }
0x20df   : > { %4261 = vpow2.f32 %v3864_v46 }
0x20e3   : > { %v4260_v45 = vpop.eup %4259 }
0x20e4   : > { %2221 = vrot.lane.b32.xlu2 %v4260_v45, %s5142_s23 }
0x20e5   : > { %v4262_v47 = vpop.eup %4261 }
0x20e6   : > { %v2199_v48 = vadd.f32 1.0, %v4262_v47 }
0x20e8   : > { %4263 = vrcp.f32 %v2199_v48  ;;  %v2211_v54 = vand.u32 2147483648, %v2199_v48  ;;  %vm2205_vm1 = vweird.f32 %v2199_v48  ;;  %v2209_v7 = vand.u32 2147483647, %v2199_v48 }
0x20ea   : > { %v2212_v56 = vor.u32 1.1754944e-38, %v2211_v54  ;;  %vm2210_vm6 = vcmp.eq.f32.partialorder %v2209_v7, 8.507059e+37 }
0x20ee   : > { %v4264_v49 = vpop.eup %4263 }
0x20ef   : > { %v2201_v50 = vmul.f32 %v4264_v49, %v2199_v48  ;;  %vm2206_vm3 = vweird.f32 %v4264_v49 }
0x20f0   : > { %vm2207_vm2 = vmor %vm2205_vm1, %vm2206_vm3  ;;  %vm2770_vm1 = vcmask 523264  }
0x20f1   : > { %v2202_v51 = vsub.f32 1.0, %v2201_v50 }
0x20f3   : > { %v2203_v52 = vmul.f32 %v4264_v49, %v2202_v51 }
0x20f5   : > { %v2204_v53 = vadd.f32 %v4264_v49, %v2203_v52 }
0x20f7   : > { %v2208_v55 = vsel %vm2207_vm2, %v4264_v49, %v2204_v53 }
0x20f8   : > { %v2213_v58 = vsel %vm2210_vm6, %v2212_v56, %v2208_v55 }
0x20f9   : > { %v2219_v62 = vmul.f32 %v2217_v60, %v2213_v58 }
0x213e   : > { %v2222_v57 = vpop.permute.xlu2 %2221 }
0x213f   : > { %v2224_v59 = vmul.f32 %v2222_v57, %v2213_v58 }
0x2141   : > { %2226 = vrot.lane.b32.xlu0 %v2224_v59, %s5144_s2 }
0x21b3   : > { %v2227_v63 = vpop.permute.xlu0 %2226 }
0x21b4   : > { %v2229_v0 = vadd.f32 %v2227_v63, %v2219_v62 }
0x21b6   : > { %4265 = vtanh.f32 %v2229_v0  ;;  %v2287_v27 = vrot.slane %v2229_v0, 7 }
0x21bc   : > { %v4266_v1 = vpop.eup %4265 }
0x21bd   : > { %2232 = vrot.lane.b32.xlu1 %v4266_v1, %s5142_s23 }
0x222f   : > { %v2233_v2 = vpop.permute.xlu1 %2232 }
0x2230   : > { %v2235_v3 = vmul.f32 %v2233_v2, %v2213_v58 }
0x2232   : > { %v2237_v4 = vrot.slane %v2235_v3, 6  ;;  %v2311_v5 = vsel %vm1718_vm10, %v2310_v40, %v2235_v3 }
0x2234   : > { %2238 = vrot.lane.b32.xlu2 %v2237_v4, %s5144_s2 }
0x228e   : > { %v2239_v6 = vpop.permute.xlu2 %2238 }
0x228f   : > { %3865 = vmatmul.msk.f32.vlgmr.msra.gmra.mxu1 %vm1157_vm5, %v2239_v6 }
0x230c   : > { %v2259_v8 = vpop.f32.mrf.mxu1 }
0x230d   : > { %v2263_v9 = vrot.slane %v2259_v8, 1 }
0x230f   : > { %v2265_v11 = vadd.f32 %v2263_v9, %v4780_v61 }
0x2311   : > { %4267 = vtanh.f32 %v2265_v11  ;;  %v3866_v13 = vmul.f32 -1.442695, %v2265_v11 }
0x2313   : > { %4269 = vpow2.f32 %v3866_v13 }
0x2317   : > { %v4268_v12 = vpop.eup %4267 }
0x2318   : > { %2291 = vrot.lane.b32.xlu0 %v4268_v12, %s5142_s23 }
0x2319   : > { %v4270_v14 = vpop.eup %4269 }
0x231a   : > { %v2269_v15 = vadd.f32 1.0, %v4270_v14 }
0x231c   : > { %4271 = vrcp.f32 %v2269_v15  ;;  %v2281_v21 = vand.u32 2147483648, %v2269_v15  ;;  %vm2275_vm7 = vweird.f32 %v2269_v15  ;;  %v2279_v23 = vand.u32 2147483647, %v2269_v15 }
0x231e   : > { %v2282_v24 = vor.u32 1.1754944e-38, %v2281_v21  ;;  %vm2280_vm9 = vcmp.eq.f32.partialorder %v2279_v23, 8.507059e+37 }
0x2322   : > { %v4272_v16 = vpop.eup %4271 }
0x2323   : > { %v2271_v17 = vmul.f32 %v4272_v16, %v2269_v15  ;;  %vm2276_vm10 = vweird.f32 %v4272_v16 }
0x2324   : > { %vm2277_vm8 = vmor %vm2275_vm7, %vm2276_vm10 }
0x2325   : > { %v2272_v18 = vsub.f32 1.0, %v2271_v17 }
0x2327   : > { %v2273_v19 = vmul.f32 %v4272_v16, %v2272_v18 }
0x2329   : > { %v2274_v20 = vadd.f32 %v4272_v16, %v2273_v19 }
0x232b   : > { %v2278_v61 = vsel %vm2277_vm8, %v4272_v16, %v2274_v20 }
0x232c   : > { %v2283_v22 = vsel %vm2280_vm9, %v2282_v24, %v2278_v61 }
0x232d   : > { %v2289_v28 = vmul.f32 %v2287_v27, %v2283_v22 }
0x238a   : > { %v2292_v25 = vpop.permute.xlu0 %2291 }
0x238b   : > { %v2294_v26 = vmul.f32 %v2292_v25, %v2283_v22 }
0x238d   : > { %2296 = vrot.lane.b32.xlu1 %v2294_v26, %s5144_s2 }
0x23ff   : > { %v2297_v29 = vpop.permute.xlu1 %2296 }
0x2400   : > { %v2299_v30 = vadd.f32 %v2297_v29, %v2289_v28 }
0x2402   : > { %4273 = vtanh.f32 %v2299_v30 }
0x2408   : > { %v4274_v31 = vpop.eup %4273 }
0x2409   : > { %2302 = vrot.lane.b32.xlu2 %v4274_v31, %s5142_s23  ;;  %s5158_s23 = smov 120  }
0x2463   : > { %v2303_v35 = vpop.permute.xlu2 %2302 }
0x2464   : > { %v2305_v36 = vmul.f32 %v2303_v35, %v2283_v22 }
0x2466   : > { %v4841_v37 = vsel %vm1720_vm4, %v2311_v5, %v2305_v36  ;;  %vm2382_vm4 = vcmask 64512  }
0x2467   : > { %v2341_v38 = vpack.c.bf16 %v4841_v37, %v4841_v37 }
0x2469   : > { %2346 = vrot.lane.b32.xlu0 %v2341_v38, %s5144_s2  ;;  %s5151_s2 = smov 72  }
0x24db   : > { %v2347_v10 = vpop.permute.xlu0 %2346 }
0x24dc   : > { %3875 = vmatmul.msk.bf16.vlgmr.msra.gmra.mxu2 %vm1157_vm5, %v2347_v10 }
0x255f   : > { %v2372_v39 = vpop.f32.mrf.mxu2 }
0x2560   : > { %v2373_v40 = vadd.f32 %v4130_v34, %v2372_v39 }
0x2562   : > { %v2376_v41 = vmul.f32 0.35355338, %v2373_v40  ;;  %v4848_v42 = vpack.c.bf16 %v2373_v40, %v2373_v40 }
0x2564   : > { %v2377_v43 = vpack.c.bf16 %v2376_v41, %v2376_v41  ;;  %2438 = vrot.lane.b32.xlu2 %v4848_v42, %s5147_s16  ;;  %2380 = vrot.lane.b32.xlu1 %v4848_v42, %s5168_s22  ;;  %s5149_s16 = smov 104  }
0x2566   : > { %2436 = vrot.lane.b32.xlu0 %v2377_v43, %s5158_s23  ;;  %s5160_s23 = smov 24  }
0x2567   : > { %v2374_v44 = vpop.f32.mrf.mxu2 }
0x256c   : > { %2550 = vrot.lane.b32.xlu2 %v4848_v42, %s5151_s2  ;;  %2494 = vrot.lane.b32.xlu1 %v4848_v42, %s5166_s3  ;;  %s5153_s2 = smov 48   ;;  %s5230_s3 = sld [smem:[#allocation19_spill]] }
0x256e   : > { %2492 = vrot.lane.b32.xlu0 %v2377_v43, %s5156_s5  ;;  %s5162_s5 = smov 16  }
0x2574   : > { %2548 = vrot.lane.b32.xlu1 %v2377_v43, %s5149_s16  ;;  %s5154_s16 = smov 56  }
0x25be   : > { %v2439_v45 = vpop.permute.xlu2 %2438 }
0x25bf   : > { %v2444_v46 = vsel %vm2382_vm4, %v2439_v45, 0 }
0x25c0   : > { %2453 = vmatpush.bf16.xpose.msrb.mxu1 %v2444_v46 }
0x25c6   : > { %v2551_v47 = vpop.permute.xlu2 %2550 }
0x25c7   : > { %v2556_v48 = vsel %vm2382_vm4, %v2551_v47, 0 }
0x25c8   : > { %2565 = vmatpush.bf16.xpose.msra.mxu1 %v2556_v48 }
0x25d6   : > { %v2381_v49 = vpop.permute.xlu1 %2380 }
0x25d7   : > { %v2387_v50 = vsel %vm2382_vm4, %v2381_v49, 0 }
0x25d8   : > { %2396 = vmatpush.bf16.xpose.msra.mxu3 %v2387_v50  ;;  %v2437_v51 = vpop.permute.xlu0 %2436 }
0x25d9   : > { %3878 = vmatmul.msk.bf16.vlgmr.msrb.gmra.mxu1 %vm2382_vm4, %v2437_v51 }
0x25de   : > { %v2495_v52 = vpop.permute.xlu1 %2494 }
0x25df   : > { %v2500_v53 = vsel %vm2382_vm4, %v2495_v52, 0  ;;  %3876 = vmatmul.msk.bf16.vlgmr.msra.gmra.mxu3 %vm2382_vm4, %v2377_v43 }
0x25e0   : > { %2509 = vmatpush.bf16.xpose.msrb.mxu3 %v2500_v53  ;;  %v2493_v7 = vpop.permute.xlu0 %2492 }
0x25e6   : > { %v2549_v54 = vpop.permute.xlu1 %2548 }
0x25e9   : > { %3882 = vmatmul.msk.bf16.vlgmr.msra.gmra.mxu1 %vm2382_vm4, %v2549_v54 }
0x25ef   : > { %3880 = vmatmul.msk.bf16.vlgmr.msrb.gmra.mxu3 %vm2382_vm4, %v2493_v7 }
0x2656   : > { %v2455_v55 = vpop.f32.mrf.mxu1 }
0x2657   : > { %v2459_v56 = vsel %vm2382_vm4, %v2455_v55, -inf }
0x2658   : > { %2460 = vmax.xlane.f32.xlu2 %v2459_v56  ;;  %v4012_v56 = vld [vmem:[%s5214_s14 + $0x8] sm:$0xff] }
0x2659   : > { %2645 = vmatpush.bf16.msra.mxu3 %v4012_v56 }
0x265e   : > { %v2457_v57 = vpop.f32.mrf.mxu1 }
0x265f   : > { %v4011_v57 = vld [vmem:[%s5214_s14] sm:$0xff]  ;;  %s5242_s14 = smov 56  }
0x2660   : > { %2646 = vmatpush.bf16.msra.mxu3 %v4011_v57 }
0x2662   : > { %v2398_v58 = vpop.f32.mrf.mxu3 }
0x2663   : > { %v2402_v59 = vsel %vm2382_vm4, %v2398_v58, -inf }
0x2664   : > { %2403 = vmax.xlane.f32.xlu0 %v2402_v59 }
0x2666   : > { %v2567_v60 = vpop.f32.mrf.mxu1 }
0x2667   : > { %v2571_v62 = vsel %vm2382_vm4, %v2567_v60, -inf }
0x2668   : > { %2572 = vmax.xlane.f32.xlu1 %v2571_v62 }
0x266a   : > { %v2400_v63 = vpop.f32.mrf.mxu3 }
0x266e   : > { %v2569_v0 = vpop.f32.mrf.mxu1 }
0x2672   : > { %v2511_v1 = vpop.f32.mrf.mxu3 }
0x2673   : > { %v2515_v2 = vsel %vm2382_vm4, %v2511_v1, -inf }
0x2674   : > { %2516 = vmax.xlane.f32.xlu2 %v2515_v2  ;;  %v4131_v2 = vld [vmem:[%s5225_s19] ss:$0 sm:$0xff]  ;;  %s5249_s19 = smov 24  }
0x267a   : > { %v2513_v3 = vpop.f32.mrf.mxu3 }
0x2681   : > { %2471 = vrot.lane.b32.xlu1 %v4848_v42, %s5154_s16  ;;  %s5155_s16 = smov 40  }
0x2689   : > { %2527 = vrot.lane.b32.xlu1 %v4848_v42, %s5153_s2  ;;  %s5224_s2 = smov 64  }
0x26cb   : > { %v2461_v4 = vpop.xlane.xlu2 %2460 }
0x26cc   : > { %v2462_v5 = vsub.f32 %v2455_v55, %v2461_v4 }
0x26ce   : > { %v2463_v6 = vmul.f32 1.442695, %v2462_v5 }
0x26d0   : > { %4275 = vpow2.f32 %v2463_v6 }
0x26d6   : > { %v4276_v8 = vpop.eup %4275 }
0x26d7   : > { %v2404_v9 = vpop.xlane.xlu0 %2403  ;;  %v2465_v11 = vsel %vm2382_vm4, %v4276_v8, 0.0 }
0x26d8   : > { %v2405_v12 = vsub.f32 %v2398_v58, %v2404_v9  ;;  %2466 = vadd.xlane.f32.xlu2 %v2465_v11 }
0x26da   : > { %v2406_v13 = vmul.f32 1.442695, %v2405_v12  ;;  %v4450_v12 = vmov 32.0  }
0x26db   : > { %v2573_v14 = vpop.xlane.xlu1 %2572 }
0x26dc   : > { %4277 = vpow2.f32 %v2406_v13  ;;  %v2574_v15 = vsub.f32 %v2567_v60, %v2573_v14 }
0x26de   : > { %v2575_v16 = vmul.f32 1.442695, %v2574_v15 }
0x26e0   : > { %4279 = vpow2.f32 %v2575_v16 }
0x26e2   : > { %v4278_v17 = vpop.eup %4277 }
0x26e3   : > { %v2408_v18 = vsel %vm2382_vm4, %v4278_v17, 0.0 }
0x26e4   : > { %2409 = vadd.xlane.f32.xlu0 %v2408_v18 }
0x26e6   : > { %v4280_v20 = vpop.eup %4279 }
0x26e7   : > { %v2517_v19 = vpop.xlane.xlu2 %2516  ;;  %v2577_v61 = vsel %vm2382_vm4, %v4280_v20, 0.0 }
0x26e8   : > { %v2518_v21 = vsub.f32 %v2511_v1, %v2517_v19 }
0x26ea   : > { %v2519_v23 = vmul.f32 1.442695, %v2518_v21 }
0x26ec   : > { %4281 = vpow2.f32 %v2519_v23  ;;  %2578 = vadd.xlane.f32.xlu0 %v2577_v61  ;;  %v4132_v23 = vld [vmem:[%s5227_s24] ss:$0 sm:$0xff]  ;;  %s5251_s24 = sld [smem:[#allocation27_spill]] }
0x26ed   : > { %v4133_v61 = vld [vmem:[%s4519_s30] ss:$0 sm:$0xff] }
0x26f0   : > { %2414 = vrot.lane.b32.xlu2 %v4848_v42, %s5224_s2 }
0x26f2   : > { %v4282_v24 = vpop.eup %4281 }
0x26f3   : > { %v2472_v25 = vpop.permute.xlu1 %2471  ;;  %v2521_v22 = vsel %vm2382_vm4, %v4282_v24, 0.0 }
0x26f4   : > { %v2477_v26 = vsel %vm1714_vm11, %v2472_v25, 0  ;;  %2522 = vadd.xlane.f32.xlu0 %v2521_v22  ;;  %v4014_v22 = vld [vmem:[%s5217_s6 + $0x8] sm:$0xff] }
0x26f5   : > { %2486 = vmatpush.bf16.msrb.mxu2 %v2477_v26 }
0x26fb   : > { %v2528_v29 = vpop.permute.xlu1 %2527 }
0x26fc   : > { %v2533_v33 = vsel %vm1714_vm11, %v2528_v29, 0 }
0x2708   : > { %2583 = vrot.lane.b32.xlu0 %v4848_v42, %s5155_s16  ;;  %s5164_s16 = smov 8  }
0x274b   : > { %v2467_v27 = vpop.xlane.xlu2 %2466 }
0x274c   : > { %4283 = vrcp.f32 %v2467_v27 }
0x2752   : > { %v4284_v28 = vpop.eup %4283 }
0x2753   : > { %v2469_v30 = vmul.f32 %v4284_v28, %v4276_v8  ;;  %v2415_v31 = vpop.permute.xlu2 %2414  ;;  %v4013_v28 = vld [vmem:[%s5217_s6] sm:$0xff]  ;;  %s5232_s6 = smov 96  }
0x2754   : > { %v2420_v32 = vsel %vm1714_vm11, %v2415_v31, 0 }
0x2755   : > { %v2470_v35 = vpack.c.bf16 %v2469_v30, %v2469_v30  ;;  %2429 = vmatpush.bf16.msrb.mxu0 %v2420_v32 }
0x2757   : > { %v2410_v36 = vpop.xlane.xlu0 %2409  ;;  %3879 = vmatmul.msk.bf16.vlgmr.msrb.gmra.mxu2 %vm2382_vm4, %v2470_v35 }
0x2758   : > { %4285 = vrcp.f32 %v2410_v36 }
0x2759   : > { %2542 = vmatpush.bf16.msra.mxu0 %v2533_v33 }
0x275e   : > { %v4286_v38 = vpop.eup %4285 }
0x275f   : > { %v2412_v10 = vmul.f32 %v4286_v38, %v4278_v17  ;;  %v2579_v34 = vpop.xlane.xlu0 %2578 }
0x2761   : > { %v2413_v39 = vpack.c.bf16 %v2412_v10, %v2412_v10 }
0x2763   : > { %3877 = vmatmul.msk.bf16.vlgmr.msrb.gmra.mxu0 %vm2382_vm4, %v2413_v39 }
0x2764   : > { %2734 = vmatpush.bf16.msrb.mxu0 %v4014_v22 }
0x2767   : > { %v2523_v40 = vpop.xlane.xlu0 %2522 }
0x2768   : > { %4287 = vrcp.f32 %v2523_v40  ;;  %2735 = vmatpush.bf16.msrb.mxu0 %v4013_v28 }
0x2769   : > { %4289 = vrcp.f32 %v2579_v34 }
0x276a   : > { %4291 = vrcp.f32 %v4450_v12 }
0x276e   : > { %v4288_v41 = vpop.eup %4287 }
0x276f   : > { %v2525_v42 = vmul.f32 %v4288_v41, %v4282_v24  ;;  %v4290_v44 = vpop.eup %4289 }
0x2770   : > { %v2581_v45 = vmul.f32 %v4290_v44, %v4280_v20  ;;  %v4292_v13 = vpop.eup %4291 }
0x2771   : > { %v2526_v43 = vpack.c.bf16 %v2525_v42, %v2525_v42  ;;  %v2665_v14 = vmul.f32 32.0, %v4292_v13  ;;  %vm2669_vm13 = vweird.f32 %v4292_v13 }
0x2772   : > { %v2582_v48 = vpack.c.bf16 %v2581_v45, %v2581_v45 }
0x2773   : > { %3881 = vmatmul.msk.bf16.vlgmr.msra.gmra.mxu0 %vm2382_vm4, %v2526_v43  ;;  %v2666_v15 = vsub.f32 1.0, %v2665_v14 }
0x2775   : > { %v2667_v16 = vmul.f32 %v4292_v13, %v2666_v15 }
0x2777   : > { %v2668_v17 = vadd.f32 %v4292_v13, %v2667_v16 }
0x2779   : > { %v4907_v18 = vsel %vm2669_vm13, %v4292_v13, %v2668_v17 }
0x277a   : > { %v2584_v46 = vpop.permute.xlu0 %2583 }
0x277b   : > { %v2589_v47 = vsel %vm1714_vm11, %v2584_v46, 0 }
0x277c   : > { %2598 = vmatpush.bf16.msra.mxu2 %v2589_v47 }
0x277f   : > { %3883 = vmatmul.msk.bf16.vlgmr.msra.gmra.mxu2 %vm2382_vm4, %v2582_v48 }
0x27da   : > { %v2488_v49 = vpop.f32.mrf.mxu2 }
0x27db   : > { %2605 = vrot.lane.b32.xlu2 %v2488_v49, %s5164_s16  ;;  %s5229_s16 = sld [smem:[#allocation17_spill]] }
0x27e0   : > { %v2431_v50 = vpop.f32.mrf.mxu0 }
0x27e1   : > { %v4134_v48 = vld [vmem:[%s5229_s16] ss:$0 sm:$0xff]  ;;  %s5234_s16 = sld [smem:[#allocation22_spill]] }
0x27e2   : > { %v2490_v51 = vpop.f32.mrf.mxu2 }
0x27e8   : > { %v2433_v52 = vpop.f32.mrf.mxu0 }
0x27f0   : > { %v2544_v53 = vpop.f32.mrf.mxu0 }
0x27f1   : > { %2609 = vrot.lane.b32.xlu1 %v2544_v53, %s5162_s5  ;;  %s5228_s5 = sld [smem:[#allocation18_spill]] }
0x27f7   : > { %v4018_v43 = vld [vmem:[%s5228_s5 + $0x18] sm:$0xff]  ;;  %v4017_v44 = vld [vmem:[%s5228_s5 + $0x10] sm:$0xff]  ;;  %v4016_v46 = vld [vmem:[%s5228_s5 + $0x8] sm:$0xff] }
0x27f8   : > { %v2546_v54 = vpop.f32.mrf.mxu0  ;;  %2778 = vmatpush.bf16.msrb.mxu1 %v4018_v43  ;;  %v4015_v47 = vld [vmem:[%s5228_s5] sm:$0xff]  ;;  %s5238_s5 = smov 120  }
0x27f9   : > { %v4135_v54 = vld [vmem:[%s5230_s3] ss:$0 sm:$0xff]  ;;  %s5235_s3 = sld [smem:[#allocation23_spill]] }
0x27fc   : > { %2779 = vmatpush.bf16.msrb.mxu1 %v4017_v44 }
0x2800   : > { %2780 = vmatpush.bf16.msrb.mxu1 %v4016_v46 }
0x2802   : > { %v2600_v7 = vpop.f32.mrf.mxu2 }
0x2803   : > { %2613 = vrot.lane.b32.xlu2 %v2600_v7, %s5160_s23  ;;  %s5226_s23 = smov 32  }
0x2804   : > { %2781 = vmatpush.bf16.msrb.mxu1 %v4015_v47 }
0x280a   : > { %v2602_v55 = vpop.f32.mrf.mxu2 }
0x2835   : > { %v2606_v58 = vpop.permute.xlu2 %2605 }
0x2836   : > { %v2616_v59 = vsel %vm2382_vm4, %v2431_v50, %v2606_v58 }
0x285d   : > { %v2614_v62 = vpop.permute.xlu2 %2613 }
0x2863   : > { %v2610_v60 = vpop.permute.xlu1 %2609 }
0x2864   : > { %v2617_v63 = vsel %vm1133_vm0, %v2616_v59, %v2610_v60 }
0x2865   : > { %v2619_v0 = vsel %vm2618_vm12, %v2617_v63, %v2614_v62 }
0x2866   : > { %v2620_v1 = vpack.c.bf16 %v2619_v0, %v2619_v0 }
0x2868   : > { %3892 = vmatmul.msk.bf16.vlgmr.msra.gmra.mxu3 %vm1157_vm5, %v2620_v1 }
0x28eb   : > { %v2648_v3 = vpop.f32.mrf.mxu3 }
0x28ec   : > { %v2649_v4 = vadd.f32 %v4131_v2, %v2648_v3  ;;  %v4137_v3 = vld [vmem:[%s5233_s8] ss:$0 sm:$0xff]  ;;  %s5236_s8 = smov 80  }
0x28ee   : > { %2653 = vrot.lane.b32.xlu1 %v2649_v4, %s5168_s22 }
0x28f3   : > { %v2650_v5 = vpop.f32.mrf.mxu3 }
0x2960   : > { %v2654_v6 = vpop.permute.xlu1 %2653 }
0x2961   : > { %v2656_v8 = vadd.f32 %v2654_v6, %v4841_v37  ;;  %v4020_v6 = vld [vmem:[%s5234_s16 + $0x8] sm:$0xff] }
0x2962   : > { %2890 = vmatpush.bf16.msrb.mxu2 %v4020_v6 }
0x2963   : > { %2658 = vrot.lane.b32.xlu0 %v2656_v8, %s5226_s23 }
0x29d5   : > { %v2659_v9 = vpop.permute.xlu0 %2658 }
0x29d6   : > { %v2661_v11 = vsel %vm1157_vm5, %v2659_v9, 0.0 }
0x29d7   : > { %2662 = vadd.xlane.f32.xlu2 %v2661_v11  ;;  %v4019_v11 = vld [vmem:[%s5234_s16] sm:$0xff]  ;;  %s5247_s16 = smov 16  }
0x29d8   : > { %2891 = vmatpush.bf16.msrb.mxu2 %v4019_v11 }
0x2a4a   : > { %v2663_v37 = vpop.xlane.xlu2 %2662 }
0x2a4b   : > { %v2671_v19 = vmul.f32 %v4907_v18, %v2663_v37 }
0x2a4d   : > { %v2672_v20 = vsub.f32 %v2656_v8, %v2671_v19 }
0x2a4f   : > { %v2673_v21 = vmul.f32 %v2672_v20, %v2672_v20 }
0x2a51   : > { %2675 = vrot.lane.b32.xlu1 %v2673_v21, %s5226_s23 }
0x2a59   : > { %2696 = vrot.lane.b32.xlu1 %v4132_v23, %s5168_s22 }
0x2a61   : > { %2702 = vrot.lane.b32.xlu1 %v4133_v61, %s5168_s22  ;;  %s5231_s22 = sld [smem:[#allocation20_spill]] }
0x2a67   : > { %v4136_v2 = vld [vmem:[%s5231_s22] ss:$0 sm:$0xff]  ;;  %s5237_s22 = smov 88  }
0x2ac3   : > { %v2676_v24 = vpop.permute.xlu1 %2675 }
0x2ac4   : > { %v2678_v25 = vsel %vm1157_vm5, %v2676_v24, 0.0 }
0x2ac5   : > { %2679 = vadd.xlane.f32.xlu0 %v2678_v25 }
0x2acb   : > { %v2697_v33 = vpop.permute.xlu1 %2696 }
0x2ad3   : > { %v2703_v39 = vpop.permute.xlu1 %2702 }
0x2b38   : > { %v2680_v26 = vpop.xlane.xlu0 %2679 }
0x2b39   : > { %v2681_v27 = vmul.f32 %v2680_v26, %v4907_v18  ;;  %v4138_v26 = vld [vmem:[%s5235_s3] ss:$0 sm:$0xff]  ;;  %s5240_s3 = smov 72  }
0x2b3b   : > { %v2682_v29 = vadd.f32 1e-05, %v2681_v27 }
0x2b3d   : > { %4293 = vrsqrt.f32 %v2682_v29  ;;  %vm2689_vm15 = vweird.f32 %v2682_v29 }
0x2b43   : > { %v4294_v30 = vpop.eup %4293 }
0x2b44   : > { %v2684_v31 = vmul.f32 %v4294_v30, %v2682_v29  ;;  %vm2690_vm14 = vweird.f32 %v4294_v30 }
0x2b45   : > { %vm2691_vm3 = vmor %vm2689_vm15, %vm2690_vm14 }
0x2b46   : > { %v2685_v32 = vmul.f32 %v4294_v30, %v2684_v31 }
0x2b48   : > { %v2686_v35 = vmul.f32 0.5, %v2685_v32 }
0x2b4a   : > { %v2687_v36 = vsub.f32 1.5, %v2686_v35 }
0x2b4c   : > { %v2688_v38 = vmul.f32 %v4294_v30, %v2687_v36 }
0x2b4e   : > { %v2692_v10 = vsel %vm2691_vm3, %v4294_v30, %v2688_v38  ;;  %vm3447_vm3 = vcmask 57344  }
0x2b4f   : > { %v2693_v34 = vmul.f32 %v2692_v10, %v2672_v20 }
0x2b51   : > { %v2699_v40 = vmul.f32 %v2697_v33, %v2693_v34 }
0x2b53   : > { %v2705_v41 = vadd.f32 %v2703_v39, %v2699_v40 }
0x2b55   : > { %v2706_v42 = vpack.c.bf16 %v2705_v41, %v2705_v41 }
0x2b57   : > { %2711 = vrot.lane.b32.xlu1 %v2706_v42, %s5226_s23 }
0x2bc9   : > { %v2712_v45 = vpop.permute.xlu1 %2711 }
0x2bca   : > { %3901 = vmatmul.msk.bf16.vlgmr.msrb.gmra.mxu0 %vm1157_vm5, %v2712_v45 }
0x2c47   : > { %v2737_v49 = vpop.f32.mrf.mxu0 }
0x2c48   : > { %v2738_v50 = vadd.f32 %v4134_v48, %v2737_v49 }
0x2c4a   : > { %v2741_v51 = vmax.f32 %v2738_v50, 0.0 }
0x2c4c   : > { %v2742_v52 = vpack.c.bf16 %v2741_v51, %v2741_v51 }
0x2c4e   : > { %3918 = vmatmul.msk.bf16.vlgmr.msrb.gmra.mxu1 %vm2770_vm1, %v2742_v52 }
0x2c4f   : > { %v2739_v53 = vpop.f32.mrf.mxu0 }
0x2ccb   : > { %v2783_v7 = vpop.f32.mrf.mxu1 }
0x2ccc   : > { %v2784_v55 = vadd.f32 %v4135_v54, %v2783_v7 }
0x2cce   : > { %2788 = vrot.lane.b32.xlu1 %v2784_v55, %s5232_s6 }
0x2cd3   : > { %v2785_v56 = vpop.f32.mrf.mxu1 }
0x2d40   : > { %v2789_v57 = vpop.permute.xlu1 %2788 }
0x2d41   : > { %v2791_v58 = vadd.f32 %v2789_v57, %v2705_v41 }
0x2d43   : > { %2793 = vrot.lane.b32.xlu2 %v2791_v58, %s5226_s23 }
0x2d9d   : > { %v2794_v59 = vpop.permute.xlu2 %2793 }
0x2d9e   : > { %v2796_v60 = vsel %vm1157_vm5, %v2794_v59, 0.0 }
0x2d9f   : > { %2797 = vadd.xlane.f32.xlu1 %v2796_v60 }
0x2e12   : > { %v2798_v62 = vpop.xlane.xlu1 %2797 }
0x2e13   : > { %v2799_v63 = vmul.f32 %v2798_v62, %v4907_v18 }
0x2e15   : > { %v2800_v0 = vsub.f32 %v2791_v58, %v2799_v63 }
0x2e17   : > { %v2801_v1 = vmul.f32 %v2800_v0, %v2800_v0 }
0x2e19   : > { %2803 = vrot.lane.b32.xlu0 %v2801_v1, %s5226_s23 }
0x2e21   : > { %2824 = vrot.lane.b32.xlu0 %v4136_v2, %s5232_s6 }
0x2e29   : > { %2830 = vrot.lane.b32.xlu0 %v4137_v3, %s5232_s6 }
0x2e8b   : > { %v2804_v4 = vpop.permute.xlu0 %2803 }
0x2e8c   : > { %v2806_v5 = vsel %vm1157_vm5, %v2804_v4, 0.0 }
0x2e8d   : > { %2807 = vadd.xlane.f32.xlu2 %v2806_v5 }
0x2e93   : > { %v2825_v16 = vpop.permute.xlu0 %2824 }
0x2e9b   : > { %v2831_v23 = vpop.permute.xlu0 %2830 }
0x2f00   : > { %v2808_v8 = vpop.xlane.xlu2 %2807 }
0x2f01   : > { %v2809_v9 = vmul.f32 %v2808_v8, %v4907_v18 }
0x2f03   : > { %v2810_v12 = vadd.f32 1e-05, %v2809_v9 }
0x2f05   : > { %4295 = vrsqrt.f32 %v2810_v12  ;;  %vm2817_vm6 = vweird.f32 %v2810_v12 }
0x2f0b   : > { %v4296_v13 = vpop.eup %4295 }
0x2f0c   : > { %v2812_v14 = vmul.f32 %v4296_v13, %v2810_v12  ;;  %vm2818_vm2 = vweird.f32 %v4296_v13 }
0x2f0d   : > { %vm2819_vm10 = vmor %vm2817_vm6, %vm2818_vm2 }
0x2f0e   : > { %v2813_v15 = vmul.f32 %v4296_v13, %v2812_v14 }
0x2f10   : > { %v2814_v17 = vmul.f32 0.5, %v2813_v15 }
0x2f12   : > { %v2815_v37 = vsub.f32 1.5, %v2814_v17 }
0x2f14   : > { %v2816_v19 = vmul.f32 %v4296_v13, %v2815_v37 }
0x2f16   : > { %v2820_v20 = vsel %vm2819_vm10, %v4296_v13, %v2816_v19 }
0x2f17   : > { %v2821_v21 = vmul.f32 %v2820_v20, %v2800_v0 }
0x2f19   : > { %v2827_v61 = vmul.f32 %v2825_v16, %v2821_v21 }
0x2f1b   : > { %v4941_v24 = vadd.f32 %v2831_v23, %v2827_v61 }
0x2f1d   : > { %v2862_v25 = vpack.c.bf16 %v4941_v24, %v4941_v24 }
0x2f1f   : > { %2867 = vrot.lane.b32.xlu0 %v2862_v25, %s5226_s23 }
0x2f91   : > { %v2868_v22 = vpop.permute.xlu0 %2867 }
0x2f92   : > { %3927 = vmatmul.msk.bf16.vlgmr.msrb.gmra.mxu2 %vm1157_vm5, %v2868_v22 }
0x3015   : > { %v2893_v27 = vpop.f32.mrf.mxu2 }
0x3016   : > { %v2894_v28 = vadd.f32 %v4138_v26, %v2893_v27 }
0x3018   : > { %v4948_v29 = vpack.c.bf16 %v2894_v28, %v2894_v28  ;;  %v2897_v30 = vmul.f32 0.35355338, %v2894_v28 }
0x301a   : > { %3014 = vrot.lane.b32.xlu2 %v4948_v29, %s5236_s8  ;;  %2958 = vrot.lane.b32.xlu0 %v4948_v29, %s5237_s22  ;;  %v2898_v32 = vpack.c.bf16 %v2897_v30, %v2897_v30 }
0x301b   : > { %2901 = vrot.lane.b32.xlu1 %v4948_v29, %s5232_s6 }
0x301d   : > { %v2895_v31 = vpop.f32.mrf.mxu2 }
0x3022   : > { %2956 = vrot.lane.b32.xlu0 %v2898_v32, %s5238_s5 }
0x3023   : > { %3012 = vrot.lane.b32.xlu1 %v2898_v32, %s5239_s9 }
0x302a   : > { %3070 = vrot.lane.b32.xlu0 %v4948_v29, %s5240_s3 }
0x3032   : > { %3068 = vrot.lane.b32.xlu0 %v2898_v32, %s5241_s13 }
0x3074   : > { %v3015_v33 = vpop.permute.xlu2 %3014 }
0x3075   : > { %v3020_v34 = vsel %vm2382_vm4, %v3015_v33, 0 }
0x308c   : > { %v2959_v35 = vpop.permute.xlu0 %2958 }
0x308d   : > { %v2964_v36 = vsel %vm2382_vm4, %v2959_v35, 0  ;;  %v2902_v38 = vpop.permute.xlu1 %2901 }
0x308e   : > { %v2907_v10 = vsel %vm2382_vm4, %v2902_v38, 0  ;;  %2973 = vmatpush.bf16.xpose.msra.mxu1 %v2964_v36 }
0x308f   : > { %2916 = vmatpush.bf16.xpose.msrb.mxu3 %v2907_v10 }
0x3094   : > { %v2957_v39 = vpop.permute.xlu0 %2956 }
0x3095   : > { %3930 = vmatmul.msk.bf16.vlgmr.msra.gmra.mxu1 %vm2382_vm4, %v2957_v39  ;;  %v3013_v43 = vpop.permute.xlu1 %3012 }
0x3096   : > { %3928 = vmatmul.msk.bf16.vlgmr.msrb.gmra.mxu3 %vm2382_vm4, %v2898_v32 }
0x3097   : > { %3029 = vmatpush.bf16.xpose.msra.mxu3 %v3020_v34 }
0x309c   : > { %v3071_v40 = vpop.permute.xlu0 %3070 }
0x309d   : > { %v3076_v41 = vsel %vm2382_vm4, %v3071_v40, 0 }
0x309e   : > { %3085 = vmatpush.bf16.xpose.msrb.mxu1 %v3076_v41 }
0x30a4   : > { %v3069_v42 = vpop.permute.xlu0 %3068 }
0x30a5   : > { %3934 = vmatmul.msk.bf16.vlgmr.msrb.gmra.mxu1 %vm2382_vm4, %v3069_v42 }
0x30a6   : > { %3932 = vmatmul.msk.bf16.vlgmr.msra.gmra.mxu3 %vm2382_vm4, %v3013_v43 }
0x3112   : > { %v2975_v44 = vpop.f32.mrf.mxu1 }
0x3113   : > { %v2979_v45 = vsel %vm2382_vm4, %v2975_v44, -inf }
0x3114   : > { %2980 = vmax.xlane.f32.xlu1 %v2979_v45 }
0x3119   : > { %v2918_v46 = vpop.f32.mrf.mxu3 }
0x311a   : > { %v2977_v47 = vpop.f32.mrf.mxu1  ;;  %v2922_v48 = vsel %vm2382_vm4, %v2918_v46, -inf }
0x311b   : > { %2923 = vmax.xlane.f32.xlu0 %v2922_v48 }
0x3121   : > { %v2920_v49 = vpop.f32.mrf.mxu3 }
0x3122   : > { %v3087_v50 = vpop.f32.mrf.mxu1 }
0x3123   : > { %v3091_v51 = vsel %vm2382_vm4, %v3087_v50, -inf }
0x3124   : > { %3092 = vmax.xlane.f32.xlu2 %v3091_v51 }
0x3129   : > { %v3031_v52 = vpop.f32.mrf.mxu3 }
0x312a   : > { %v3089_v53 = vpop.f32.mrf.mxu1  ;;  %v3035_v54 = vsel %vm2382_vm4, %v3031_v52, -inf }
0x312b   : > { %3036 = vmax.xlane.f32.xlu1 %v3035_v54 }
0x312f   : > { %2934 = vrot.lane.b32.xlu0 %v4948_v29, %s5224_s2  ;;  %s5244_s2 = smov 40  }
0x3131   : > { %v3033_v7 = vpop.f32.mrf.mxu3 }
0x3132   : > { %v4139_v7 = vld [vmem:[%s5248_s17] ss:$0 sm:$0xff]  ;;  %s5253_s17 = sld [smem:[#allocation30_spill]] }
0x313c   : > { %2991 = vrot.lane.b32.xlu2 %v4948_v29, %s5242_s14  ;;  %s5243_s14 = smov 48  }
0x3187   : > { %v2981_v55 = vpop.xlane.xlu1 %2980 }
0x3188   : > { %v2982_v56 = vsub.f32 %v2975_v44, %v2981_v55 }
0x318a   : > { %v2983_v57 = vmul.f32 1.442695, %v2982_v56 }
0x318c   : > { %4297 = vpow2.f32 %v2983_v57 }
0x318e   : > { %v2924_v58 = vpop.xlane.xlu0 %2923 }
0x318f   : > { %v2925_v59 = vsub.f32 %v2918_v46, %v2924_v58 }
0x3191   : > { %v2926_v60 = vmul.f32 1.442695, %v2925_v59 }
0x3192   : > { %v4298_v62 = vpop.eup %4297 }
0x3193   : > { %4299 = vpow2.f32 %v2926_v60  ;;  %v2985_v63 = vsel %vm2382_vm4, %v4298_v62, 0.0 }
0x3194   : > { %2986 = vadd.xlane.f32.xlu0 %v2985_v63 }
0x3197   : > { %v3093_v0 = vpop.xlane.xlu2 %3092 }
0x3198   : > { %v3094_v1 = vsub.f32 %v3087_v50, %v3093_v0 }
0x3199   : > { %v4300_v2 = vpop.eup %4299 }
0x319a   : > { %v3095_v3 = vmul.f32 1.442695, %v3094_v1  ;;  %v2928_v4 = vsel %vm2382_vm4, %v4300_v2, 0.0 }
0x319b   : > { %2929 = vadd.xlane.f32.xlu1 %v2928_v4  ;;  %v4141_v4 = vld [vmem:[%s5251_s24] ss:$0 sm:$0xff]  ;;  %s5255_s24 = sld [smem:[#allocation31_spill]] }
0x319c   : > { %4301 = vpow2.f32 %v3095_v3  ;;  %v4140_v3 = vld [vmem:[%s5250_s21] ss:$0 sm:$0xff]  ;;  %s5254_s21 = sld [smem:[#allocation29_spill]] }
0x319e   : > { %v3037_v5 = vpop.xlane.xlu1 %3036 }
0x319f   : > { %v3038_v6 = vsub.f32 %v3031_v52, %v3037_v5  ;;  %v2992_v8 = vpop.permute.xlu2 %2991 }
0x31a0   : > { %v2997_v9 = vsel %vm1714_vm11, %v2992_v8, 0 }
0x31a1   : > { %v3039_v11 = vmul.f32 1.442695, %v3038_v6  ;;  %v2935_v12 = vpop.permute.xlu0 %2934  ;;  %3006 = vmatpush.bf16.msra.mxu2 %v2997_v9 }
0x31a2   : > { %v4302_v13 = vpop.eup %4301  ;;  %v2940_v14 = vsel %vm1714_vm11, %v2935_v12, 0 }
0x31a3   : > { %4303 = vpow2.f32 %v3039_v11  ;;  %2949 = vmatpush.bf16.msra.mxu0 %v2940_v14  ;;  %v3097_v15 = vsel %vm2382_vm4, %v4302_v13, 0.0 }
0x31a4   : > { %3098 = vadd.xlane.f32.xlu1 %v3097_v15 }
0x31a8   : > { %3047 = vrot.lane.b32.xlu0 %v4948_v29, %s5243_s14  ;;  %s5245_s14 = sld [smem:[#allocation24_spill]] }
0x31a9   : > { %v4304_v16 = vpop.eup %4303 }
0x31aa   : > { %v3041_v17 = vsel %vm2382_vm4, %v4304_v16, 0.0 }
0x31ac   : > { %3042 = vadd.xlane.f32.xlu1 %v3041_v17 }
0x31ae   : > { %v4022_v46 = vld [vmem:[%s5245_s14 + $0x8] sm:$0xff]  ;;  %v4021_v47 = vld [vmem:[%s5245_s14] sm:$0xff]  ;;  %s5252_s14 = sld [smem:[#allocation28_spill]] }
0x31af   : > { %3164 = vmatpush.bf16.msrb.mxu3 %v4022_v46 }
0x31b3   : > { %3165 = vmatpush.bf16.msrb.mxu3 %v4021_v47 }
0x31b4   : > { %v4024_v6 = vld [vmem:[%s5252_s14 + $0x8] sm:$0xff]  ;;  %v4023_v11 = vld [vmem:[%s5252_s14] sm:$0xff]  ;;  %s5256_s14 = sld [smem:[#allocation32_spill]] }
0x31c5   : > { %3103 = vrot.lane.b32.xlu1 %v4948_v29, %s5244_s2  ;;  %s5246_s2 = smov 8  }
0x3207   : > { %v2987_v37 = vpop.xlane.xlu0 %2986 }
0x3208   : > { %4305 = vrcp.f32 %v2987_v37 }
0x320e   : > { %v4306_v19 = vpop.eup %4305  ;;  %v2930_v20 = vpop.xlane.xlu1 %2929 }
0x320f   : > { %v2989_v21 = vmul.f32 %v4306_v19, %v4298_v62  ;;  %4307 = vrcp.f32 %v2930_v20 }
0x3211   : > { %v2990_v23 = vpack.c.bf16 %v2989_v21, %v2989_v21 }
0x3213   : > { %3931 = vmatmul.msk.bf16.vlgmr.msra.gmra.mxu2 %vm2382_vm4, %v2990_v23 }
0x3215   : > { %v4308_v61 = vpop.eup %4307 }
0x3216   : > { %v2932_v25 = vmul.f32 %v4308_v61, %v4300_v2 }
0x3217   : > { %v3099_v22 = vpop.xlane.xlu1 %3098 }
0x3218   : > { %v2933_v26 = vpack.c.bf16 %v2932_v25, %v2932_v25 }
0x321a   : > { %3929 = vmatmul.msk.bf16.vlgmr.msra.gmra.mxu0 %vm2382_vm4, %v2933_v26  ;;  %v3048_v27 = vpop.permute.xlu0 %3047  ;;  %v4028_v26 = vld [vmem:[%s5253_s17 + $0x18] sm:$0xff] }
0x321b   : > { %v3053_v28 = vsel %vm1714_vm11, %v3048_v27, 0  ;;  %3289 = vmatpush.bf16.msra.mxu1 %v4028_v26  ;;  %v4027_v27 = vld [vmem:[%s5253_s17 + $0x10] sm:$0xff] }
0x321c   : > { %3062 = vmatpush.bf16.msrb.mxu0 %v3053_v28 }
0x321f   : > { %v3043_v29 = vpop.xlane.xlu1 %3042  ;;  %3290 = vmatpush.bf16.msra.mxu1 %v4027_v27 }
0x3220   : > { %4309 = vrcp.f32 %v3043_v29  ;;  %3246 = vmatpush.bf16.msra.mxu0 %v4024_v6  ;;  %v4026_v29 = vld [vmem:[%s5253_s17 + $0x8] sm:$0xff] }
0x3221   : > { %4311 = vrcp.f32 %v3099_v22 }
0x3223   : > { %3291 = vmatpush.bf16.msra.mxu1 %v4026_v29 }
0x3224   : > { %3247 = vmatpush.bf16.msra.mxu0 %v4023_v11 }
0x3226   : > { %v4310_v30 = vpop.eup %4309 }
0x3227   : > { %v3045_v31 = vmul.f32 %v4310_v30, %v4304_v16  ;;  %v4312_v33 = vpop.eup %4311  ;;  %v4025_v30 = vld [vmem:[%s5253_s17] sm:$0xff] }
0x3228   : > { %v3101_v35 = vmul.f32 %v4312_v33, %v4302_v13  ;;  %3292 = vmatpush.bf16.msra.mxu1 %v4025_v30 }
0x3229   : > { %v3046_v32 = vpack.c.bf16 %v3045_v31, %v3045_v31  ;;  %v4142_v31 = vld [vmem:[%s5254_s21] ss:$0 sm:$0xff]  ;;  %s5258_s21 = sld [smem:[#allocation34_spill]] }
0x322a   : > { %v3102_v10 = vpack.c.bf16 %v3101_v35, %v3101_v35 }
0x322b   : > { %3933 = vmatmul.msk.bf16.vlgmr.msrb.gmra.mxu0 %vm2382_vm4, %v3046_v32 }
0x3237   : > { %v3104_v36 = vpop.permute.xlu1 %3103 }
0x3238   : > { %v3109_v38 = vsel %vm1714_vm11, %v3104_v36, 0 }
0x3239   : > { %3118 = vmatpush.bf16.msrb.mxu2 %v3109_v38 }
0x323c   : > { %3935 = vmatmul.msk.bf16.vlgmr.msrb.gmra.mxu2 %vm2382_vm4, %v3102_v10  ;;  %v4143_v10 = vld [vmem:[%s5255_s24] ss:$0 sm:$0xff] }
0x3296   : > { %v3008_v34 = vpop.f32.mrf.mxu2 }
0x3297   : > { %v2951_v39 = vpop.f32.mrf.mxu0  ;;  %3125 = vrot.lane.b32.xlu2 %v3008_v34, %s5246_s2 }
0x329e   : > { %v3010_v40 = vpop.f32.mrf.mxu2 }
0x329f   : > { %v2953_v41 = vpop.f32.mrf.mxu0 }
0x32a8   : > { %v3064_v42 = vpop.f32.mrf.mxu0 }
0x32a9   : > { %3129 = vrot.lane.b32.xlu0 %v3064_v42, %s5247_s16 }
0x32b0   : > { %v3066_v43 = vpop.f32.mrf.mxu0 }
0x32bf   : > { %v3120_v44 = vpop.f32.mrf.mxu2 }
0x32c0   : > { %3133 = vrot.lane.b32.xlu2 %v3120_v44, %s5249_s19 }
0x32c7   : > { %v3122_v45 = vpop.f32.mrf.mxu2 }
0x32f1   : > { %v3126_v48 = vpop.permute.xlu2 %3125 }
0x32f2   : > { %v3136_v49 = vsel %vm2382_vm4, %v2951_v39, %v3126_v48 }
0x331a   : > { %v3134_v51 = vpop.permute.xlu2 %3133 }
0x331b   : > { %v3130_v50 = vpop.permute.xlu0 %3129 }
0x331c   : > { %v3137_v52 = vsel %vm1133_vm0, %v3136_v49, %v3130_v50  ;;  %v4144_v49 = vld [vmem:[%s5256_s14] ss:$0 sm:$0xff] }
0x331d   : > { %v3138_v53 = vsel %vm2618_vm12, %v3137_v52, %v3134_v51  ;;  %v4145_v50 = vld [vmem:[%s5257_s25] ss:$0 sm:$0xff]  ;;  %s5259_s25 = sld [smem:[#allocation35_spill]] }
0x331e   : > { %v3139_v54 = vpack.c.bf16 %v3138_v53, %v3138_v53  ;;  %v4030_v53 = vld [vmem:[%s5258_s21 + $0x8] sm:$0xff] }
0x331f   : > { %3388 = vmatpush.bf16.msra.mxu2 %v4030_v53 }
0x3320   : > { %3944 = vmatmul.msk.bf16.vlgmr.msrb.gmra.mxu3 %vm1157_vm5, %v3139_v54  ;;  %v4029_v54 = vld [vmem:[%s5258_s21] sm:$0xff] }
0x3323   : > { %3389 = vmatpush.bf16.msra.mxu2 %v4029_v54  ;;  %v4146_v11 = vld [vmem:[%s5259_s25] ss:$0 sm:$0xff] }
0x33a3   : > { %v3167_v55 = vpop.f32.mrf.mxu3 }
0x33a4   : > { %v3168_v56 = vadd.f32 %v4139_v7, %v3167_v55 }
0x33a6   : > { %3172 = vrot.lane.b32.xlu0 %v3168_v56, %s5232_s6 }
0x33ab   : > { %v3169_v57 = vpop.f32.mrf.mxu3 }
0x3418   : > { %v3173_v58 = vpop.permute.xlu0 %3172 }
0x3419   : > { %v3175_v59 = vadd.f32 %v3173_v58, %v4941_v24 }
0x341b   : > { %3177 = vrot.lane.b32.xlu2 %v3175_v59, %s5226_s23 }
0x3475   : > { %v3178_v60 = vpop.permute.xlu2 %3177 }
0x3476   : > { %v3180_v62 = vsel %vm1157_vm5, %v3178_v60, 0.0 }
0x3477   : > { %3181 = vadd.xlane.f32.xlu1 %v3180_v62 }
0x34ea   : > { %v3182_v63 = vpop.xlane.xlu1 %3181 }
0x34eb   : > { %v3183_v0 = vmul.f32 %v3182_v63, %v4907_v18 }
0x34ed   : > { %v3184_v1 = vsub.f32 %v3175_v59, %v3183_v0 }
0x34ef   : > { %v3185_v2 = vmul.f32 %v3184_v1, %v3184_v1 }
0x34f1   : > { %3187 = vrot.lane.b32.xlu0 %v3185_v2, %s5226_s23 }
0x34f9   : > { %3208 = vrot.lane.b32.xlu0 %v4140_v3, %s5232_s6 }
0x3501   : > { %3214 = vrot.lane.b32.xlu0 %v4141_v4, %s5232_s6 }
0x3563   : > { %v3188_v24 = vpop.permute.xlu0 %3187 }
0x3564   : > { %v3190_v5 = vsel %vm1157_vm5, %v3188_v24, 0.0 }
0x3565   : > { %3191 = vadd.xlane.f32.xlu2 %v3190_v5 }
0x356b   : > { %v3209_v16 = vpop.permute.xlu0 %3208 }
0x3573   : > { %v3215_v23 = vpop.permute.xlu0 %3214 }
0x35d8   : > { %v3192_v8 = vpop.xlane.xlu2 %3191 }
0x35d9   : > { %v3193_v9 = vmul.f32 %v3192_v8, %v4907_v18 }
0x35db   : > { %v3194_v12 = vadd.f32 1e-05, %v3193_v9 }
0x35dd   : > { %4313 = vrsqrt.f32 %v3194_v12  ;;  %vm3201_vm8 = vweird.f32 %v3194_v12 }
0x35e3   : > { %v4314_v13 = vpop.eup %4313 }
0x35e4   : > { %v3196_v14 = vmul.f32 %v4314_v13, %v3194_v12  ;;  %vm3202_vm7 = vweird.f32 %v4314_v13 }
0x35e5   : > { %vm3203_vm9 = vmor %vm3201_vm8, %vm3202_vm7 }
0x35e6   : > { %v3197_v15 = vmul.f32 %v4314_v13, %v3196_v14  ;;  %v3349_v14 = vld [vmem:[%s5259_s25] sm:$0x1] }
0x35e8   : > { %v3198_v17 = vmul.f32 0.5, %v3197_v15 }
0x35ea   : > { %v3199_v37 = vsub.f32 1.5, %v3198_v17 }
0x35ec   : > { %v3200_v19 = vmul.f32 %v4314_v13, %v3199_v37 }
0x35ee   : > { %v3204_v20 = vsel %vm3203_vm9, %v4314_v13, %v3200_v19 }
0x35ef   : > { %v3205_v21 = vmul.f32 %v3204_v20, %v3184_v1 }
0x35f1   : > { %v3211_v61 = vmul.f32 %v3209_v16, %v3205_v21 }
0x35f3   : > { %v3217_v25 = vadd.f32 %v3215_v23, %v3211_v61 }
0x35f5   : > { %v3218_v22 = vpack.c.bf16 %v3217_v25, %v3217_v25 }
0x35f7   : > { %3223 = vrot.lane.b32.xlu0 %v3218_v22, %s5226_s23 }
0x3669   : > { %v3224_v28 = vpop.permute.xlu0 %3223 }
0x366a   : > { %3953 = vmatmul.msk.bf16.vlgmr.msra.gmra.mxu0 %vm1157_vm5, %v3224_v28 }
0x36e7   : > { %v3249_v32 = vpop.f32.mrf.mxu0 }
0x36e8   : > { %v3250_v33 = vadd.f32 %v4142_v31, %v3249_v32 }
0x36ea   : > { %v3253_v35 = vmax.f32 %v3250_v33, 0.0 }
0x36ec   : > { %v3254_v36 = vpack.c.bf16 %v3253_v35, %v3253_v35 }
0x36ee   : > { %3970 = vmatmul.msk.bf16.vlgmr.msra.gmra.mxu1 %vm2770_vm1, %v3254_v36 }
0x36ef   : > { %v3251_v38 = vpop.f32.mrf.mxu0 }
0x376b   : > { %v3294_v34 = vpop.f32.mrf.mxu1 }
0x376c   : > { %v3295_v39 = vadd.f32 %v4143_v10, %v3294_v34 }
0x376e   : > { %3299 = vrot.lane.b32.xlu0 %v3295_v39, %s5232_s6 }
0x3773   : > { %v3296_v40 = vpop.f32.mrf.mxu1 }
0x37e0   : > { %v3300_v41 = vpop.permute.xlu0 %3299 }
0x37e1   : > { %v3302_v42 = vadd.f32 %v3300_v41, %v3217_v25 }
0x37e3   : > { %3304 = vrot.lane.b32.xlu0 %v3302_v42, %s5226_s23 }
0x3855   : > { %v3305_v43 = vpop.permute.xlu0 %3304 }
0x3856   : > { %v3307_v44 = vsel %vm1157_vm5, %v3305_v43, 0.0 }
0x3857   : > { %3308 = vadd.xlane.f32.xlu1 %v3307_v44 }
0x3870   : > { %3335 = vrot.lane.b32.xlu1 %v4144_v49, %s5232_s6 }
0x3878   : > { %3402 = vrot.lane.b32.xlu1 %v4030_v53, %s5232_s6 }
0x38ca   : > { %v3309_v45 = vpop.xlane.xlu1 %3308 }
0x38cb   : > { %v3310_v46 = vmul.f32 %v3309_v45, %v4907_v18 }
0x38cd   : > { %v3311_v47 = vsub.f32 %v3302_v42, %v3310_v46 }
0x38cf   : > { %v3312_v48 = vmul.f32 %v3311_v47, %v3311_v47 }
0x38d1   : > { %3314 = vrot.lane.b32.xlu2 %v3312_v48, %s5226_s23 }
0x38d9   : > { %3341 = vrot.lane.b32.xlu2 %v4145_v50, %s5232_s6 }
0x38e1   : > { %3400 = vrot.lane.b32.xlu2 %v4029_v54, %s5232_s6 }
0x38e2   : > { %v3336_v1 = vpop.permute.xlu1 %3335 }
0x38ea   : > { %v3403_v8 = vpop.permute.xlu1 %3402 }
0x38eb   : > { %3418 = vmatpush.bf16.msra.mxu3 %v3403_v8 }
0x392b   : > { %v3315_v51 = vpop.permute.xlu2 %3314 }
0x392c   : > { %v3317_v52 = vsel %vm1157_vm5, %v3315_v51, 0.0 }
0x392d   : > { %3318 = vadd.xlane.f32.xlu0 %v3317_v52 }
0x3933   : > { %v3342_v3 = vpop.permute.xlu2 %3341 }
0x393b   : > { %v3401_v9 = vpop.permute.xlu2 %3400 }
0x393c   : > { %3419 = vmatpush.bf16.msra.mxu3 %v3401_v9 }
0x3941   : > { %3406 = vrot.lane.b32.xlu0 %v4146_v11, %s5232_s6 }
0x39a0   : > { %v3319_v7 = vpop.xlane.xlu0 %3318 }
0x39a1   : > { %v3320_v55 = vmul.f32 %v3319_v7, %v4907_v18 }
0x39a3   : > { %v3321_v56 = vadd.f32 1e-05, %v3320_v55 }
0x39a5   : > { %4315 = vrsqrt.f32 %v3321_v56  ;;  %vm3328_vm14 = vweird.f32 %v3321_v56 }
0x39ab   : > { %v4316_v57 = vpop.eup %4315 }
0x39ac   : > { %v3323_v58 = vmul.f32 %v4316_v57, %v3321_v56  ;;  %vm3329_vm13 = vweird.f32 %v4316_v57 }
0x39ad   : > { %vm3330_vm15 = vmor %vm3328_vm14, %vm3329_vm13 }
0x39ae   : > { %v3324_v59 = vmul.f32 %v4316_v57, %v3323_v58 }
0x39b0   : > { %v3325_v60 = vmul.f32 0.5, %v3324_v59 }
0x39b2   : > { %v3326_v62 = vsub.f32 1.5, %v3325_v60 }
0x39b3   : > { %v3407_v20 = vpop.permute.xlu0 %3406 }
0x39b4   : > { %v3327_v63 = vmul.f32 %v4316_v57, %v3326_v62 }
0x39b6   : > { %v3331_v0 = vsel %vm3330_vm15, %v4316_v57, %v3327_v63 }
0x39b7   : > { %v3332_v2 = vmul.f32 %v3331_v0, %v3311_v47 }
0x39b9   : > { %v3338_v4 = vmul.f32 %v3336_v1, %v3332_v2 }
0x39bb   : > { %v3344_v24 = vadd.f32 %v3342_v3, %v3338_v4 }
0x39bd   : > { %v3360_v18 = vpack.c.bf16 %v3344_v24, %v3344_v24 }
0x39bf   : > { %v3362_v5 = vshrl.u32 %v3360_v18, 16  ;;  %3398 = vrot.lane.b32.xlu1 %v3360_v18, %s5226_s23 }
0x39c1   : > { %v3364_v6 = vrot.slane %v3362_v5, 3 }
0x39c3   : > { %3365 = vrot.lane.b32.xlu2 %v3364_v6, %s5226_s23 }
0x3a1d   : > { %v3366_v12 = vpop.permute.xlu2 %3365 }
0x3a1e   : > { %3979 = vmatmul.msk.bf16.vlgmr.msra.gmra.mxu2 %vm1157_vm5, %v3366_v12 }
0x3a31   : > { %v3399_v13 = vpop.permute.xlu1 %3398 }
0x3a32   : > { %3980 = vmatmul.msk.bf16.vlgmr.msra.gmra.mxu3 %vm1157_vm5, %v3399_v13 }
0x3aa1   : > { %v3391_v15 = vpop.f32.mrf.mxu2 }
0x3aa2   : > { %v3392_v16 = vadd.f32 %v3391_v15, %v3349_v14 }
0x3aa4   : > { %v3425_v17 = vmul.f32 0.35355338, %v3392_v16 }
0x3aa6   : > { %v3426_v37 = vpack.c.bf16 %v3425_v17, %v3425_v17 }
0x3aa8   : > { %3483 = vrot.lane.b32.xlu2 %v3426_v37, %s5238_s5 }
0x3aa9   : > { %v3393_v19 = vpop.f32.mrf.mxu2 }
0x3ab0   : > { %3595 = vrot.lane.b32.xlu2 %v3426_v37, %s5241_s13 }
0x3ab5   : > { %v3421_v21 = vpop.f32.mrf.mxu3 }
0x3ab6   : > { %v3422_v23 = vadd.f32 %v3421_v21, %v3407_v20 }
0x3ab8   : > { %v5050_v61 = vpack.c.bf16 %v3422_v23, %v3422_v23  ;;  %3539 = vrot.lane.b32.xlu2 %v3426_v37, %s5239_s9 }
0x3aba   : > { %3485 = vrot.lane.b32.xlu1 %v5050_v61, %s5238_s5  ;;  %v3432_v25 = vsel %vm2382_vm4, %v5050_v61, 0  ;;  %s5260_s5 = sld [smem:[#allocation36_spill]] }
0x3abb   : > { %3441 = vmatpush.bf16.xpose.msrb.mxu0 %v3432_v25 }
0x3abd   : > { %v3423_v22 = vpop.f32.mrf.mxu3 }
0x3ac2   : > { %3597 = vrot.lane.b32.xlu1 %v5050_v61, %s5241_s13  ;;  %3981 = vmatmul.msk.bf16.vlgmr.msrb.gmra.mxu0 %vm2382_vm4, %v3426_v37  ;;  %s3734_s13 = scalar_lea.hbm %s4644_s4, %s4667_s0  ;;  %s4353_s0 = scalar_lea.hbm %s4644_s4, 2 }
0x3ac3   : > { %s3738_s23 = sshll.u32 %s3734_s13, 4  ;;  %s3739_s23 = int_to_ptr.hbm [resolvable:$true] %s3738_s23 }
0x3aca   : > { %3541 = vrot.lane.b32.xlu1 %v5050_v61, %s5239_s9  ;;  %s1115_s9 = sand.u32 1, %s4387_s10  }
0x3b02   : > { %v3484_v28 = vpop.permute.xlu2 %3483 }
0x3b0a   : > { %v3596_v31 = vpop.permute.xlu2 %3595 }
0x3b12   : > { %v3540_v38 = vpop.permute.xlu2 %3539 }
0x3b2c   : > { %v3486_v26 = vpop.permute.xlu1 %3485 }
0x3b2d   : > { %v3491_v27 = vsel %vm2382_vm4, %v3486_v26, 0 }
0x3b2e   : > { %3500 = vmatpush.bf16.xpose.msrb.mxu2 %v3491_v27 }
0x3b34   : > { %v3598_v29 = vpop.permute.xlu1 %3597 }
0x3b35   : > { %v3603_v30 = vsel %vm2382_vm4, %v3598_v29, 0  ;;  %3983 = vmatmul.msk.bf16.vlgmr.msrb.gmra.mxu2 %vm2382_vm4, %v3484_v28 }
0x3b36   : > { %3612 = vmatpush.bf16.xpose.msra.mxu2 %v3603_v30 }
0x3b3c   : > { %v3542_v32 = vpop.permute.xlu1 %3541 }
0x3b3d   : > { %v3547_v33 = vsel %vm2382_vm4, %v3542_v32, 0 }
0x3b3e   : > { %3556 = vmatpush.bf16.xpose.msra.mxu0 %v3547_v33 }
0x3b3f   : > { %v3443_v35 = vpop.f32.mrf.mxu0 }
0x3b40   : > { %v3448_v36 = vsel %vm3447_vm3, %v3443_v35, -inf }
0x3b41   : > { %3449 = vmax.xlane.f32.xlu1 %v3448_v36  ;;  %v4032_v36 = vld [vmem:[%s5260_s5 + $0x8] sm:$0xff] }
0x3b45   : > { %3985 = vmatmul.msk.bf16.vlgmr.msra.gmra.mxu0 %vm2382_vm4, %v3540_v38  ;;  %3987 = vmatmul.msk.bf16.vlgmr.msra.gmra.mxu2 %vm2382_vm4, %v3596_v31  ;;  %v4031_v38 = vld [vmem:[%s5260_s5] sm:$0xff] }
0x3b46   : > { %3688 = vmatpush.bf16.msrb.mxu0 %v4032_v36 }
0x3b47   : > { %v3445_v10 = vpop.f32.mrf.mxu0 }
0x3b48   : > { %v4034_v10 = vld [vmem:[%s4634_s20 + $0x8] sm:$0xff] }
0x3b4a   : > { %3689 = vmatpush.bf16.msrb.mxu0 %v4031_v38 }
0x3bb4   : > { %v3450_v40 = vpop.xlane.xlu1 %3449 }
0x3bb5   : > { %v3451_v41 = vsub.f32 %v3443_v35, %v3450_v40 }
0x3bb7   : > { %v3452_v45 = vmul.f32 1.442695, %v3451_v41 }
0x3bb8   : > { %v3502_v34 = vpop.f32.mrf.mxu2 }
0x3bb9   : > { %v3506_v39 = vsel %vm3447_vm3, %v3502_v34, -inf  ;;  %4317 = vpow2.f32 %v3452_v45  ;;  %v4033_v45 = vld [vmem:[%s4634_s20] sm:$0xff] }
0x3bba   : > { %3507 = vmax.xlane.f32.xlu0 %v3506_v39 }
0x3bbf   : > { %v4318_v49 = vpop.eup %4317 }
0x3bc0   : > { %v3504_v42 = vpop.f32.mrf.mxu2  ;;  %v3454_v51 = vsel %vm3447_vm3, %v4318_v49, 0.0 }
0x3bc2   : > { %v3558_v43 = vpop.f32.mrf.mxu0 }
0x3bc3   : > { %v3562_v44 = vsel %vm3447_vm3, %v3558_v43, -inf }
0x3bc4   : > { %3563 = vmax.xlane.f32.xlu0 %v3562_v44 }
0x3bc8   : > { %v3614_v46 = vpop.f32.mrf.mxu2 }
0x3bc9   : > { %v3618_v47 = vsel %vm3447_vm3, %v3614_v46, -inf }
0x3bca   : > { %3619 = vmax.xlane.f32.xlu2 %v3618_v47  ;;  %v3560_v48 = vpop.f32.mrf.mxu0 }
0x3bd0   : > { %v3616_v50 = vpop.f32.mrf.mxu2 }
0x3bd2   : > { %3455 = vadd.xlane.f32.xlu2 %v3454_v51  ;;  %v3359_v51 = vld [vmem:[%s4639_s27] sm:$0x1] }
0x3bd8   : > { %3518 = vrot.lane.b32.xlu0 %v5050_v61, %s5237_s22 }
0x3be0   : > { %3630 = vrot.lane.b32.xlu0 %v5050_v61, %s5240_s3 }
0x3c2d   : > { %v3508_v52 = vpop.xlane.xlu0 %3507 }
0x3c2e   : > { %v3509_v53 = vsub.f32 %v3502_v34, %v3508_v52 }
0x3c30   : > { %v3510_v54 = vmul.f32 1.442695, %v3509_v53 }
0x3c32   : > { %4319 = vpow2.f32 %v3510_v54 }
0x3c37   : > { %v3564_v7 = vpop.xlane.xlu0 %3563 }
0x3c38   : > { %v4320_v55 = vpop.eup %4319  ;;  %v3565_v56 = vsub.f32 %v3558_v43, %v3564_v7 }
0x3c39   : > { %v3512_v57 = vsel %vm3447_vm3, %v4320_v55, 0.0 }
0x3c3a   : > { %v3566_v58 = vmul.f32 1.442695, %v3565_v56  ;;  %3513 = vadd.xlane.f32.xlu1 %v3512_v57 }
0x3c3c   : > { %4321 = vpow2.f32 %v3566_v58 }
0x3c3d   : > { %v3620_v59 = vpop.xlane.xlu2 %3619 }
0x3c3e   : > { %v3621_v60 = vsub.f32 %v3614_v46, %v3620_v59  ;;  %v3354_v46 = vld [vmem:[%s4629_s12] sm:$0x1] }
0x3c40   : > { %v3622_v62 = vmul.f32 1.442695, %v3621_v60 }
0x3c42   : > { %v4322_v63 = vpop.eup %4321  ;;  %4323 = vpow2.f32 %v3622_v62 }
0x3c43   : > { %v3568_v0 = vsel %vm3447_vm3, %v4322_v63, 0.0 }
0x3c44   : > { %3569 = vadd.xlane.f32.xlu2 %v3568_v0 }
0x3c45   : > { %v3456_v6 = vpop.xlane.xlu2 %3455 }
0x3c48   : > { %v4324_v1 = vpop.eup %4323 }
0x3c49   : > { %v3624_v4 = vsel %vm3447_vm3, %v4324_v1, 0.0 }
0x3c4a   : > { %v3519_v2 = vpop.permute.xlu0 %3518 }
0x3c4b   : > { %v3524_v3 = vsel %vm1714_vm11, %v3519_v2, 0 }
0x3c4c   : > { %3625 = vadd.xlane.f32.xlu2 %v3624_v4  ;;  %3533 = vmatpush.bf16.msrb.mxu3 %v3524_v3 }
0x3c52   : > { %v3631_v24 = vpop.permute.xlu0 %3630 }
0x3c53   : > { %v3636_v18 = vsel %vm1714_vm11, %v3631_v24, 0  ;;  %3461 = vrot.lane.b32.xlu1 %v5050_v61, %s5232_s6 }
0x3c54   : > { %3645 = vmatpush.bf16.msra.mxu3 %v3636_v18 }
0x3c64   : > { %3574 = vrot.lane.b32.xlu2 %v5050_v61, %s5236_s8  ;;  %s4347_s8 = sshra.s32 %s3739_s23, 4  ;;  %s4348_s8 = int_to_ptr.hbm [resolvable:$true] %s4347_s8 }
0x3c65   : > { %s4349_s22 = scalar_lea.hbm %s4348_s8, 1  ;;  %p4354_p0 = scmp.lt.s32.totalorder %s4348_s8, %s4644_s4 }
0x3c66   : > { %p4350_p11 = scmp.ne.s32.totalorder %s4348_s8, %s4349_s22  ;;  %p4355_p1 = scmp.lt.s32.totalorder %s4353_s0, %s4349_s22 }
0x3c68   : > { %p4351_p12 = pnand %p4350_p11, %p4684_p5  ;;  %p4356_p2 = por %p4355_p1, %p4354_p0 }
0x3c6a   : > { %p4352_p13 = pneg %p4351_p12 }
0x3c6c   : > { %p4357_p3 = pnand %p4356_p2, %p4352_p13 }
0x3cad   : > { %v3514_v5 = vpop.xlane.xlu1 %3513 }
0x3cae   : > { %4325 = vrcp.f32 %v3514_v5 }
0x3caf   : > { %4327 = vrcp.f32 %v3456_v6 }
0x3cb4   : > { %v4326_v8 = vpop.eup %4325 }
0x3cb5   : > { %v3516_v9 = vmul.f32 %v4326_v8, %v4320_v55  ;;  %v4328_v14 = vpop.eup %4327 }
0x3cb6   : > { %v3458_v15 = vmul.f32 %v4328_v14, %v4318_v49 }
0x3cb7   : > { %v3517_v11 = vpack.c.bf16 %v3516_v9, %v3516_v9  ;;  %v3570_v12 = vpop.xlane.xlu2 %3569 }
0x3cb8   : > { %v3459_v21 = vpack.c.bf16 %v3458_v15, %v3458_v15 }
0x3cb9   : > { %3984 = vmatmul.msk.bf16.vlgmr.msrb.gmra.mxu3 %vm2382_vm4, %v3517_v11 }
0x3cbf   : > { %v3626_v13 = vpop.xlane.xlu2 %3625 }
0x3cc0   : > { %4329 = vrcp.f32 %v3626_v13 }
0x3cc1   : > { %4331 = vrcp.f32 %v3570_v12 }
0x3cc5   : > { %v3462_v16 = vpop.permute.xlu1 %3461 }
0x3cc6   : > { %v4330_v17 = vpop.eup %4329  ;;  %v3467_v37 = vsel %vm1714_vm11, %v3462_v16, 0 }
0x3cc7   : > { %v3628_v19 = vmul.f32 %v4330_v17, %v4324_v1  ;;  %3476 = vmatpush.bf16.msrb.mxu1 %v3467_v37  ;;  %v3575_v20 = vpop.permute.xlu2 %3574  ;;  %v4332_v25 = vpop.eup %4331 }
0x3cc8   : > { %v3580_v23 = vsel %vm1714_vm11, %v3575_v20, 0  ;;  %v3572_v22 = vmul.f32 %v4332_v25, %v4322_v63 }
0x3cc9   : > { %v3629_v61 = vpack.c.bf16 %v3628_v19, %v3628_v19 }
0x3cca   : > { %3982 = vmatmul.msk.bf16.vlgmr.msrb.gmra.mxu1 %vm2382_vm4, %v3459_v21  ;;  %v3573_v26 = vpack.c.bf16 %v3572_v22, %v3572_v22 }
0x3ccb   : > { %3589 = vmatpush.bf16.msra.mxu1 %v3580_v23  ;;  %3988 = vmatmul.msk.bf16.vlgmr.msra.gmra.mxu3 %vm2382_vm4, %v3629_v61 }
0x3ccf   : > { %3717 = vmatpush.bf16.msrb.mxu1 %v4034_v10 }
0x3cd3   : > { %3718 = vmatpush.bf16.msrb.mxu1 %v4033_v45 }
0x3cda   : > { %3986 = vmatmul.msk.bf16.vlgmr.msra.gmra.mxu1 %vm2382_vm4, %v3573_v26 }
0x3d3c   : > { %v3535_v27 = vpop.f32.mrf.mxu3 }
0x3d3d   : > { %3652 = vrot.lane.b32.xlu0 %v3535_v27, %s5246_s2 }
0x3d44   : > { %v3537_v28 = vpop.f32.mrf.mxu3 }
0x3d47   : > { %v3478_v29 = vpop.f32.mrf.mxu1 }
0x3d4e   : > { %v3647_v30 = vpop.f32.mrf.mxu3 }
0x3d4f   : > { %v3480_v31 = vpop.f32.mrf.mxu1  ;;  %3660 = vrot.lane.b32.xlu0 %v3647_v30, %s5249_s19  ;;  %s1116_s19 = scalar_lea.vmem [#allocation2], %s1115_s9 }
0x3d50   : > { %s3736_s6 = sshll.u32 %s1116_s19, 4  ;;  %s3737_s6 = int_to_ptr.vmem [resolvable:$true] %s3736_s6 }
0x3d56   : > { %v3649_v32 = vpop.f32.mrf.mxu3 }
0x3d57   : > { %v3591_v33 = vpop.f32.mrf.mxu1 }
0x3d58   : > { %3656 = vrot.lane.b32.xlu1 %v3591_v33, %s5247_s16  ;;  %s3726_s16 = scalar_lea.sflag [#allocation3], %s1115_s9 }
0x3d5f   : > { %v3593_v35 = vpop.f32.mrf.mxu1 }
0x3daf   : > { %v3653_v34 = vpop.permute.xlu0 %3652 }
0x3db0   : > { %v3663_v39 = vsel %vm2382_vm4, %v3478_v29, %v3653_v34 }
0x3dc1   : > { %v3661_v41 = vpop.permute.xlu0 %3660 }
0x3dca   : > { %v3657_v40 = vpop.permute.xlu1 %3656 }
0x3dcb   : > { %v3664_v42 = vsel %vm1133_vm0, %v3663_v39, %v3657_v40 }
0x3dcc   : > { %v3665_v43 = vsel %vm2618_vm12, %v3664_v42, %v3661_v41 }
0x3dcd   : > { %v3666_v44 = vpack.c.bf16 %v3665_v43, %v3665_v43 }
0x3dcf   : > { %3997 = vmatmul.msk.bf16.vlgmr.msrb.gmra.mxu0 %vm1157_vm5, %v3666_v44 }
0x3e4c   : > { %v3691_v47 = vpop.f32.mrf.mxu0 }
0x3e4d   : > { %v3692_v48 = vadd.f32 %v3691_v47, %v3354_v46 }
0x3e4f   : > { %v3695_v49 = vpack.c.bf16 %v3692_v48, %v3692_v48 }
0x3e51   : > { %4006 = vmatmul.msk.bf16.vlgmr.msrb.gmra.mxu1 %vm1157_vm5, %v3695_v49 }
0x3e54   : > { %v3693_v50 = vpop.f32.mrf.mxu0 }
0x3ece   : > { %v3720_v52 = vpop.f32.mrf.mxu1 }
0x3ecf   : > { %v3721_v53 = vadd.f32 %v3720_v52, %v3359_v51 }
0x3ed1   : > { %3724 = vst.msk [vmem:[%s1116_s19] sm:$0x1] %vm3447_vm3, %v3721_v53 }
0x3ed2   : > { %4360 = shalt.err (!%p4357_p3)
}
0x3ed3   : > { %4035 = dma.vmem_to_hbm [thread:$0]  (%p4684_p5), %s3737_s6, 16, %s3739_s23, %s3726_s16  }
0x3ed6   : > { %v3722_v54 = vpop.f32.mrf.mxu1 }
0x3ed7 PF: > { %p4041_p4 = scmp.ge.s32.totalorder %s4395_s15, 2  ;;  %s3750_s3 = sand.u32 1, %s4383_s7  }
0x3ed8   : > { %s3751_s14 = scalar_lea.sflag [#allocation3], %s3750_s3 }
0x3ed9   : > { %p4038_p7 = pnand %p4041_p4, %p4688_p6 }
0x3edb   : > { %p4039_p8 = pneg %p4038_p7 }
0x3edd   : > { %4378 = dma.done.wait (%p4039_p8), %s3751_s14, 16  }
0x3ede   : > { %4380 = vsyncadd (%p4039_p8), %s3751_s14, 4294967280  ;;  %p85_p9 = scmp.ge.s32.totalorder %s4671_s18, 4   ;;  %s5261_s7 = smov %s4387_s10 }
0x3edf   : > { %s5262_s10 = smov %s4391_s11  ;;  %s5263_s11 = smov %s4682_s26 }
0x3ee0   : > { %s5264_s15 = smov %s4671_s18  ;;  %87 = sbr.rel (!%p85_p9) target bundleno = 83 (0x53), region = 240 }
0x3ee5   :  { %3756 = vsyncpa [#allocation3], 1 }
0x3ee6   :  { %3758 = vsyncpa [#allocation3 + $0x1], 1 }

</bundles_post_ra>
